<compile_context>
chip_gen: v7x
topology: tpu7x:2x2x1
jax: 0.10.0
libtpu: 0.0.40
codegen_flags: <defaults>
</compile_context>

<pallas_src>
import functools

import jax
import jax.numpy as jnp
from jax import lax
from jax.experimental import pallas as pl
from jax.experimental.pallas import tpu as pltpu

LATENT_DIM = 10
IMG_CHANNELS = 1


# ------------------------------------------------------------------ stage 1 --
# fc + BN1 + ConvT1(sub-pixel) + BN2 + ReLU.  grid=(1,) (BN needs the batch).
#
# Sub-pixel decomposition of ConvTranspose2d(k=3, s=2, p=1, op=1):
#   out[2i  ,2j  ] = x[i,j]@W[1,1]
#   out[2i  ,2j+1] = x[i,j]@W[1,2] + x[i,j+1]@W[1,0]
#   out[2i+1,2j  ] = x[i,j]@W[2,1] + x[i+1,j]@W[0,1]
#   out[2i+1,2j+1] = x[i,j]@W[2,2] + x[i,j+1]@W[2,0] + x[i+1,j]@W[0,2]
#                  + x[i+1,j+1]@W[0,0]
# The four taps-per-slot are concatenated into 256-wide RHS matrices so the
# whole layer is 4 matmuls of (B*49,128)x(128,256).
def _stage1_kernel(z_ref, wfc_ref, bfc_ref, bn1w_ref, bn1b_ref,
                   wtap_ref, cb1_ref, bn2w_ref, bn2b_ref, mr_ref, md_ref,
                   o_ref, *, batch, latent, eps):
    f32 = jnp.float32
    bf16 = jnp.bfloat16

    # ---- Linear(10 -> 128*49): K=10 scalar contraction from SMEM (VPU);
    #      result lands channels-on-lanes, batch stacked on sublanes.
    hs = []
    for b in range(batch):
        acc = bfc_ref[...]                                   # (49,128)
        for k in range(latent):
            acc = acc + z_ref[b, k] * wfc_ref[k]
        hs.append(acc)
    h = jnp.concatenate(hs, axis=0)                          # (B*49,128)

    # ---- BatchNorm2d(128), training-mode batch stats (biased variance).
    n1 = float(batch * 49)
    mean1 = jnp.sum(h, axis=0, keepdims=True) / n1           # (1,128)
    var1 = jnp.sum(jnp.square(h - mean1), axis=0, keepdims=True) / n1
    x = (h - mean1) * lax.rsqrt(var1 + eps) * bn1w_ref[...] + bn1b_ref[...]

    # ---- neighbour shifts on the flattened 7x7 grid.  Masks zero the
    #      cross-row / cross-image wrap rows, so one roll over the whole
    #      (B*49) stack is exact.
    mr = mr_ref[...]                                         # (B*49,1) j<6
    md = md_ref[...]                                         # (B*49,1) i<6
    xc = x.astype(bf16)
    xr = (jnp.roll(x, -1, axis=0) * mr).astype(bf16)
    xd = (jnp.roll(x, -7, axis=0) * md).astype(bf16)
    xrd = (jnp.roll(x, -8, axis=0) * (mr * md)).astype(bf16)

    # ---- ConvTranspose2d(128->64): 4 stacked MXU matmuls, N=256.
    y = jnp.dot(xc, wtap_ref[0], preferred_element_type=f32)
    y = y + jnp.dot(xr, wtap_ref[1], preferred_element_type=f32)
    y = y + jnp.dot(xd, wtap_ref[2], preferred_element_type=f32)
    y = y + jnp.dot(xrd, wtap_ref[3], preferred_element_type=f32)
    y = y + cb1_ref[...]                                     # (B*49,256)

    # ---- BatchNorm2d(64) + ReLU; per-channel stats fold the 4 sub-pixel
    #      slots (each 64 lanes) together.
    n2 = float(batch * 4 * 49)

    def fold4(v):                                            # (1,256)->(1,64)
        return v[:, 0:64] + v[:, 64:128] + v[:, 128:192] + v[:, 192:256]

    def tile4(v):                                            # (1,64)->(1,256)
        return jnp.concatenate([v, v, v, v], axis=1)

    mean2 = tile4(fold4(jnp.sum(y, axis=0, keepdims=True)) / n2)
    var2 = tile4(fold4(jnp.sum(jnp.square(y - mean2), axis=0,
                               keepdims=True)) / n2)
    o_ref[...] = jnp.maximum(
        (y - mean2) * lax.rsqrt(var2 + eps) * bn2w_ref[...] + bn2b_ref[...],
        0.0)


# ------------------------------------------------------------------ stage 2 --
# Self-attention + ConvT(64->1) + tanh on a block of Bt images per grid step.
# q/k biases are folded host-side: terms constant along the softmax axis drop
# out exactly, the remaining one is a row-broadcast add to x@A.
def _stage2_kernel(x_ref, aqk_ref, rw_ref, wv_ref, bv_ref, w4_ref,
                   mr_ref, md_ref, gamma_ref, cb2_ref, o_ref):
    f32 = jnp.float32
    bf16 = jnp.bfloat16
    bt = x_ref.shape[0]

    x = x_ref[...]                                           # (Bt,196,64) f32
    xb = x.astype(bf16)

    # scores s[p,q] = (x[p]@A + rW) . x[q]   (A = Wq@Wk^T, rW = Wk@bq)
    xa = jnp.einsum('bpc,cd->bpd', xb, aqk_ref[...],
                    preferred_element_type=f32) + rw_ref[...]
    s = jnp.einsum('bpd,bqd->bpq', xa.astype(bf16), xb,
                   preferred_element_type=f32)               # (Bt,196,196)
    s = s - jnp.max(s, axis=-1, keepdims=True)
    e = jnp.exp(s)
    attn = e * pl.reciprocal(jnp.sum(e, axis=-1, keepdims=True), approx=True)

    v = jnp.einsum('bpc,cd->bpd', xb, wv_ref[...],
                   preferred_element_type=f32) + bv_ref[...]
    out = jnp.einsum('bpq,bqd->bpd', attn.astype(bf16), v.astype(bf16),
                     preferred_element_type=f32)
    a = gamma_ref[0] * out + x                               # residual, f32

    # ConvTranspose2d(64->1): shifted inputs concatenated on lanes (K=256),
    # one (4,256)x(256,196) matmul per image -> (4 sub-pixel maps, 196 pos).
    mr = mr_ref[...]                                         # (1,196,1) j<13
    md = md_ref[...]                                         # (1,196,1) i<13
    ar = jnp.roll(a, -1, axis=1) * mr
    ad = jnp.roll(a, -14, axis=1) * md
    ard = jnp.roll(a, -15, axis=1) * (mr * md)
    abig = jnp.concatenate([a, ar, ad, ard], axis=-1).astype(bf16)  # (Bt,196,256)

    w4 = w4_ref[...]                                         # (4,256) bf16
    cb2 = cb2_ref[0]
    for b in range(bt):
        yb = lax.dot_general(w4, abig[b], (((1,), (1,)), ((), ())),
                             preferred_element_type=f32)     # (4,196)
        o_ref[b] = jnp.tanh(yb + cb2)


def _pick_block(batch):
    """Largest divisor of batch that is <=4 and still leaves >=2 grid steps
    (keeps both v7x TensorCores busy while amortizing per-step overhead)."""
    if batch <= 1:
        return 1
    best = 1
    for c in range(1, min(4, batch) + 1):
        if batch % c == 0 and batch // c >= 2:
            best = c
    return best


# ---------------------------------------------------------- full generator --
def generator_forward(z, params):
    B = z.shape[0]
    f32 = jnp.float32
    bf16 = jnp.bfloat16

    # ---------------- host-side parameter re-layouts (tiny, pure glue) -----
    # fc (PyTorch Linear: weight (out,in)) -> (k, pos, chan) / (pos, chan)
    wfc = params["fc_w"].reshape(128, 49, LATENT_DIM).transpose(2, 1, 0).astype(f32)
    bfc = params["fc_b"].reshape(128, 49).T.astype(f32)

    # ConvT1 weight (Cin,Cout,3,3) -> per-tap (Cin,Cout), then 4 shifted-input
    # RHS matrices with each 64-lane slot owning one sub-pixel map.
    w1 = params["ct1_w"].transpose(2, 3, 0, 1).astype(f32)   # (3,3,128,64)
    z128 = jnp.zeros((128, 64), f32)
    wtap = jnp.stack([
        jnp.concatenate([w1[1, 1], w1[1, 2], w1[2, 1], w1[2, 2]], axis=1),  # center
        jnp.concatenate([z128,     w1[1, 0], z128,     w1[2, 0]], axis=1),  # right
        jnp.concatenate([z128,     z128,     w1[0, 1], w1[0, 2]], axis=1),  # down
        jnp.concatenate([z128,     z128,     z128,     w1[0, 0]], axis=1),  # diag
    ], axis=0).astype(bf16)                                  # (4,128,256)
    cb1 = jnp.tile(params["ct1_b"].reshape(1, 64), (1, 4)).astype(f32)
    bn2w = jnp.tile(params["bn2_w"].reshape(1, 64), (1, 4)).astype(f32)
    bn2b = jnp.tile(params["bn2_b"].reshape(1, 64), (1, 4)).astype(f32)

    jj7 = jnp.tile(jnp.arange(49) % 7, (B,))
    ii7 = jnp.tile(jnp.arange(49) // 7, (B,))
    mr1 = (jj7 < 6).astype(f32).reshape(B * 49, 1)
    md1 = (ii7 < 6).astype(f32).reshape(B * 49, 1)

    # Self-attention 1x1 convs (PyTorch Conv2d weight (Cout,Cin,1,1)).
    wq = params["q_w"].reshape(8, 64).T                      # (Cin,Cout)
    wk = params["k_w"].reshape(8, 64).T
    wv = params["v_w"].reshape(64, 64).T
    aqk = (wq @ wk.T).astype(bf16)                           # (64,64)
    rw = (wk @ params["q_b"]).reshape(1, 64).astype(f32)     # Wk @ bq
    # k bias only contributes softmax-row-invariant terms -> drops out exactly.
    bv = params["v_b"].reshape(1, 64).astype(f32)

    # ConvT2 weight (Cin=64,Cout=1,3,3): one (4,256) matrix, columns laid out
    # as [center | right | down | diag] x 64 channels.
    w2 = params["ct2_w"].reshape(64, 3, 3).astype(f32)
    z64 = jnp.zeros((64,), f32)
    w4 = jnp.stack([
        jnp.concatenate([w2[:, 1, 1], z64,         z64,         z64]),
        jnp.concatenate([w2[:, 1, 2], w2[:, 1, 0], z64,         z64]),
        jnp.concatenate([w2[:, 2, 1], z64,         w2[:, 0, 1], z64]),
        jnp.concatenate([w2[:, 2, 2], w2[:, 2, 0], w2[:, 0, 2], w2[:, 0, 0]]),
    ], axis=0).astype(bf16)                                  # (4,256)
    gamma = params["gamma"].reshape(1).astype(f32)
    cb2 = params["ct2_b"].reshape(1).astype(f32)

    p14 = jnp.arange(196)
    mr2 = ((p14 % 14) < 13).astype(f32).reshape(1, 196, 1)
    md2 = ((p14 // 14) < 13).astype(f32).reshape(1, 196, 1)

    # ---------------------------------------------------------- stage 1 ----
    stage1 = pl.pallas_call(
        functools.partial(_stage1_kernel, batch=B, latent=LATENT_DIM, eps=1e-5),
        out_shape=jax.ShapeDtypeStruct((B * 49, 256), f32),
        grid=(1,),
        in_specs=[
            pl.BlockSpec(memory_space=pltpu.MemorySpace.SMEM),            # z
            pl.BlockSpec((LATENT_DIM, 49, 128), lambda i: (0, 0, 0)),     # fc w
            pl.BlockSpec((49, 128), lambda i: (0, 0)),                    # fc b
            pl.BlockSpec((1, 128), lambda i: (0, 0)),                     # bn1 w
            pl.BlockSpec((1, 128), lambda i: (0, 0)),                     # bn1 b
            pl.BlockSpec((4, 128, 256), lambda i: (0, 0, 0)),             # ct1 taps
            pl.BlockSpec((1, 256), lambda i: (0, 0)),                     # ct1 b
            pl.BlockSpec((1, 256), lambda i: (0, 0)),                     # bn2 w
            pl.BlockSpec((1, 256), lambda i: (0, 0)),                     # bn2 b
            pl.BlockSpec((B * 49, 1), lambda i: (0, 0)),                  # mask j<6
            pl.BlockSpec((B * 49, 1), lambda i: (0, 0)),                  # mask i<6
        ],
        out_specs=pl.BlockSpec((B * 49, 256), lambda i: (0, 0)),
        compiler_params=pltpu.CompilerParams(
            dimension_semantics=("arbitrary",)),
    )(z.astype(f32), wfc, bfc,
      params["bn1_w"].reshape(1, 128).astype(f32),
      params["bn1_b"].reshape(1, 128).astype(f32),
      wtap, cb1, bn2w, bn2b, mr1, md1)

    # interleave the 4 sub-pixel slots -> (B, 14, 14, 64) -> (B, 196, 64)
    x2 = (stage1.reshape(B, 7, 7, 2, 2, 64)
                .transpose(0, 1, 3, 2, 4, 5)
                .reshape(B, 196, 64))

    # ---------------------------------------------------------- stage 2 ----
    bt = _pick_block(B)
    nblk = B // bt
    stage2 = pl.pallas_call(
        _stage2_kernel,
        out_shape=jax.ShapeDtypeStruct((B, 4, 196), f32),
        grid=(nblk,),
        in_specs=[
            pl.BlockSpec((bt, 196, 64), lambda b: (b, 0, 0)),             # x
            pl.BlockSpec((64, 64), lambda b: (0, 0)),                     # Wq@Wk^T
            pl.BlockSpec((1, 64), lambda b: (0, 0)),                      # Wk@bq
            pl.BlockSpec((64, 64), lambda b: (0, 0)),                     # Wv
            pl.BlockSpec((1, 64), lambda b: (0, 0)),                      # bv
            pl.BlockSpec((4, 256), lambda b: (0, 0)),                     # ct2 taps
            pl.BlockSpec((1, 196, 1), lambda b: (0, 0, 0)),               # mask j<13
            pl.BlockSpec((1, 196, 1), lambda b: (0, 0, 0)),               # mask i<13
            pl.BlockSpec(memory_space=pltpu.MemorySpace.SMEM),            # gamma
            pl.BlockSpec(memory_space=pltpu.MemorySpace.SMEM),            # ct2 b
        ],
        out_specs=pl.BlockSpec((bt, 4, 196), lambda b: (b, 0, 0)),
        compiler_params=pltpu.CompilerParams(
            dimension_semantics=("parallel",)),
    )(x2, aqk, rw, wv, bv, w4, mr2, md2, gamma, cb2)

    # interleave -> (B, 28, 28) -> NCHW (B, 1, 28, 28)
    img = (stage2.reshape(B, 2, 2, 14, 14)
                 .transpose(0, 3, 1, 4, 2)
                 .reshape(B, 28, 28)[:, None, :, :])
    return img


if __name__ == "__main__":
    B = 2
    f32 = jnp.float32

    keys = jax.random.split(jax.random.PRNGKey(0), 13)
    init = lambda k, s, sc=0.05: sc * jax.random.normal(k, s, f32)

    # Parameters in native PyTorch layouts.
    params = {
        "fc_w": init(keys[0], (128 * 49, LATENT_DIM)),       # Linear (out,in)
        "fc_b": init(keys[1], (128 * 49,)),
        "bn1_w": jnp.ones((128,), f32),
        "bn1_b": jnp.zeros((128,), f32),
        "ct1_w": init(keys[2], (128, 64, 3, 3)),             # ConvT (Cin,Cout,k,k)
        "ct1_b": init(keys[3], (64,)),
        "bn2_w": jnp.ones((64,), f32),
        "bn2_b": jnp.zeros((64,), f32),
        "q_w": init(keys[4], (8, 64, 1, 1)),                 # Conv2d (Cout,Cin,1,1)
        "q_b": init(keys[5], (8,)),
        "k_w": init(keys[6], (8, 64, 1, 1)),
        "k_b": init(keys[7], (8,)),
        "v_w": init(keys[8], (64, 64, 1, 1)),
        "v_b": init(keys[9], (64,)),
        # PyTorch inits gamma to 0 (attention branch contributes nothing);
        # use a small nonzero value so the attention path is exercised.
        "gamma": jnp.asarray([0.1], f32),
        "ct2_w": init(keys[10], (64, IMG_CHANNELS, 3, 3)),
        "ct2_b": init(keys[11], (IMG_CHANNELS,)),
    }

    z = jax.random.normal(keys[12], (B, LATENT_DIM), f32)
    img = jax.jit(lambda zz: generator_forward(zz, params))(z)
    img = jax.block_until_ready(img)
    assert img.shape == (B, IMG_CHANNELS, 28, 28)
    assert bool(jnp.all(jnp.isfinite(img)))
    print("KERNEL_OK")
</pallas_src>

<mosaic_0001>
module attributes {stable_mosaic.version = 11 : i64} {
  func.func @_stage1_kernel(%arg0: i32, %arg1: memref<2x10xf32, #tpu.memory_space<smem>>, %arg2: memref<10x49x128xf32, #tpu.memory_space<vmem>>, %arg3: memref<49x128xf32, #tpu.memory_space<vmem>>, %arg4: memref<1x128xf32, #tpu.memory_space<vmem>>, %arg5: memref<1x128xf32, #tpu.memory_space<vmem>>, %arg6: memref<4x128x256xbf16, #tpu.memory_space<vmem>>, %arg7: memref<1x256xf32, #tpu.memory_space<vmem>>, %arg8: memref<1x256xf32, #tpu.memory_space<vmem>>, %arg9: memref<1x256xf32, #tpu.memory_space<vmem>>, %arg10: memref<98x1xf32, #tpu.memory_space<vmem>>, %arg11: memref<98x1xf32, #tpu.memory_space<vmem>>, %arg12: memref<98x256xf32, #tpu.memory_space<vmem>>) attributes {dimension_semantics = [#tpu.dimension_semantics<arbitrary>], iteration_bounds = array<i64: 1>, scalar_prefetch = 0 : i64, scratch_operands = 0 : i64, tpu.core_type = #tpu.core_type<tc>, window_params = [{transform_indices = @transform_0, window_bounds = array<i64: 2, 10>}, {pipeline_mode = #tpu.pipeline_mode<synchronous>, transform_indices = @transform_1, window_bounds = array<i64: 10, 49, 128>}, {pipeline_mode = #tpu.pipeline_mode<synchronous>, transform_indices = @transform_2, window_bounds = array<i64: 49, 128>}, {pipeline_mode = #tpu.pipeline_mode<synchronous>, transform_indices = @transform_3, window_bounds = array<i64: 1, 128>}, {pipeline_mode = #tpu.pipeline_mode<synchronous>, transform_indices = @transform_4, window_bounds = array<i64: 1, 128>}, {pipeline_mode = #tpu.pipeline_mode<synchronous>, transform_indices = @transform_5, window_bounds = array<i64: 4, 128, 256>}, {pipeline_mode = #tpu.pipeline_mode<synchronous>, transform_indices = @transform_6, window_bounds = array<i64: 1, 256>}, {pipeline_mode = #tpu.pipeline_mode<synchronous>, transform_indices = @transform_7, window_bounds = array<i64: 1, 256>}, {pipeline_mode = #tpu.pipeline_mode<synchronous>, transform_indices = @transform_8, window_bounds = array<i64: 1, 256>}, {pipeline_mode = #tpu.pipeline_mode<synchronous>, transform_indices = @transform_9, window_bounds = array<i64: 98, 1>}, {pipeline_mode = #tpu.pipeline_mode<synchronous>, transform_indices = @transform_10, window_bounds = array<i64: 98, 1>}, {pipeline_mode = #tpu.pipeline_mode<synchronous>, transform_indices = @transform_11, window_bounds = array<i64: 98, 256>}]} {
    %c0 = arith.constant 0 : index
    %c0_0 = arith.constant 0 : index
    %0 = vector.load %arg3[%c0, %c0_0] : memref<49x128xf32, #tpu.memory_space<vmem>>, vector<49x128xf32>
    %c0_1 = arith.constant 0 : index
    %c0_2 = arith.constant 0 : index
    %1 = memref.load %arg1[%c0_1, %c0_2] : memref<2x10xf32, #tpu.memory_space<smem>>
    %c0_3 = arith.constant 0 : index
    %c0_4 = arith.constant 0 : index
    %c0_5 = arith.constant 0 : index
    %2 = vector.load %arg2[%c0_3, %c0_4, %c0_5] : memref<10x49x128xf32, #tpu.memory_space<vmem>>, vector<1x49x128xf32>
    %3 = vector.shape_cast %2 : vector<1x49x128xf32> to vector<49x128xf32>
    %4 = vector.broadcast %1 : f32 to vector<49x128xf32>
    %5 = arith.mulf %4, %3 : vector<49x128xf32>
    %6 = arith.addf %0, %5 : vector<49x128xf32>
    %c0_6 = arith.constant 0 : index
    %c1 = arith.constant 1 : index
    %7 = memref.load %arg1[%c0_6, %c1] : memref<2x10xf32, #tpu.memory_space<smem>>
    %c1_7 = arith.constant 1 : index
    %c0_8 = arith.constant 0 : index
    %c0_9 = arith.constant 0 : index
    %8 = vector.load %arg2[%c1_7, %c0_8, %c0_9] : memref<10x49x128xf32, #tpu.memory_space<vmem>>, vector<1x49x128xf32>
    %9 = vector.shape_cast %8 : vector<1x49x128xf32> to vector<49x128xf32>
    %10 = vector.broadcast %7 : f32 to vector<49x128xf32>
    %11 = arith.mulf %10, %9 : vector<49x128xf32>
    %12 = arith.addf %6, %11 : vector<49x128xf32>
    %c0_10 = arith.constant 0 : index
    %c2 = arith.constant 2 : index
    %13 = memref.load %arg1[%c0_10, %c2] : memref<2x10xf32, #tpu.memory_space<smem>>
    %c2_11 = arith.constant 2 : index
    %c0_12 = arith.constant 0 : index
    %c0_13 = arith.constant 0 : index
    %14 = vector.load %arg2[%c2_11, %c0_12, %c0_13] : memref<10x49x128xf32, #tpu.memory_space<vmem>>, vector<1x49x128xf32>
    %15 = vector.shape_cast %14 : vector<1x49x128xf32> to vector<49x128xf32>
    %16 = vector.broadcast %13 : f32 to vector<49x128xf32>
    %17 = arith.mulf %16, %15 : vector<49x128xf32>
    %18 = arith.addf %12, %17 : vector<49x128xf32>
    %c0_14 = arith.constant 0 : index
    %c3 = arith.constant 3 : index
    %19 = memref.load %arg1[%c0_14, %c3] : memref<2x10xf32, #tpu.memory_space<smem>>
    %c3_15 = arith.constant 3 : index
    %c0_16 = arith.constant 0 : index
    %c0_17 = arith.constant 0 : index
    %20 = vector.load %arg2[%c3_15, %c0_16, %c0_17] : memref<10x49x128xf32, #tpu.memory_space<vmem>>, vector<1x49x128xf32>
    %21 = vector.shape_cast %20 : vector<1x49x128xf32> to vector<49x128xf32>
    %22 = vector.broadcast %19 : f32 to vector<49x128xf32>
    %23 = arith.mulf %22, %21 : vector<49x128xf32>
    %24 = arith.addf %18, %23 : vector<49x128xf32>
    %c0_18 = arith.constant 0 : index
    %c4 = arith.constant 4 : index
    %25 = memref.load %arg1[%c0_18, %c4] : memref<2x10xf32, #tpu.memory_space<smem>>
    %c4_19 = arith.constant 4 : index
    %c0_20 = arith.constant 0 : index
    %c0_21 = arith.constant 0 : index
    %26 = vector.load %arg2[%c4_19, %c0_20, %c0_21] : memref<10x49x128xf32, #tpu.memory_space<vmem>>, vector<1x49x128xf32>
    %27 = vector.shape_cast %26 : vector<1x49x128xf32> to vector<49x128xf32>
    %28 = vector.broadcast %25 : f32 to vector<49x128xf32>
    %29 = arith.mulf %28, %27 : vector<49x128xf32>
    %30 = arith.addf %24, %29 : vector<49x128xf32>
    %c0_22 = arith.constant 0 : index
    %c5 = arith.constant 5 : index
    %31 = memref.load %arg1[%c0_22, %c5] : memref<2x10xf32, #tpu.memory_space<smem>>
    %c5_23 = arith.constant 5 : index
    %c0_24 = arith.constant 0 : index
    %c0_25 = arith.constant 0 : index
    %32 = vector.load %arg2[%c5_23, %c0_24, %c0_25] : memref<10x49x128xf32, #tpu.memory_space<vmem>>, vector<1x49x128xf32>
    %33 = vector.shape_cast %32 : vector<1x49x128xf32> to vector<49x128xf32>
    %34 = vector.broadcast %31 : f32 to vector<49x128xf32>
    %35 = arith.mulf %34, %33 : vector<49x128xf32>
    %36 = arith.addf %30, %35 : vector<49x128xf32>
    %c0_26 = arith.constant 0 : index
    %c6 = arith.constant 6 : index
    %37 = memref.load %arg1[%c0_26, %c6] : memref<2x10xf32, #tpu.memory_space<smem>>
    %c6_27 = arith.constant 6 : index
    %c0_28 = arith.constant 0 : index
    %c0_29 = arith.constant 0 : index
    %38 = vector.load %arg2[%c6_27, %c0_28, %c0_29] : memref<10x49x128xf32, #tpu.memory_space<vmem>>, vector<1x49x128xf32>
    %39 = vector.shape_cast %38 : vector<1x49x128xf32> to vector<49x128xf32>
    %40 = vector.broadcast %37 : f32 to vector<49x128xf32>
    %41 = arith.mulf %40, %39 : vector<49x128xf32>
    %42 = arith.addf %36, %41 : vector<49x128xf32>
    %c0_30 = arith.constant 0 : index
    %c7 = arith.constant 7 : index
    %43 = memref.load %arg1[%c0_30, %c7] : memref<2x10xf32, #tpu.memory_space<smem>>
    %c7_31 = arith.constant 7 : index
    %c0_32 = arith.constant 0 : index
    %c0_33 = arith.constant 0 : index
    %44 = vector.load %arg2[%c7_31, %c0_32, %c0_33] : memref<10x49x128xf32, #tpu.memory_space<vmem>>, vector<1x49x128xf32>
    %45 = vector.shape_cast %44 : vector<1x49x128xf32> to vector<49x128xf32>
    %46 = vector.broadcast %43 : f32 to vector<49x128xf32>
    %47 = arith.mulf %46, %45 : vector<49x128xf32>
    %48 = arith.addf %42, %47 : vector<49x128xf32>
    %c0_34 = arith.constant 0 : index
    %c8 = arith.constant 8 : index
    %49 = memref.load %arg1[%c0_34, %c8] : memref<2x10xf32, #tpu.memory_space<smem>>
    %c8_35 = arith.constant 8 : index
    %c0_36 = arith.constant 0 : index
    %c0_37 = arith.constant 0 : index
    %50 = vector.load %arg2[%c8_35, %c0_36, %c0_37] : memref<10x49x128xf32, #tpu.memory_space<vmem>>, vector<1x49x128xf32>
    %51 = vector.shape_cast %50 : vector<1x49x128xf32> to vector<49x128xf32>
    %52 = vector.broadcast %49 : f32 to vector<49x128xf32>
    %53 = arith.mulf %52, %51 : vector<49x128xf32>
    %54 = arith.addf %48, %53 : vector<49x128xf32>
    %c0_38 = arith.constant 0 : index
    %c9 = arith.constant 9 : index
    %55 = memref.load %arg1[%c0_38, %c9] : memref<2x10xf32, #tpu.memory_space<smem>>
    %c9_39 = arith.constant 9 : index
    %c0_40 = arith.constant 0 : index
    %c0_41 = arith.constant 0 : index
    %56 = vector.load %arg2[%c9_39, %c0_40, %c0_41] : memref<10x49x128xf32, #tpu.memory_space<vmem>>, vector<1x49x128xf32>
    %57 = vector.shape_cast %56 : vector<1x49x128xf32> to vector<49x128xf32>
    %58 = vector.broadcast %55 : f32 to vector<49x128xf32>
    %59 = arith.mulf %58, %57 : vector<49x128xf32>
    %60 = arith.addf %54, %59 : vector<49x128xf32>
    %c0_42 = arith.constant 0 : index
    %c0_43 = arith.constant 0 : index
    %61 = vector.load %arg3[%c0_42, %c0_43] : memref<49x128xf32, #tpu.memory_space<vmem>>, vector<49x128xf32>
    %c1_44 = arith.constant 1 : index
    %c0_45 = arith.constant 0 : index
    %62 = memref.load %arg1[%c1_44, %c0_45] : memref<2x10xf32, #tpu.memory_space<smem>>
    %c0_46 = arith.constant 0 : index
    %c0_47 = arith.constant 0 : index
    %c0_48 = arith.constant 0 : index
    %63 = vector.load %arg2[%c0_46, %c0_47, %c0_48] : memref<10x49x128xf32, #tpu.memory_space<vmem>>, vector<1x49x128xf32>
    %64 = vector.shape_cast %63 : vector<1x49x128xf32> to vector<49x128xf32>
    %65 = vector.broadcast %62 : f32 to vector<49x128xf32>
    %66 = arith.mulf %65, %64 : vector<49x128xf32>
    %67 = arith.addf %61, %66 : vector<49x128xf32>
    %c1_49 = arith.constant 1 : index
    %c1_50 = arith.constant 1 : index
    %68 = memref.load %arg1[%c1_49, %c1_50] : memref<2x10xf32, #tpu.memory_space<smem>>
    %c1_51 = arith.constant 1 : index
    %c0_52 = arith.constant 0 : index
    %c0_53 = arith.constant 0 : index
    %69 = vector.load %arg2[%c1_51, %c0_52, %c0_53] : memref<10x49x128xf32, #tpu.memory_space<vmem>>, vector<1x49x128xf32>
    %70 = vector.shape_cast %69 : vector<1x49x128xf32> to vector<49x128xf32>
    %71 = vector.broadcast %68 : f32 to vector<49x128xf32>
    %72 = arith.mulf %71, %70 : vector<49x128xf32>
    %73 = arith.addf %67, %72 : vector<49x128xf32>
    %c1_54 = arith.constant 1 : index
    %c2_55 = arith.constant 2 : index
    %74 = memref.load %arg1[%c1_54, %c2_55] : memref<2x10xf32, #tpu.memory_space<smem>>
    %c2_56 = arith.constant 2 : index
    %c0_57 = arith.constant 0 : index
    %c0_58 = arith.constant 0 : index
    %75 = vector.load %arg2[%c2_56, %c0_57, %c0_58] : memref<10x49x128xf32, #tpu.memory_space<vmem>>, vector<1x49x128xf32>
    %76 = vector.shape_cast %75 : vector<1x49x128xf32> to vector<49x128xf32>
    %77 = vector.broadcast %74 : f32 to vector<49x128xf32>
    %78 = arith.mulf %77, %76 : vector<49x128xf32>
    %79 = arith.addf %73, %78 : vector<49x128xf32>
    %c1_59 = arith.constant 1 : index
    %c3_60 = arith.constant 3 : index
    %80 = memref.load %arg1[%c1_59, %c3_60] : memref<2x10xf32, #tpu.memory_space<smem>>
    %c3_61 = arith.constant 3 : index
    %c0_62 = arith.constant 0 : index
    %c0_63 = arith.constant 0 : index
    %81 = vector.load %arg2[%c3_61, %c0_62, %c0_63] : memref<10x49x128xf32, #tpu.memory_space<vmem>>, vector<1x49x128xf32>
    %82 = vector.shape_cast %81 : vector<1x49x128xf32> to vector<49x128xf32>
    %83 = vector.broadcast %80 : f32 to vector<49x128xf32>
    %84 = arith.mulf %83, %82 : vector<49x128xf32>
    %85 = arith.addf %79, %84 : vector<49x128xf32>
    %c1_64 = arith.constant 1 : index
    %c4_65 = arith.constant 4 : index
    %86 = memref.load %arg1[%c1_64, %c4_65] : memref<2x10xf32, #tpu.memory_space<smem>>
    %c4_66 = arith.constant 4 : index
    %c0_67 = arith.constant 0 : index
    %c0_68 = arith.constant 0 : index
    %87 = vector.load %arg2[%c4_66, %c0_67, %c0_68] : memref<10x49x128xf32, #tpu.memory_space<vmem>>, vector<1x49x128xf32>
    %88 = vector.shape_cast %87 : vector<1x49x128xf32> to vector<49x128xf32>
    %89 = vector.broadcast %86 : f32 to vector<49x128xf32>
    %90 = arith.mulf %89, %88 : vector<49x128xf32>
    %91 = arith.addf %85, %90 : vector<49x128xf32>
    %c1_69 = arith.constant 1 : index
    %c5_70 = arith.constant 5 : index
    %92 = memref.load %arg1[%c1_69, %c5_70] : memref<2x10xf32, #tpu.memory_space<smem>>
    %c5_71 = arith.constant 5 : index
    %c0_72 = arith.constant 0 : index
    %c0_73 = arith.constant 0 : index
    %93 = vector.load %arg2[%c5_71, %c0_72, %c0_73] : memref<10x49x128xf32, #tpu.memory_space<vmem>>, vector<1x49x128xf32>
    %94 = vector.shape_cast %93 : vector<1x49x128xf32> to vector<49x128xf32>
    %95 = vector.broadcast %92 : f32 to vector<49x128xf32>
    %96 = arith.mulf %95, %94 : vector<49x128xf32>
    %97 = arith.addf %91, %96 : vector<49x128xf32>
    %c1_74 = arith.constant 1 : index
    %c6_75 = arith.constant 6 : index
    %98 = memref.load %arg1[%c1_74, %c6_75] : memref<2x10xf32, #tpu.memory_space<smem>>
    %c6_76 = arith.constant 6 : index
    %c0_77 = arith.constant 0 : index
    %c0_78 = arith.constant 0 : index
    %99 = vector.load %arg2[%c6_76, %c0_77, %c0_78] : memref<10x49x128xf32, #tpu.memory_space<vmem>>, vector<1x49x128xf32>
    %100 = vector.shape_cast %99 : vector<1x49x128xf32> to vector<49x128xf32>
    %101 = vector.broadcast %98 : f32 to vector<49x128xf32>
    %102 = arith.mulf %101, %100 : vector<49x128xf32>
    %103 = arith.addf %97, %102 : vector<49x128xf32>
    %c1_79 = arith.constant 1 : index
    %c7_80 = arith.constant 7 : index
    %104 = memref.load %arg1[%c1_79, %c7_80] : memref<2x10xf32, #tpu.memory_space<smem>>
    %c7_81 = arith.constant 7 : index
    %c0_82 = arith.constant 0 : index
    %c0_83 = arith.constant 0 : index
    %105 = vector.load %arg2[%c7_81, %c0_82, %c0_83] : memref<10x49x128xf32, #tpu.memory_space<vmem>>, vector<1x49x128xf32>
    %106 = vector.shape_cast %105 : vector<1x49x128xf32> to vector<49x128xf32>
    %107 = vector.broadcast %104 : f32 to vector<49x128xf32>
    %108 = arith.mulf %107, %106 : vector<49x128xf32>
    %109 = arith.addf %103, %108 : vector<49x128xf32>
    %c1_84 = arith.constant 1 : index
    %c8_85 = arith.constant 8 : index
    %110 = memref.load %arg1[%c1_84, %c8_85] : memref<2x10xf32, #tpu.memory_space<smem>>
    %c8_86 = arith.constant 8 : index
    %c0_87 = arith.constant 0 : index
    %c0_88 = arith.constant 0 : index
    %111 = vector.load %arg2[%c8_86, %c0_87, %c0_88] : memref<10x49x128xf32, #tpu.memory_space<vmem>>, vector<1x49x128xf32>
    %112 = vector.shape_cast %111 : vector<1x49x128xf32> to vector<49x128xf32>
    %113 = vector.broadcast %110 : f32 to vector<49x128xf32>
    %114 = arith.mulf %113, %112 : vector<49x128xf32>
    %115 = arith.addf %109, %114 : vector<49x128xf32>
    %c1_89 = arith.constant 1 : index
    %c9_90 = arith.constant 9 : index
    %116 = memref.load %arg1[%c1_89, %c9_90] : memref<2x10xf32, #tpu.memory_space<smem>>
    %c9_91 = arith.constant 9 : index
    %c0_92 = arith.constant 0 : index
    %c0_93 = arith.constant 0 : index
    %117 = vector.load %arg2[%c9_91, %c0_92, %c0_93] : memref<10x49x128xf32, #tpu.memory_space<vmem>>, vector<1x49x128xf32>
    %118 = vector.shape_cast %117 : vector<1x49x128xf32> to vector<49x128xf32>
    %119 = vector.broadcast %116 : f32 to vector<49x128xf32>
    %120 = arith.mulf %119, %118 : vector<49x128xf32>
    %121 = arith.addf %115, %120 : vector<49x128xf32>
    %122 = tpu.concatenate %60, %121 in 0 : vector<49x128xf32>, vector<49x128xf32> -> vector<98x128xf32>
    %cst = arith.constant dense<0.000000e+00> : vector<128xf32>
    %123 = vector.multi_reduction <add>, %122, %cst [0] : vector<98x128xf32> to vector<128xf32>
    %124 = vector.shape_cast %123 : vector<128xf32> to vector<1x128xf32>
    %cst_94 = arith.constant 9.800000e+01 : f32
    %125 = vector.broadcast %cst_94 : f32 to vector<1x128xf32>
    %126 = arith.divf %124, %125 : vector<1x128xf32>
    %127 = vector.broadcast %126 : vector<1x128xf32> to vector<98x128xf32>
    %128 = arith.subf %122, %127 : vector<98x128xf32>
    %129 = arith.mulf %128, %128 : vector<98x128xf32>
    %cst_95 = arith.constant dense<0.000000e+00> : vector<128xf32>
    %130 = vector.multi_reduction <add>, %129, %cst_95 [0] : vector<98x128xf32> to vector<128xf32>
    %131 = vector.shape_cast %130 : vector<128xf32> to vector<1x128xf32>
    %cst_96 = arith.constant 9.800000e+01 : f32
    %132 = vector.broadcast %cst_96 : f32 to vector<1x128xf32>
    %133 = arith.divf %131, %132 : vector<1x128xf32>
    %134 = vector.broadcast %126 : vector<1x128xf32> to vector<98x128xf32>
    %135 = arith.subf %122, %134 : vector<98x128xf32>
    %cst_97 = arith.constant 9.99999974E-6 : f32
    %136 = vector.broadcast %cst_97 : f32 to vector<1x128xf32>
    %137 = arith.addf %133, %136 : vector<1x128xf32>
    %138 = math.rsqrt %137 : vector<1x128xf32>
    %139 = vector.broadcast %138 : vector<1x128xf32> to vector<98x128xf32>
    %140 = arith.mulf %135, %139 : vector<98x128xf32>
    %c0_98 = arith.constant 0 : index
    %c0_99 = arith.constant 0 : index
    %141 = vector.load %arg4[%c0_98, %c0_99] : memref<1x128xf32, #tpu.memory_space<vmem>>, vector<1x128xf32>
    %142 = vector.broadcast %141 : vector<1x128xf32> to vector<98x128xf32>
    %143 = arith.mulf %140, %142 : vector<98x128xf32>
    %c0_100 = arith.constant 0 : index
    %c0_101 = arith.constant 0 : index
    %144 = vector.load %arg5[%c0_100, %c0_101] : memref<1x128xf32, #tpu.memory_space<vmem>>, vector<1x128xf32>
    %145 = vector.broadcast %144 : vector<1x128xf32> to vector<98x128xf32>
    %146 = arith.addf %143, %145 : vector<98x128xf32>
    %c0_102 = arith.constant 0 : index
    %c0_103 = arith.constant 0 : index
    %147 = vector.load %arg10[%c0_102, %c0_103] : memref<98x1xf32, #tpu.memory_space<vmem>>, vector<98x1xf32>
    %c0_104 = arith.constant 0 : index
    %c0_105 = arith.constant 0 : index
    %148 = vector.load %arg11[%c0_104, %c0_105] : memref<98x1xf32, #tpu.memory_space<vmem>>, vector<98x1xf32>
    %149 = arith.truncf %146 : vector<98x128xf32> to vector<98x128xbf16>
    %150 = vector.extract_strided_slice %146 {offsets = [1, 0], sizes = [97, 128], strides = [1, 1]} : vector<98x128xf32> to vector<97x128xf32>
    %151 = vector.extract_strided_slice %146 {offsets = [0, 0], sizes = [1, 128], strides = [1, 1]} : vector<98x128xf32> to vector<1x128xf32>
    %152 = tpu.concatenate %150, %151 in 0 : vector<97x128xf32>, vector<1x128xf32> -> vector<98x128xf32>
    %153 = vector.broadcast %147 : vector<98x1xf32> to vector<98x128xf32>
    %154 = arith.mulf %152, %153 : vector<98x128xf32>
    %155 = arith.truncf %154 : vector<98x128xf32> to vector<98x128xbf16>
    %156 = vector.extract_strided_slice %146 {offsets = [7, 0], sizes = [91, 128], strides = [1, 1]} : vector<98x128xf32> to vector<91x128xf32>
    %157 = vector.extract_strided_slice %146 {offsets = [0, 0], sizes = [7, 128], strides = [1, 1]} : vector<98x128xf32> to vector<7x128xf32>
    %158 = tpu.concatenate %156, %157 in 0 : vector<91x128xf32>, vector<7x128xf32> -> vector<98x128xf32>
    %159 = vector.broadcast %148 : vector<98x1xf32> to vector<98x128xf32>
    %160 = arith.mulf %158, %159 : vector<98x128xf32>
    %161 = arith.truncf %160 : vector<98x128xf32> to vector<98x128xbf16>
    %162 = vector.extract_strided_slice %146 {offsets = [8, 0], sizes = [90, 128], strides = [1, 1]} : vector<98x128xf32> to vector<90x128xf32>
    %163 = vector.extract_strided_slice %146 {offsets = [0, 0], sizes = [8, 128], strides = [1, 1]} : vector<98x128xf32> to vector<8x128xf32>
    %164 = tpu.concatenate %162, %163 in 0 : vector<90x128xf32>, vector<8x128xf32> -> vector<98x128xf32>
    %165 = arith.mulf %147, %148 : vector<98x1xf32>
    %166 = vector.broadcast %165 : vector<98x1xf32> to vector<98x128xf32>
    %167 = arith.mulf %164, %166 : vector<98x128xf32>
    %168 = arith.truncf %167 : vector<98x128xf32> to vector<98x128xbf16>
    %c0_106 = arith.constant 0 : index
    %c0_107 = arith.constant 0 : index
    %c0_108 = arith.constant 0 : index
    %169 = vector.load %arg6[%c0_106, %c0_107, %c0_108] : memref<4x128x256xbf16, #tpu.memory_space<vmem>>, vector<1x128x256xbf16>
    %170 = vector.shape_cast %169 : vector<1x128x256xbf16> to vector<128x256xbf16>
    %cst_109 = arith.constant dense<0.000000e+00> : vector<98x256xf32>
    %171 = tpu.matmul %149, %170, %cst_109 {dimension_numbers = #tpu.dot_dimension_numbers<[1], [0], [0], [1], [0, 0, 1, 1], [], []>} : vector<98x128xbf16>, vector<128x256xbf16>, vector<98x256xf32> -> vector<98x256xf32>
    %c1_110 = arith.constant 1 : index
    %c0_111 = arith.constant 0 : index
    %c0_112 = arith.constant 0 : index
    %172 = vector.load %arg6[%c1_110, %c0_111, %c0_112] : memref<4x128x256xbf16, #tpu.memory_space<vmem>>, vector<1x128x256xbf16>
    %173 = vector.shape_cast %172 : vector<1x128x256xbf16> to vector<128x256xbf16>
    %cst_113 = arith.constant dense<0.000000e+00> : vector<98x256xf32>
    %174 = tpu.matmul %155, %173, %cst_113 {dimension_numbers = #tpu.dot_dimension_numbers<[1], [0], [0], [1], [0, 0, 1, 1], [], []>} : vector<98x128xbf16>, vector<128x256xbf16>, vector<98x256xf32> -> vector<98x256xf32>
    %175 = arith.addf %171, %174 : vector<98x256xf32>
    %c2_114 = arith.constant 2 : index
    %c0_115 = arith.constant 0 : index
    %c0_116 = arith.constant 0 : index
    %176 = vector.load %arg6[%c2_114, %c0_115, %c0_116] : memref<4x128x256xbf16, #tpu.memory_space<vmem>>, vector<1x128x256xbf16>
    %177 = vector.shape_cast %176 : vector<1x128x256xbf16> to vector<128x256xbf16>
    %cst_117 = arith.constant dense<0.000000e+00> : vector<98x256xf32>
    %178 = tpu.matmul %161, %177, %cst_117 {dimension_numbers = #tpu.dot_dimension_numbers<[1], [0], [0], [1], [0, 0, 1, 1], [], []>} : vector<98x128xbf16>, vector<128x256xbf16>, vector<98x256xf32> -> vector<98x256xf32>
    %179 = arith.addf %175, %178 : vector<98x256xf32>
    %c3_118 = arith.constant 3 : index
    %c0_119 = arith.constant 0 : index
    %c0_120 = arith.constant 0 : index
    %180 = vector.load %arg6[%c3_118, %c0_119, %c0_120] : memref<4x128x256xbf16, #tpu.memory_space<vmem>>, vector<1x128x256xbf16>
    %181 = vector.shape_cast %180 : vector<1x128x256xbf16> to vector<128x256xbf16>
    %cst_121 = arith.constant dense<0.000000e+00> : vector<98x256xf32>
    %182 = tpu.matmul %168, %181, %cst_121 {dimension_numbers = #tpu.dot_dimension_numbers<[1], [0], [0], [1], [0, 0, 1, 1], [], []>} : vector<98x128xbf16>, vector<128x256xbf16>, vector<98x256xf32> -> vector<98x256xf32>
    %183 = arith.addf %179, %182 : vector<98x256xf32>
    %c0_122 = arith.constant 0 : index
    %c0_123 = arith.constant 0 : index
    %184 = vector.load %arg7[%c0_122, %c0_123] : memref<1x256xf32, #tpu.memory_space<vmem>>, vector<1x256xf32>
    %185 = vector.broadcast %184 : vector<1x256xf32> to vector<98x256xf32>
    %186 = arith.addf %183, %185 : vector<98x256xf32>
    %cst_124 = arith.constant dense<0.000000e+00> : vector<256xf32>
    %187 = vector.multi_reduction <add>, %186, %cst_124 [0] : vector<98x256xf32> to vector<256xf32>
    %188 = vector.shape_cast %187 : vector<256xf32> to vector<1x256xf32>
    %189 = vector.extract_strided_slice %188 {offsets = [0, 0], sizes = [1, 64], strides = [1, 1]} : vector<1x256xf32> to vector<1x64xf32>
    %190 = vector.extract_strided_slice %188 {offsets = [0, 64], sizes = [1, 64], strides = [1, 1]} : vector<1x256xf32> to vector<1x64xf32>
    %191 = arith.addf %189, %190 : vector<1x64xf32>
    %192 = vector.extract_strided_slice %188 {offsets = [0, 128], sizes = [1, 64], strides = [1, 1]} : vector<1x256xf32> to vector<1x64xf32>
    %193 = arith.addf %191, %192 : vector<1x64xf32>
    %194 = vector.extract_strided_slice %188 {offsets = [0, 192], sizes = [1, 64], strides = [1, 1]} : vector<1x256xf32> to vector<1x64xf32>
    %195 = arith.addf %193, %194 : vector<1x64xf32>
    %cst_125 = arith.constant 3.920000e+02 : f32
    %196 = vector.broadcast %cst_125 : f32 to vector<1x64xf32>
    %197 = arith.divf %195, %196 : vector<1x64xf32>
    %198 = tpu.concatenate %197, %197, %197, %197 in 1 : vector<1x64xf32>, vector<1x64xf32>, vector<1x64xf32>, vector<1x64xf32> -> vector<1x256xf32>
    %199 = vector.broadcast %198 : vector<1x256xf32> to vector<98x256xf32>
    %200 = arith.subf %186, %199 : vector<98x256xf32>
    %201 = arith.mulf %200, %200 : vector<98x256xf32>
    %cst_126 = arith.constant dense<0.000000e+00> : vector<256xf32>
    %202 = vector.multi_reduction <add>, %201, %cst_126 [0] : vector<98x256xf32> to vector<256xf32>
    %203 = vector.shape_cast %202 : vector<256xf32> to vector<1x256xf32>
    %204 = vector.extract_strided_slice %203 {offsets = [0, 0], sizes = [1, 64], strides = [1, 1]} : vector<1x256xf32> to vector<1x64xf32>
    %205 = vector.extract_strided_slice %203 {offsets = [0, 64], sizes = [1, 64], strides = [1, 1]} : vector<1x256xf32> to vector<1x64xf32>
    %206 = arith.addf %204, %205 : vector<1x64xf32>
    %207 = vector.extract_strided_slice %203 {offsets = [0, 128], sizes = [1, 64], strides = [1, 1]} : vector<1x256xf32> to vector<1x64xf32>
    %208 = arith.addf %206, %207 : vector<1x64xf32>
    %209 = vector.extract_strided_slice %203 {offsets = [0, 192], sizes = [1, 64], strides = [1, 1]} : vector<1x256xf32> to vector<1x64xf32>
    %210 = arith.addf %208, %209 : vector<1x64xf32>
    %cst_127 = arith.constant 3.920000e+02 : f32
    %211 = vector.broadcast %cst_127 : f32 to vector<1x64xf32>
    %212 = arith.divf %210, %211 : vector<1x64xf32>
    %213 = tpu.concatenate %212, %212, %212, %212 in 1 : vector<1x64xf32>, vector<1x64xf32>, vector<1x64xf32>, vector<1x64xf32> -> vector<1x256xf32>
    %214 = vector.broadcast %198 : vector<1x256xf32> to vector<98x256xf32>
    %215 = arith.subf %186, %214 : vector<98x256xf32>
    %cst_128 = arith.constant 9.99999974E-6 : f32
    %216 = vector.broadcast %cst_128 : f32 to vector<1x256xf32>
    %217 = arith.addf %213, %216 : vector<1x256xf32>
    %218 = math.rsqrt %217 : vector<1x256xf32>
    %219 = vector.broadcast %218 : vector<1x256xf32> to vector<98x256xf32>
    %220 = arith.mulf %215, %219 : vector<98x256xf32>
    %c0_129 = arith.constant 0 : index
    %c0_130 = arith.constant 0 : index
    %221 = vector.load %arg8[%c0_129, %c0_130] : memref<1x256xf32, #tpu.memory_space<vmem>>, vector<1x256xf32>
    %222 = vector.broadcast %221 : vector<1x256xf32> to vector<98x256xf32>
    %223 = arith.mulf %220, %222 : vector<98x256xf32>
    %c0_131 = arith.constant 0 : index
    %c0_132 = arith.constant 0 : index
    %224 = vector.load %arg9[%c0_131, %c0_132] : memref<1x256xf32, #tpu.memory_space<vmem>>, vector<1x256xf32>
    %225 = vector.broadcast %224 : vector<1x256xf32> to vector<98x256xf32>
    %226 = arith.addf %223, %225 : vector<98x256xf32>
    %cst_133 = arith.constant 0.000000e+00 : f32
    %227 = vector.broadcast %cst_133 : f32 to vector<98x256xf32>
    %228 = arith.maximumf %226, %227 : vector<98x256xf32>
    %c0_134 = arith.constant 0 : index
    %c0_135 = arith.constant 0 : index
    %229 = vector.load %arg12[%c0_134, %c0_135] : memref<98x256xf32, #tpu.memory_space<vmem>>, vector<98x256xf32>
    tpu.vector_store %arg12[%c0_134, %c0_135], %228 {strides = array<i32>} : memref<98x256xf32, #tpu.memory_space<vmem>>, vector<98x256xf32>,
    return
  }
  func.func @transform_0(%arg0: i32) -> (i32, i32) {
    %c0_i32 = arith.constant 0 : i32
    %c0_i32_0 = arith.constant 0 : i32
    %c0_i32_1 = arith.constant 0 : i32
    return %c0_i32, %c0_i32_0 : i32, i32
  }
  func.func @transform_1(%arg0: i32) -> (i32, i32, i32) {
    %c0_i32 = arith.constant 0 : i32
    %c0_i32_0 = arith.constant 0 : i32
    %c0_i32_1 = arith.constant 0 : i32
    %c0_i32_2 = arith.constant 0 : i32
    return %c0_i32, %c0_i32_0, %c0_i32_1 : i32, i32, i32
  }
  func.func @transform_2(%arg0: i32) -> (i32, i32) {
    %c0_i32 = arith.constant 0 : i32
    %c0_i32_0 = arith.constant 0 : i32
    %c0_i32_1 = arith.constant 0 : i32
    return %c0_i32, %c0_i32_0 : i32, i32
  }
  func.func @transform_3(%arg0: i32) -> (i32, i32) {
    %c0_i32 = arith.constant 0 : i32
    %c0_i32_0 = arith.constant 0 : i32
    %c0_i32_1 = arith.constant 0 : i32
    return %c0_i32, %c0_i32_0 : i32, i32
  }
  func.func @transform_4(%arg0: i32) -> (i32, i32) {
    %c0_i32 = arith.constant 0 : i32
    %c0_i32_0 = arith.constant 0 : i32
    %c0_i32_1 = arith.constant 0 : i32
    return %c0_i32, %c0_i32_0 : i32, i32
  }
  func.func @transform_5(%arg0: i32) -> (i32, i32, i32) {
    %c0_i32 = arith.constant 0 : i32
    %c0_i32_0 = arith.constant 0 : i32
    %c0_i32_1 = arith.constant 0 : i32
    %c0_i32_2 = arith.constant 0 : i32
    return %c0_i32, %c0_i32_0, %c0_i32_1 : i32, i32, i32
  }
  func.func @transform_6(%arg0: i32) -> (i32, i32) {
    %c0_i32 = arith.constant 0 : i32
    %c0_i32_0 = arith.constant 0 : i32
    %c0_i32_1 = arith.constant 0 : i32
    return %c0_i32, %c0_i32_0 : i32, i32
  }
  func.func @transform_7(%arg0: i32) -> (i32, i32) {
    %c0_i32 = arith.constant 0 : i32
    %c0_i32_0 = arith.constant 0 : i32
    %c0_i32_1 = arith.constant 0 : i32
    return %c0_i32, %c0_i32_0 : i32, i32
  }
  func.func @transform_8(%arg0: i32) -> (i32, i32) {
    %c0_i32 = arith.constant 0 : i32
    %c0_i32_0 = arith.constant 0 : i32
    %c0_i32_1 = arith.constant 0 : i32
    return %c0_i32, %c0_i32_0 : i32, i32
  }
  func.func @transform_9(%arg0: i32) -> (i32, i32) {
    %c0_i32 = arith.constant 0 : i32
    %c0_i32_0 = arith.constant 0 : i32
    %c0_i32_1 = arith.constant 0 : i32
    return %c0_i32, %c0_i32_0 : i32, i32
  }
  func.func @transform_10(%arg0: i32) -> (i32, i32) {
    %c0_i32 = arith.constant 0 : i32
    %c0_i32_0 = arith.constant 0 : i32
    %c0_i32_1 = arith.constant 0 : i32
    return %c0_i32, %c0_i32_0 : i32, i32
  }
  func.func @transform_11(%arg0: i32) -> (i32, i32) {
    %c0_i32 = arith.constant 0 : i32
    %c0_i32_0 = arith.constant 0 : i32
    %c0_i32_1 = arith.constant 0 : i32
    return %c0_i32, %c0_i32_0 : i32, i32
  }
}

module attributes {stable_mosaic.version = 11 : i64} {
  func.func @_stage2_kernel(%arg0: i32, %arg1: memref<1x196x64xf32, #tpu.memory_space<vmem>>, %arg2: memref<64x64xbf16, #tpu.memory_space<vmem>>, %arg3: memref<1x64xf32, #tpu.memory_space<vmem>>, %arg4: memref<64x64xf32, #tpu.memory_space<vmem>>, %arg5: memref<1x64xf32, #tpu.memory_space<vmem>>, %arg6: memref<4x256xbf16, #tpu.memory_space<vmem>>, %arg7: memref<1x196x1xf32, #tpu.memory_space<vmem>>, %arg8: memref<1x196x1xf32, #tpu.memory_space<vmem>>, %arg9: memref<1xf32, #tpu.memory_space<smem>>, %arg10: memref<1xf32, #tpu.memory_space<smem>>, %arg11: memref<1x4x196xf32, #tpu.memory_space<vmem>>) attributes {dimension_semantics = [#tpu.dimension_semantics<parallel>], iteration_bounds = array<i64: 2>, scalar_prefetch = 0 : i64, scratch_operands = 0 : i64, tpu.core_type = #tpu.core_type<tc>, window_params = [{transform_indices = @transform_0, window_bounds = array<i64: 1, 196, 64>}, {pipeline_mode = #tpu.pipeline_mode<synchronous>, transform_indices = @transform_1, window_bounds = array<i64: 64, 64>}, {pipeline_mode = #tpu.pipeline_mode<synchronous>, transform_indices = @transform_2, window_bounds = array<i64: 1, 64>}, {pipeline_mode = #tpu.pipeline_mode<synchronous>, transform_indices = @transform_3, window_bounds = array<i64: 64, 64>}, {pipeline_mode = #tpu.pipeline_mode<synchronous>, transform_indices = @transform_4, window_bounds = array<i64: 1, 64>}, {pipeline_mode = #tpu.pipeline_mode<synchronous>, transform_indices = @transform_5, window_bounds = array<i64: 4, 256>}, {pipeline_mode = #tpu.pipeline_mode<synchronous>, transform_indices = @transform_6, window_bounds = array<i64: 1, 196, 1>}, {pipeline_mode = #tpu.pipeline_mode<synchronous>, transform_indices = @transform_7, window_bounds = array<i64: 1, 196, 1>}, {transform_indices = @transform_8, window_bounds = array<i64: 1>}, {transform_indices = @transform_9, window_bounds = array<i64: 1>}, {transform_indices = @transform_10, window_bounds = array<i64: 1, 4, 196>}]} {
    %c0 = arith.constant 0 : index
    %c0_0 = arith.constant 0 : index
    %c0_1 = arith.constant 0 : index
    %0 = vector.load %arg1[%c0, %c0_0, %c0_1] : memref<1x196x64xf32, #tpu.memory_space<vmem>>, vector<1x196x64xf32>
    %1 = arith.truncf %0 : vector<1x196x64xf32> to vector<1x196x64xbf16>
    %c0_2 = arith.constant 0 : index
    %c0_3 = arith.constant 0 : index
    %2 = vector.load %arg2[%c0_2, %c0_3] : memref<64x64xbf16, #tpu.memory_space<vmem>>, vector<64x64xbf16>
    "tpu.trace_start"() <{level = 10 : i32, message = "bpc,cd->bpd"}> : () -> ()
    %cst = arith.constant dense<0.000000e+00> : vector<1x196x64xf32>
    %3 = tpu.matmul %1, %2, %cst {dimension_numbers = #tpu.dot_dimension_numbers<[2], [0], [0, 1], [1], [0, 0, 0, 1, 1, 1], [], []>} : vector<1x196x64xbf16>, vector<64x64xbf16>, vector<1x196x64xf32> -> vector<1x196x64xf32>
    "tpu.trace_stop"() : () -> ()
    %c0_4 = arith.constant 0 : index
    %c0_5 = arith.constant 0 : index
    %4 = vector.load %arg3[%c0_4, %c0_5] : memref<1x64xf32, #tpu.memory_space<vmem>>, vector<1x64xf32>
    %5 = vector.shape_cast %4 : vector<1x64xf32> to vector<1x1x64xf32>
    %6 = vector.broadcast %5 : vector<1x1x64xf32> to vector<1x196x64xf32>
    %7 = arith.addf %3, %6 : vector<1x196x64xf32>
    %8 = arith.truncf %7 : vector<1x196x64xf32> to vector<1x196x64xbf16>
    "tpu.trace_start"() <{level = 10 : i32, message = "bpd,bqd->bpq"}> : () -> ()
    %cst_6 = arith.constant dense<0.000000e+00> : vector<1x196x196xf32>
    %9 = tpu.matmul %8, %1, %cst_6 {dimension_numbers = #tpu.dot_dimension_numbers<[2], [2], [1], [1], [0, 0, 0, 1, 1, 1], [0], [0]>} : vector<1x196x64xbf16>, vector<1x196x64xbf16>, vector<1x196x196xf32> -> vector<1x196x196xf32>
    "tpu.trace_stop"() : () -> ()
    %cst_7 = arith.constant dense<0xFF800000> : vector<1x196xf32>
    %10 = vector.multi_reduction <maximumf>, %9, %cst_7 [2] : vector<1x196x196xf32> to vector<1x196xf32>
    %11 = vector.shape_cast %10 : vector<1x196xf32> to vector<1x196x1xf32>
    %12 = vector.broadcast %11 : vector<1x196x1xf32> to vector<1x196x196xf32>
    %13 = arith.subf %9, %12 : vector<1x196x196xf32>
    %14 = math.exp %13 : vector<1x196x196xf32>
    %cst_8 = arith.constant dense<0.000000e+00> : vector<1x196xf32>
    %15 = vector.multi_reduction <add>, %14, %cst_8 [2] : vector<1x196x196xf32> to vector<1x196xf32>
    %16 = vector.shape_cast %15 : vector<1x196xf32> to vector<1x196x1xf32>
    %17 = tpu.reciprocal %16 {approx = true} : vector<1x196x1xf32> -> vector<1x196x1xf32>
    %18 = vector.broadcast %17 : vector<1x196x1xf32> to vector<1x196x196xf32>
    %19 = arith.mulf %14, %18 : vector<1x196x196xf32>
    %c0_9 = arith.constant 0 : index
    %c0_10 = arith.constant 0 : index
    %20 = vector.load %arg4[%c0_9, %c0_10] : memref<64x64xf32, #tpu.memory_space<vmem>>, vector<64x64xf32>
    "tpu.trace_start"() <{level = 10 : i32, message = "bpc,cd->bpd"}> : () -> ()
    %cst_11 = arith.constant dense<0.000000e+00> : vector<1x196x64xf32>
    %21 = tpu.matmul %1, %20, %cst_11 {dimension_numbers = #tpu.dot_dimension_numbers<[2], [0], [0, 1], [1], [0, 0, 0, 1, 1, 1], [], []>} : vector<1x196x64xbf16>, vector<64x64xf32>, vector<1x196x64xf32> -> vector<1x196x64xf32>
    "tpu.trace_stop"() : () -> ()
    %c0_12 = arith.constant 0 : index
    %c0_13 = arith.constant 0 : index
    %22 = vector.load %arg5[%c0_12, %c0_13] : memref<1x64xf32, #tpu.memory_space<vmem>>, vector<1x64xf32>
    %23 = vector.shape_cast %22 : vector<1x64xf32> to vector<1x1x64xf32>
    %24 = vector.broadcast %23 : vector<1x1x64xf32> to vector<1x196x64xf32>
    %25 = arith.addf %21, %24 : vector<1x196x64xf32>
    %26 = arith.truncf %19 : vector<1x196x196xf32> to vector<1x196x196xbf16>
    %27 = arith.truncf %25 : vector<1x196x64xf32> to vector<1x196x64xbf16>
    "tpu.trace_start"() <{level = 10 : i32, message = "bpq,bqd->bpd"}> : () -> ()
    %cst_14 = arith.constant dense<0.000000e+00> : vector<1x196x64xf32>
    %28 = tpu.matmul %26, %27, %cst_14 {dimension_numbers = #tpu.dot_dimension_numbers<[2], [1], [1], [2], [0, 0, 0, 1, 1, 2], [0], [0]>} : vector<1x196x196xbf16>, vector<1x196x64xbf16>, vector<1x196x64xf32> -> vector<1x196x64xf32>
    "tpu.trace_stop"() : () -> ()
    %c0_15 = arith.constant 0 : index
    %29 = memref.load %arg9[%c0_15] : memref<1xf32, #tpu.memory_space<smem>>
    %30 = vector.broadcast %29 : f32 to vector<1x196x64xf32>
    %31 = arith.mulf %30, %28 : vector<1x196x64xf32>
    %32 = arith.addf %31, %0 : vector<1x196x64xf32>
    %c0_16 = arith.constant 0 : index
    %c0_17 = arith.constant 0 : index
    %c0_18 = arith.constant 0 : index
    %33 = vector.load %arg7[%c0_16, %c0_17, %c0_18] : memref<1x196x1xf32, #tpu.memory_space<vmem>>, vector<1x196x1xf32>
    %c0_19 = arith.constant 0 : index
    %c0_20 = arith.constant 0 : index
    %c0_21 = arith.constant 0 : index
    %34 = vector.load %arg8[%c0_19, %c0_20, %c0_21] : memref<1x196x1xf32, #tpu.memory_space<vmem>>, vector<1x196x1xf32>
    %35 = vector.extract_strided_slice %32 {offsets = [0, 1, 0], sizes = [1, 195, 64], strides = [1, 1, 1]} : vector<1x196x64xf32> to vector<1x195x64xf32>
    %36 = vector.extract_strided_slice %32 {offsets = [0, 0, 0], sizes = [1, 1, 64], strides = [1, 1, 1]} : vector<1x196x64xf32> to vector<1x1x64xf32>
    %37 = tpu.concatenate %35, %36 in 1 : vector<1x195x64xf32>, vector<1x1x64xf32> -> vector<1x196x64xf32>
    %38 = vector.broadcast %33 : vector<1x196x1xf32> to vector<1x196x64xf32>
    %39 = arith.mulf %37, %38 : vector<1x196x64xf32>
    %40 = vector.extract_strided_slice %32 {offsets = [0, 14, 0], sizes = [1, 182, 64], strides = [1, 1, 1]} : vector<1x196x64xf32> to vector<1x182x64xf32>
    %41 = vector.extract_strided_slice %32 {offsets = [0, 0, 0], sizes = [1, 14, 64], strides = [1, 1, 1]} : vector<1x196x64xf32> to vector<1x14x64xf32>
    %42 = tpu.concatenate %40, %41 in 1 : vector<1x182x64xf32>, vector<1x14x64xf32> -> vector<1x196x64xf32>
    %43 = vector.broadcast %34 : vector<1x196x1xf32> to vector<1x196x64xf32>
    %44 = arith.mulf %42, %43 : vector<1x196x64xf32>
    %45 = vector.extract_strided_slice %32 {offsets = [0, 15, 0], sizes = [1, 181, 64], strides = [1, 1, 1]} : vector<1x196x64xf32> to vector<1x181x64xf32>
    %46 = vector.extract_strided_slice %32 {offsets = [0, 0, 0], sizes = [1, 15, 64], strides = [1, 1, 1]} : vector<1x196x64xf32> to vector<1x15x64xf32>
    %47 = tpu.concatenate %45, %46 in 1 : vector<1x181x64xf32>, vector<1x15x64xf32> -> vector<1x196x64xf32>
    %48 = arith.mulf %33, %34 : vector<1x196x1xf32>
    %49 = vector.broadcast %48 : vector<1x196x1xf32> to vector<1x196x64xf32>
    %50 = arith.mulf %47, %49 : vector<1x196x64xf32>
    %51 = tpu.concatenate %32, %39, %44, %50 in 2 : vector<1x196x64xf32>, vector<1x196x64xf32>, vector<1x196x64xf32>, vector<1x196x64xf32> -> vector<1x196x256xf32>
    %52 = arith.truncf %51 : vector<1x196x256xf32> to vector<1x196x256xbf16>
    %c0_22 = arith.constant 0 : index
    %c0_23 = arith.constant 0 : index
    %53 = vector.load %arg6[%c0_22, %c0_23] : memref<4x256xbf16, #tpu.memory_space<vmem>>, vector<4x256xbf16>
    %c0_24 = arith.constant 0 : index
    %54 = memref.load %arg10[%c0_24] : memref<1xf32, #tpu.memory_space<smem>>
    %55 = vector.shape_cast %52 : vector<1x196x256xbf16> to vector<196x256xbf16>
    %cst_25 = arith.constant dense<0.000000e+00> : vector<4x196xf32>
    %56 = tpu.matmul %53, %55, %cst_25 {dimension_numbers = #tpu.dot_dimension_numbers<[1], [1], [0], [0], [0, 0, 1, 0], [], []>} : vector<4x256xbf16>, vector<196x256xbf16>, vector<4x196xf32> -> vector<4x196xf32>
    %57 = vector.broadcast %54 : f32 to vector<4x196xf32>
    %58 = arith.addf %56, %57 : vector<4x196xf32>
    %59 = math.tanh %58 : vector<4x196xf32>
    %c0_26 = arith.constant 0 : index
    %c0_27 = arith.constant 0 : index
    %c0_28 = arith.constant 0 : index
    %60 = vector.load %arg11[%c0_26, %c0_27, %c0_28] : memref<1x4x196xf32, #tpu.memory_space<vmem>>, vector<1x4x196xf32>
    %61 = vector.shape_cast %60 : vector<1x4x196xf32> to vector<4x196xf32>
    %62 = vector.shape_cast %59 : vector<4x196xf32> to vector<1x4x196xf32>
    tpu.vector_store %arg11[%c0_26, %c0_27, %c0_28], %62 {strides = array<i32>} : memref<1x4x196xf32, #tpu.memory_space<vmem>>, vector<1x4x196xf32>,
    return
  }
  func.func @transform_0(%arg0: i32) -> (i32, i32, i32) {
    %c0_i32 = arith.constant 0 : i32
    %c0_i32_0 = arith.constant 0 : i32
    %c0_i32_1 = arith.constant 0 : i32
    return %arg0, %c0_i32, %c0_i32_0 : i32, i32, i32
  }
  func.func @transform_1(%arg0: i32) -> (i32, i32) {
    %c0_i32 = arith.constant 0 : i32
    %c0_i32_0 = arith.constant 0 : i32
    %c0_i32_1 = arith.constant 0 : i32
    return %c0_i32, %c0_i32_0 : i32, i32
  }
  func.func @transform_2(%arg0: i32) -> (i32, i32) {
    %c0_i32 = arith.constant 0 : i32
    %c0_i32_0 = arith.constant 0 : i32
    %c0_i32_1 = arith.constant 0 : i32
    return %c0_i32, %c0_i32_0 : i32, i32
  }
  func.func @transform_3(%arg0: i32) -> (i32, i32) {
    %c0_i32 = arith.constant 0 : i32
    %c0_i32_0 = arith.constant 0 : i32
    %c0_i32_1 = arith.constant 0 : i32
    return %c0_i32, %c0_i32_0 : i32, i32
  }
  func.func @transform_4(%arg0: i32) -> (i32, i32) {
    %c0_i32 = arith.constant 0 : i32
    %c0_i32_0 = arith.constant 0 : i32
    %c0_i32_1 = arith.constant 0 : i32
    return %c0_i32, %c0_i32_0 : i32, i32
  }
  func.func @transform_5(%arg0: i32) -> (i32, i32) {
    %c0_i32 = arith.constant 0 : i32
    %c0_i32_0 = arith.constant 0 : i32
    %c0_i32_1 = arith.constant 0 : i32
    return %c0_i32, %c0_i32_0 : i32, i32
  }
  func.func @transform_6(%arg0: i32) -> (i32, i32, i32) {
    %c0_i32 = arith.constant 0 : i32
    %c0_i32_0 = arith.constant 0 : i32
    %c0_i32_1 = arith.constant 0 : i32
    %c0_i32_2 = arith.constant 0 : i32
    return %c0_i32, %c0_i32_0, %c0_i32_1 : i32, i32, i32
  }
  func.func @transform_7(%arg0: i32) -> (i32, i32, i32) {
    %c0_i32 = arith.constant 0 : i32
    %c0_i32_0 = arith.constant 0 : i32
    %c0_i32_1 = arith.constant 0 : i32
    %c0_i32_2 = arith.constant 0 : i32
    return %c0_i32, %c0_i32_0, %c0_i32_1 : i32, i32, i32
  }
  func.func @transform_8(%arg0: i32) -> i32 {
    %c0_i32 = arith.constant 0 : i32
    %c0_i32_0 = arith.constant 0 : i32
    return %c0_i32 : i32
  }
  func.func @transform_9(%arg0: i32) -> i32 {
    %c0_i32 = arith.constant 0 : i32
    %c0_i32_0 = arith.constant 0 : i32
    return %c0_i32 : i32
  }
  func.func @transform_10(%arg0: i32) -> (i32, i32, i32) {
    %c0_i32 = arith.constant 0 : i32
    %c0_i32_0 = arith.constant 0 : i32
    %c0_i32_1 = arith.constant 0 : i32
    return %arg0, %c0_i32, %c0_i32_0 : i32, i32, i32
  }
}

</mosaic_0001>

<bundles_post_ra>
// kernel: tile.17
= control target key start
LH: loop header
LB: loop body
LE: loop exit
PB: predicated region body
PF: predicated region fallthrough
CT: control target
= control target key end

     0   :  { %s26_s0 = inlined_call_operand.<no memory space> [shape: f32[], index: 0, kind: input, shape index: {}]   ;;  %s27_s1 = inlined_call_operand.vmem [shape: f32[1,256], index: 1, kind: output, shape index: {}]  }
   0x1   :  { %v2_v0 = vstv %s26_s0 }
   0x2   :  { %3 = vst [vmem:[%s27_s1] sm:$0x1] %v2_v0  ;;  %6 = vst [vmem:[%s27_s1 + $0x1] sm:$0x1] %v2_v0 }

// kernel: _lambda_.3
= control target key start
LH: loop header
LB: loop body
LE: loop exit
PB: predicated region body
PF: predicated region fallthrough
CT: control target
= control target key end

     0   :  { %s3565_s17 = smov 0   ;;  %s5183_s0 = inlined_call_operand.vmem [shape: f32[2,196,64], index: 0, kind: input, shape index: {}]   ;;  %s5184_s1 = inlined_call_operand.vmem [shape: bf16[64,64], index: 1, kind: input, shape index: {}]   ;;  %s5185_s2 = inlined_call_operand.vmem [shape: f32[1,64], index: 2, kind: input, shape index: {}]   ;;  %s5186_s3 = inlined_call_operand.vmem [shape: f32[64,64], index: 3, kind: input, shape index: {}]   ;;  %s5187_s4 = inlined_call_operand.vmem [shape: f32[1,64], index: 4, kind: input, shape index: {}]   ;;  %s5188_s5 = inlined_call_operand.vmem [shape: bf16[4,256], index: 5, kind: input, shape index: {}]   ;;  %s5189_s6 = inlined_call_operand.vmem [shape: f32[1,196,1], index: 6, kind: input, shape index: {}]   ;;  %s5190_s7 = inlined_call_operand.vmem [shape: f32[1,196,1], index: 7, kind: input, shape index: {}]   ;;  %s5191_s8 = inlined_call_operand.<no memory space> [shape: f32[1], index: 8, kind: input, shape index: {}]   ;;  %s5192_s9 = inlined_call_operand.<no memory space> [shape: f32[1], index: 9, kind: input, shape index: {}]   ;;  %s5193_s10 = inlined_call_operand.vmem [shape: f32[2,4,196], index: 10, kind: output, shape index: {}]  }
   0x1   :  { %15 = sst [smem:[#allocation2]] %s5191_s8 }
   0x2   :  { %16 = sst [smem:[#allocation3]] %s5192_s9 }
   0x3 LB: > { %s2893_s18 = sadd.s32 4294967295, %s3497_s17   ;;  %p2897_p0 = scmp.ge.s32.totalorder %s3497_s17, 1  ;;  %s3497_s17 = sphi %s3565_s17, %s22_s17  }
   0x4   : > { %p314_p1 = scmp.lt.s32.totalorder %s3497_s17, 3 }
   0x6   : > { %p315_p2 = pnand %p2897_p0, %p314_p1 }
   0x8   : > { %318 = sbr.rel (%p315_p2) target bundleno = 1539 (0x603), region = 60 }
   0xf   : > { %v3308_v0 = vld [vmem:[%s5184_s1] sm:$0xff]   ;;  %v3499_v1 = vmov 0.0   ;;  %v3309_v2 = vld [vmem:[%s5184_s1 + $0x8] sm:$0xff]   ;;  %vm3500_vm0 = vmmov 0   ;;  %p352_p3 = scmp.lt.s32.totalorder %s2893_s18, 1  ;;  %v5194_v3 = vmov 0  }
  0x10   : > { %3001 = vmatprep.subr.bf16.mxu0 %v3499_v1  ;;  %3009 = vmatprep.mubr.msk.bf16.mxu0 %vm3500_vm0, %v3499_v1  ;;  %v3310_v4 = vld [vmem:[%s5184_s1 + $0x10] sm:$0xff]   ;;  %v3311_v7 = vld [vmem:[%s5184_s1 + $0x18] sm:$0xff]   ;;  %vm440_vm1 = vcmask 523264   ;;  %v3502_v57 = vmov 0.0|0.0   ;;  %v3760_v58 = vld [vmem:[%s5185_s2] ss:$0 sm:$0xff] }
  0x11   : > { %3002 = vmatpush3.bf16.msra.mxu0 %v3308_v0  ;;  %s5235_s18 = smov (!%p352_p3, %s2893_s18), 1  ;;  %3141 = vmatprep.subr.bf16.mxu1 %v5194_v3  ;;  %v1259_v61 = vld [vmem:[%s5186_s3] sm:$0xff]  ;;  %v1260_v62 = vld [vmem:[%s5186_s3 + $0x8] sm:$0xff]  ;;  %vm829_vm2 = vcmask 556032   ;;  %vm926_vm3 = vcmask 1043456   ;;  %vm928_vm4 = vcmask 551936  }
  0x12   : > { %3003 = vmatprep.subr.bf16.mxu0 %v3499_v1  ;;  %750 = vmatprep.mubr.bf16.mxu1 %v5194_v3  ;;  %s3167_s23 = smul.u32 200, %s5235_s18  ;;  %vm1520_vm5 = vcmask 1041408   ;;  %s1660_s11 = sld [smem:[#allocation2]]  ;;  %vm1787_vm6 = vcmask 1046528   ;;  %vm2244_vm7 = vcmask 1040384   ;;  %vm2315_vm8 = vcmask 1044480  }
  0x13   : > { %3181 = vset.pattern.permute.xlu0 %v5194_v3  ;;  %3182 = vset.pattern.permute.xlu1 %v5194_v3  ;;  %s3503_s12 = smov 64   ;;  %vm1864_vm9 = vcmask 1042432   ;;  %vm2086_vm10 = vcmask 1045504   ;;  %s2775_s19 = sld [smem:[#allocation3]]  ;;  %vm2835_vm11 = vcmask 556036  }
  0x14   : > { %s3597_s26 = scalar_lea.vmem %s5183_s0, %s3167_s23  ;;  %s2962_s9 = sshll.u32 %s5235_s18, 3  ;;  %vm2836_vm12 = vmor %vm2835_vm11, %vm926_vm3 }
  0x15   : > { %3004 = vmatpush3.bf16.msra.mxu0 %v3309_v2  ;;  %v363_v5 = vld [vmem:[%s3597_s26] sm:$0xff]  ;;  %v364_v6 = vld [vmem:[%s3597_s26 + $0x8] sm:$0xff]  ;;  %v365_v10 = vld [vmem:[%s3597_s26 + $0x10] sm:$0xff]  ;;  %s361_s22 = scalar_lea.vmem %s5193_s10, %s2962_s9 }
  0x16   : > { %3005 = vmatprep.subr.bf16.mxu0 %v3499_v1  ;;  %v3604_v8 = vpack.c.bf16 %v364_v6, %v363_v5  ;;  %v366_v11 = vld [vmem:[%s3597_s26 + $0x18] sm:$0xff]  ;;  %v367_v14 = vld [vmem:[%s3597_s26 + $0x20] sm:$0xff]  ;;  %v368_v15 = vld [vmem:[%s3597_s26 + $0x28] sm:$0xff]  ;;  %v3130_v5 = vpack.c.bf16 %v1260_v62, %v1259_v61 }
  0x17   : > { %v3617_v12 = vpack.c.bf16 %v366_v11, %v365_v10  ;;  %v3629_v16 = vpack.c.bf16 %v368_v15, %v367_v14  ;;  %v369_v18 = vld [vmem:[%s3597_s26 + $0x30] sm:$0xff]  ;;  %v370_v19 = vld [vmem:[%s3597_s26 + $0x38] sm:$0xff]  ;;  %v371_v22 = vld [vmem:[%s3597_s26 + $0x40] sm:$0xff] }
  0x18   : > { %v442_v9 = vsel %vm440_vm1, %v3604_v8, 0  ;;  %v3641_v20 = vpack.c.bf16 %v370_v19, %v369_v18  ;;  %v372_v23 = vld [vmem:[%s3597_s26 + $0x48] sm:$0xff]  ;;  %v373_v26 = vld [vmem:[%s3597_s26 + $0x50] sm:$0xff]  ;;  %v374_v27 = vld [vmem:[%s3597_s26 + $0x58] sm:$0xff] }
  0x19   : > { %3006 = vmatpush3.bf16.msra.mxu0 %v3310_v4  ;;  %3154 = vmatpush1.bf16.xpose.msra.mxu1 %v442_v9  ;;  %v445_v13 = vsel %vm440_vm1, %v3617_v12, 0  ;;  %v448_v17 = vsel %vm440_vm1, %v3629_v16, 0  ;;  %v3653_v24 = vpack.c.bf16 %v372_v23, %v371_v22  ;;  %v3665_v28 = vpack.c.bf16 %v374_v27, %v373_v26  ;;  %v375_v30 = vld [vmem:[%s3597_s26 + $0x60] sm:$0xff]  ;;  %v376_v31 = vld [vmem:[%s3597_s26 + $0x68] sm:$0xff]  ;;  %v377_v34 = vld [vmem:[%s3597_s26 + $0x70] sm:$0xff] }
  0x1a   : > { %3007 = vmatprep.subr.bf16.mxu0 %v3499_v1  ;;  %3142 = vmatprep.subr.bf16.mxu1 %v5194_v3  ;;  %v451_v21 = vsel %vm440_vm1, %v3641_v20, 0  ;;  %v3677_v32 = vpack.c.bf16 %v376_v31, %v375_v30  ;;  %v378_v35 = vld [vmem:[%s3597_s26 + $0x78] sm:$0xff]  ;;  %v379_v38 = vld [vmem:[%s3597_s26 + $0x80] sm:$0xff]  ;;  %v380_v39 = vld [vmem:[%s3597_s26 + $0x88] sm:$0xff] }
  0x1b   : > { %v454_v25 = vsel %vm440_vm1, %v3653_v24, 0  ;;  %v457_v29 = vsel %vm440_vm1, %v3665_v28, 0  ;;  %v3689_v36 = vpack.c.bf16 %v378_v35, %v377_v34  ;;  %v3701_v40 = vpack.c.bf16 %v380_v39, %v379_v38  ;;  %v381_v42 = vld [vmem:[%s3597_s26 + $0x90] sm:$0xff]  ;;  %v382_v43 = vld [vmem:[%s3597_s26 + $0x98] sm:$0xff]  ;;  %v383_v46 = vld [vmem:[%s3597_s26 + $0xa0] sm:$0xff] }
  0x1c   : > { %v460_v33 = vsel %vm440_vm1, %v3677_v32, 0  ;;  %v3713_v44 = vpack.c.bf16 %v382_v43, %v381_v42  ;;  %v384_v47 = vld [vmem:[%s3597_s26 + $0xa8] sm:$0xff]  ;;  %v385_v50 = vld [vmem:[%s3597_s26 + $0xb0] sm:$0xff]  ;;  %v386_v51 = vld [vmem:[%s3597_s26 + $0xb8] sm:$0xff] }
  0x1d   : > { %3008 = vmatpush3.bf16.msra.mxu0 %v3311_v7  ;;  %v463_v37 = vsel %vm440_vm1, %v3689_v36, 0  ;;  %v466_v41 = vsel %vm440_vm1, %v3701_v40, 0  ;;  %v3725_v48 = vpack.c.bf16 %v384_v47, %v383_v46  ;;  %v3737_v52 = vpack.c.bf16 %v386_v51, %v385_v50  ;;  %v387_v54 = vld [vmem:[%s3597_s26 + $0xc0] sm:$0xf]  ;;  %v1261_v7 = vld [vmem:[%s5186_s3 + $0x10] sm:$0xff] }
  0x1e   : > { %668 = vmatprep.subr.bf16.mxu0 %v5194_v3  ;;  %v469_v45 = vsel %vm440_vm1, %v3713_v44, 0  ;;  %v3748_v55 = vpack.c.bf16 %v387_v54, %v387_v54  ;;  %v1263_v15 = vld [vmem:[%s5186_s3 + $0x20] sm:$0xff] }
  0x1f   : > { %v472_v49 = vsel %vm440_vm1, %v3725_v48, 0  ;;  %v475_v53 = vsel %vm440_vm1, %v3737_v52, 0 }
  0x20   : > { %3010 = vmatmul.mubr.msk.bf16.vlgmr.msra.gmra.mrb[0].mxu0 %vm440_vm1, %v3604_v8  ;;  %v478_v56 = vsel %vm440_vm1, %v3748_v55, 0 }
  0x21   : > { %3013 = vmatprep.mubr.msk.bf16.mxu0 %vm3500_vm0, %v3499_v1  ;;  %3155 = vmatpush1.bf16.xpose.msra.mxu1 %v445_v13 }
  0x22   : > { %3143 = vmatprep.subr.bf16.mxu1 %v5194_v3 }
  0x26   : > { %669 = vmatpush1.bf16.xpose.msra.mxu0 %v442_v9  ;;  %v1262_v9 = vld [vmem:[%s5186_s3 + $0x18] sm:$0xff] }
  0x27   : > { %670 = vmatprep.subr.bf16.mxu0 %v5194_v3  ;;  %v3133_v11 = vpack.c.bf16 %v1262_v9, %v1261_v7 }
  0x28   : > { %3014 = vmatmul.mubr.msk.bf16.gmra.mrb[4].mxu0 %vm440_vm1, %v3617_v12 }
  0x29   : > { %3017 = vmatprep.mubr.msk.bf16.mxu0 %vm3500_vm0, %v3499_v1  ;;  %3156 = vmatpush1.bf16.xpose.msra.mxu1 %v448_v17 }
  0x2a   : > { %3144 = vmatprep.subr.bf16.mxu1 %v5194_v3 }
  0x2e   : > { %671 = vmatpush1.bf16.xpose.msra.mxu0 %v445_v13 }
  0x2f   : > { %672 = vmatprep.subr.bf16.mxu0 %v5194_v3 }
  0x30   : > { %3018 = vmatmul.mubr.msk.bf16.gmra.mrb[8].mxu0 %vm440_vm1, %v3629_v16 }
  0x31   : > { %3021 = vmatprep.mubr.msk.bf16.mxu0 %vm3500_vm0, %v3499_v1  ;;  %3157 = vmatpush1.bf16.xpose.msra.mxu1 %v451_v21 }
  0x32   : > { %3145 = vmatprep.subr.bf16.mxu1 %v5194_v3 }
  0x36   : > { %673 = vmatpush1.bf16.xpose.msra.mxu0 %v448_v17  ;;  %v1264_v17 = vld [vmem:[%s5186_s3 + $0x28] sm:$0xff] }
  0x37   : > { %674 = vmatprep.subr.bf16.mxu0 %v5194_v3  ;;  %v3136_v22 = vpack.c.bf16 %v1264_v17, %v1263_v15 }
  0x38   : > { %3022 = vmatmul.mubr.msk.bf16.gmra.mrb[12].mxu0 %vm440_vm1, %v3641_v20 }
  0x39   : > { %3025 = vmatprep.mubr.msk.bf16.mxu0 %vm3500_vm0, %v3499_v1  ;;  %3158 = vmatpush1.bf16.xpose.msra.mxu1 %v454_v25 }
  0x3a   : > { %3146 = vmatprep.subr.bf16.mxu1 %v5194_v3 }
  0x3e   : > { %675 = vmatpush1.bf16.xpose.msra.mxu0 %v451_v21 }
  0x3f   : > { %676 = vmatprep.subr.bf16.mxu0 %v5194_v3 }
  0x40   : > { %3026 = vmatmul.mubr.msk.bf16.gmra.mrb[16].mxu0 %vm440_vm1, %v3653_v24 }
  0x41   : > { %3029 = vmatprep.mubr.msk.bf16.mxu0 %vm3500_vm0, %v3499_v1  ;;  %3159 = vmatpush1.bf16.xpose.msra.mxu1 %v457_v29 }
  0x42   : > { %3147 = vmatprep.subr.bf16.mxu1 %v5194_v3 }
  0x46   : > { %677 = vmatpush1.bf16.xpose.msra.mxu0 %v454_v25 }
  0x47   : > { %678 = vmatprep.subr.bf16.mxu0 %v5194_v3 }
  0x48   : > { %3030 = vmatmul.mubr.msk.bf16.gmra.mrb[20].mxu0 %vm440_vm1, %v3665_v28 }
  0x49   : > { %3033 = vmatprep.mubr.msk.bf16.mxu0 %vm3500_vm0, %v3499_v1  ;;  %3160 = vmatpush1.bf16.xpose.msra.mxu1 %v460_v33 }
  0x4a   : > { %3148 = vmatprep.subr.bf16.mxu1 %v5194_v3 }
  0x4e   : > { %679 = vmatpush1.bf16.xpose.msra.mxu0 %v457_v29 }
  0x4f   : > { %680 = vmatprep.subr.bf16.mxu0 %v5194_v3 }
  0x50   : > { %3034 = vmatmul.mubr.msk.bf16.gmra.mrb[24].mxu0 %vm440_vm1, %v3677_v32 }
  0x51   : > { %3037 = vmatprep.mubr.msk.bf16.mxu0 %vm3500_vm0, %v3499_v1  ;;  %3161 = vmatpush1.bf16.xpose.msra.mxu1 %v463_v37 }
  0x52   : > { %3149 = vmatprep.subr.bf16.mxu1 %v5194_v3 }
  0x56   : > { %681 = vmatpush1.bf16.xpose.msra.mxu0 %v460_v33 }
  0x57   : > { %682 = vmatprep.subr.bf16.mxu0 %v5194_v3 }
  0x58   : > { %3038 = vmatmul.mubr.msk.bf16.gmra.mrb[28].mxu0 %vm440_vm1, %v3689_v36 }
  0x59   : > { %3041 = vmatprep.mubr.msk.bf16.mxu0 %vm3500_vm0, %v3499_v1  ;;  %3162 = vmatpush1.bf16.xpose.msra.mxu1 %v466_v41 }
  0x5a   : > { %3150 = vmatprep.subr.bf16.mxu1 %v5194_v3 }
  0x5e   : > { %683 = vmatpush1.bf16.xpose.msra.mxu0 %v463_v37 }
  0x5f   : > { %684 = vmatprep.subr.bf16.mxu0 %v5194_v3 }
  0x60   : > { %3042 = vmatmul.mubr.msk.bf16.gmra.mrb[32].mxu0 %vm440_vm1, %v3701_v40 }
  0x61   : > { %3045 = vmatprep.mubr.msk.bf16.mxu0 %vm3500_vm0, %v3499_v1  ;;  %3163 = vmatpush1.bf16.xpose.msra.mxu1 %v469_v45 }
  0x62   : > { %3151 = vmatprep.subr.bf16.mxu1 %v5194_v3 }
  0x66   : > { %685 = vmatpush1.bf16.xpose.msra.mxu0 %v466_v41 }
  0x67   : > { %686 = vmatprep.subr.bf16.mxu0 %v5194_v3 }
  0x68   : > { %3046 = vmatmul.mubr.msk.bf16.gmra.mrb[36].mxu0 %vm440_vm1, %v3713_v44 }
  0x69   : > { %3049 = vmatprep.mubr.msk.bf16.mxu0 %vm3500_vm0, %v3499_v1  ;;  %3164 = vmatpush1.bf16.xpose.msra.mxu1 %v472_v49 }
  0x6a   : > { %3152 = vmatprep.subr.bf16.mxu1 %v5194_v3 }
  0x6e   : > { %687 = vmatpush1.bf16.xpose.msra.mxu0 %v469_v45 }
  0x6f   : > { %688 = vmatprep.subr.bf16.mxu0 %v5194_v3 }
  0x70   : > { %3050 = vmatmul.mubr.msk.bf16.gmra.mrb[40].mxu0 %vm440_vm1, %v3725_v48 }
  0x71   : > { %3053 = vmatprep.mubr.msk.bf16.mxu0 %vm3500_vm0, %v3499_v1  ;;  %3165 = vmatpush1.bf16.xpose.msra.mxu1 %v475_v53 }
  0x72   : > { %3153 = vmatprep.subr.bf16.mxu1 %v5194_v3 }
  0x76   : > { %689 = vmatpush1.bf16.xpose.msra.mxu0 %v472_v49 }
  0x77   : > { %690 = vmatprep.subr.bf16.mxu0 %v5194_v3 }
  0x78   : > { %3054 = vmatmul.mubr.msk.bf16.gmra.mrb[44].mxu0 %vm440_vm1, %v3737_v52 }
  0x79   : > { %3057 = vmatprep.mubr.msk.bf16.mxu0 %vm3500_vm0, %v3499_v1  ;;  %3166 = vmatpush1.bf16.xpose.msra.mxu1 %v478_v56 }
  0x7a   : > { %1524 = vmatprep.subr.bf16.mxu1 %v5194_v3 }
  0x7e   : > { %691 = vmatpush1.bf16.xpose.msra.mxu0 %v475_v53 }
  0x7f   : > { %692 = vmatprep.subr.bf16.mxu0 %v5194_v3 }
  0x80   : > { %3058 = vmatmul.mubr.msk.bf16.gmra.mrb[48].mxu0 %vm440_vm1, %v3748_v55 }
  0x81   : > { %700 = vmatprep.mubr.bf16.mxu0 %v5194_v3 }
  0x86   : > { %693 = vmatpush1.bf16.xpose.msra.mxu0 %v478_v56 }
  0x87   : > { %3129 = vmatprep.subr.bf16.mxu0 %v3502_v57 }
  0xf3   : > { %v514_v59 = vpop.f32.mrb[0].mxu0 }
  0xf4   : > { %v3011_v60 = vpop.f32.mrb[1].mxu0  ;;  %v515_v0 = vadd.f32 %v3760_v58, %v514_v59 }
  0xf5   : > { %v517_v63 = vpop.f32.mrb[2].mxu0 }
  0xf6   : > { %v518_v2 = vadd.f32 %v3760_v58, %v517_v63  ;;  %v3012_v4 = vpop.f32.mrb[3].mxu0 }
  0xf8   : > { %v616_v6 = vpack.c.bf16 %v518_v2, %v515_v0 }
  0xfa   : > { %2919 = vmatmul.mubr.msk.bf16.vlgmr.msra.gmra.mrb[52].mxu0 %vm440_vm1, %v616_v6 }
  0xfb   : > { %v522_v10 = vpop.f32.mrb[4].mxu0  ;;  %710 = vmatprep.mubr.bf16.mxu0 %v5194_v3  ;;  %3131 = vmatpush3.bf16.msra.mxu0 %v3130_v5 }
  0xfc   : > { %v523_v13 = vadd.f32 %v3760_v58, %v522_v10  ;;  %v3015_v14 = vpop.f32.mrb[5].mxu0  ;;  %3132 = vmatprep.subr.bf16.mxu0 %v3502_v57 }
  0xfd   : > { %v525_v18 = vpop.f32.mrb[6].mxu0 }
  0xfe   : > { %v526_v19 = vadd.f32 %v3760_v58, %v525_v18  ;;  %v3016_v21 = vpop.f32.mrb[7].mxu0 }
  0xff   : > { %3134 = vmatpush3.bf16.msra.mxu0 %v3133_v11 }
 0x100   : > { %v617_v23 = vpack.c.bf16 %v526_v19, %v523_v13  ;;  %3135 = vmatprep.subr.bf16.mxu0 %v3502_v57 }
 0x102   : > { %2920 = vmatmul.mubr.msk.bf16.gmra.mrb[56].mxu0 %vm440_vm1, %v617_v23 }
 0x103   : > { %v530_v25 = vpop.f32.mrb[8].mxu0  ;;  %720 = vmatprep.mubr.bf16.mxu0 %v5194_v3  ;;  %3137 = vmatpush3.bf16.msra.mxu0 %v3136_v22 }
 0x104   : > { %v531_v26 = vadd.f32 %v3760_v58, %v530_v25  ;;  %v3019_v27 = vpop.f32.mrb[9].mxu0  ;;  %3138 = vmatprep.subr.bf16.mxu0 %v3502_v57 }
 0x105   : > { %v533_v29 = vpop.f32.mrb[10].mxu0 }
 0x106   : > { %v534_v30 = vadd.f32 %v3760_v58, %v533_v29  ;;  %v3020_v31 = vpop.f32.mrb[11].mxu0 }
 0x108   : > { %v618_v33 = vpack.c.bf16 %v534_v30, %v531_v26 }
 0x10a   : > { %2921 = vmatmul.mubr.msk.bf16.gmra.mrb[60].mxu0 %vm440_vm1, %v618_v33 }
 0x10b   : > { %v538_v34 = vpop.f32.mrb[12].mxu0  ;;  %730 = vmatprep.mubr.bf16.mxu0 %v5194_v3 }
 0x10c   : > { %v539_v35 = vadd.f32 %v3760_v58, %v538_v34  ;;  %v3023_v37 = vpop.f32.mrb[13].mxu0 }
 0x10d   : > { %v541_v38 = vpop.f32.mrb[14].mxu0 }
 0x10e   : > { %v542_v39 = vadd.f32 %v3760_v58, %v541_v38  ;;  %v3024_v41 = vpop.f32.mrb[15].mxu0 }
 0x110   : > { %v619_v42 = vpack.c.bf16 %v542_v39, %v539_v35 }
 0x112   : > { %2922 = vmatmul.mubr.msk.bf16.gmra.mrb[64].mxu0 %vm440_vm1, %v619_v42 }
 0x113   : > { %v546_v43 = vpop.f32.mrb[16].mxu0  ;;  %740 = vmatprep.mubr.bf16.mxu0 %v5194_v3 }
 0x114   : > { %v547_v45 = vadd.f32 %v3760_v58, %v546_v43  ;;  %v3027_v46 = vpop.f32.mrb[17].mxu0 }
 0x115   : > { %v549_v47 = vpop.f32.mrb[18].mxu0 }
 0x116   : > { %v550_v49 = vadd.f32 %v3760_v58, %v549_v47  ;;  %v3028_v50 = vpop.f32.mrb[19].mxu0 }
 0x118   : > { %v620_v51 = vpack.c.bf16 %v550_v49, %v547_v45 }
 0x11a   : > { %2923 = vmatmul.mubr.msk.bf16.gmra.mrb[68].mxu0 %vm440_vm1, %v620_v51 }
 0x11b   : > { %v554_v53 = vpop.f32.mrb[20].mxu0  ;;  %3077 = vmatprep.mubr.msk.bf16.mxu0 %vm3500_vm0, %v3499_v1 }
 0x11c   : > { %v555_v54 = vadd.f32 %v3760_v58, %v554_v53  ;;  %v3031_v56 = vpop.f32.mrb[21].mxu0 }
 0x11d   : > { %v557_v57 = vpop.f32.mrb[22].mxu0  ;;  %v1266_v56 = vld [vmem:[%s5186_s3 + $0x38] sm:$0xff] }
 0x11e   : > { %v558_v59 = vadd.f32 %v3760_v58, %v557_v57  ;;  %v3032_v60 = vpop.f32.mrb[23].mxu0 }
 0x120   : > { %v621_v61 = vpack.c.bf16 %v558_v59, %v555_v54  ;;  %v1265_v54 = vld [vmem:[%s5186_s3 + $0x30] sm:$0xff] }
 0x121   : > { %v3139_v59 = vpack.c.bf16 %v1266_v56, %v1265_v54 }
 0x122   : > { %2924 = vmatmul.mubr.msk.bf16.vlgmr.msra.gmra.mrb[0].mxu1 %vm440_vm1, %v621_v61 }
 0x123   : > { %v562_v62 = vpop.f32.mrb[24].mxu0  ;;  %760 = vmatprep.mubr.bf16.mxu1 %v5194_v3  ;;  %3140 = vmatpush3.bf16.msra.mxu0 %v3139_v59 }
 0x124   : > { %v563_v63 = vadd.f32 %v3760_v58, %v562_v62  ;;  %v3035_v0 = vpop.f32.mrb[25].mxu0 }
 0x125   : > { %v565_v2 = vpop.f32.mrb[26].mxu0 }
 0x126   : > { %v566_v4 = vadd.f32 %v3760_v58, %v565_v2  ;;  %v3036_v5 = vpop.f32.mrb[27].mxu0  ;;  %3078 = vmatmul.mubr.msk.bf16.vlgmr.msra.gmra.mrb[72].mxu0 %vm440_vm1, %v3604_v8 }
 0x127   : > { %3081 = vmatprep.mubr.msk.bf16.mxu0 %vm3500_vm0, %v3499_v1 }
 0x128   : > { %v622_v6 = vpack.c.bf16 %v566_v4, %v563_v63 }
 0x12a   : > { %2925 = vmatmul.mubr.msk.bf16.gmra.mrb[4].mxu1 %vm440_vm1, %v622_v6 }
 0x12b   : > { %v570_v7 = vpop.f32.mrb[28].mxu0  ;;  %770 = vmatprep.mubr.bf16.mxu1 %v5194_v3 }
 0x12c   : > { %v571_v9 = vadd.f32 %v3760_v58, %v570_v7  ;;  %v3039_v10 = vpop.f32.mrb[29].mxu0 }
 0x12d   : > { %v573_v11 = vpop.f32.mrb[30].mxu0 }
 0x12e   : > { %v574_v13 = vadd.f32 %v3760_v58, %v573_v11  ;;  %v3040_v14 = vpop.f32.mrb[31].mxu0  ;;  %3082 = vmatmul.mubr.msk.bf16.gmra.mrb[76].mxu0 %vm440_vm1, %v3617_v12 }
 0x12f   : > { %3085 = vmatprep.mubr.msk.bf16.mxu0 %vm3500_vm0, %v3499_v1 }
 0x130   : > { %v623_v15 = vpack.c.bf16 %v574_v13, %v571_v9 }
 0x132   : > { %2926 = vmatmul.mubr.msk.bf16.gmra.mrb[8].mxu1 %vm440_vm1, %v623_v15 }
 0x133   : > { %v578_v17 = vpop.f32.mrb[32].mxu0  ;;  %780 = vmatprep.mubr.bf16.mxu1 %v5194_v3 }
 0x134   : > { %v579_v18 = vadd.f32 %v3760_v58, %v578_v17  ;;  %v3043_v19 = vpop.f32.mrb[33].mxu0 }
 0x135   : > { %v581_v21 = vpop.f32.mrb[34].mxu0 }
 0x136   : > { %v582_v22 = vadd.f32 %v3760_v58, %v581_v21  ;;  %v3044_v23 = vpop.f32.mrb[35].mxu0  ;;  %3086 = vmatmul.mubr.msk.bf16.gmra.mrb[80].mxu0 %vm440_vm1, %v3629_v16 }
 0x137   : > { %3089 = vmatprep.mubr.msk.bf16.mxu0 %vm3500_vm0, %v3499_v1 }
 0x138   : > { %v624_v25 = vpack.c.bf16 %v582_v22, %v579_v18 }
 0x13a   : > { %2927 = vmatmul.mubr.msk.bf16.gmra.mrb[12].mxu1 %vm440_vm1, %v624_v25 }
 0x13b   : > { %v586_v26 = vpop.f32.mrb[36].mxu0  ;;  %790 = vmatprep.mubr.bf16.mxu1 %v5194_v3 }
 0x13c   : > { %v587_v27 = vadd.f32 %v3760_v58, %v586_v26  ;;  %v3047_v29 = vpop.f32.mrb[37].mxu0 }
 0x13d   : > { %v589_v30 = vpop.f32.mrb[38].mxu0 }
 0x13e   : > { %v590_v31 = vadd.f32 %v3760_v58, %v589_v30  ;;  %v3048_v33 = vpop.f32.mrb[39].mxu0  ;;  %3090 = vmatmul.mubr.msk.bf16.gmra.mrb[84].mxu0 %vm440_vm1, %v3641_v20 }
 0x13f   : > { %3093 = vmatprep.mubr.msk.bf16.mxu0 %vm3500_vm0, %v3499_v1 }
 0x140   : > { %v625_v34 = vpack.c.bf16 %v590_v31, %v587_v27 }
 0x142   : > { %2928 = vmatmul.mubr.msk.bf16.gmra.mrb[16].mxu1 %vm440_vm1, %v625_v34 }
 0x143   : > { %v594_v35 = vpop.f32.mrb[40].mxu0  ;;  %800 = vmatprep.mubr.bf16.mxu1 %v5194_v3 }
 0x144   : > { %v595_v37 = vadd.f32 %v3760_v58, %v594_v35  ;;  %v3051_v38 = vpop.f32.mrb[41].mxu0 }
 0x145   : > { %v597_v39 = vpop.f32.mrb[42].mxu0 }
 0x146   : > { %v598_v41 = vadd.f32 %v3760_v58, %v597_v39  ;;  %v3052_v42 = vpop.f32.mrb[43].mxu0  ;;  %3094 = vmatmul.mubr.msk.bf16.gmra.mrb[88].mxu0 %vm440_vm1, %v3653_v24 }
 0x147   : > { %3097 = vmatprep.mubr.msk.bf16.mxu0 %vm3500_vm0, %v3499_v1 }
 0x148   : > { %v626_v43 = vpack.c.bf16 %v598_v41, %v595_v37 }
 0x14a   : > { %2929 = vmatmul.mubr.msk.bf16.gmra.mrb[20].mxu1 %vm440_vm1, %v626_v43 }
 0x14b   : > { %v602_v45 = vpop.f32.mrb[44].mxu0  ;;  %810 = vmatprep.mubr.bf16.mxu1 %v5194_v3 }
 0x14c   : > { %v603_v46 = vadd.f32 %v3760_v58, %v602_v45  ;;  %v3055_v47 = vpop.f32.mrb[45].mxu0 }
 0x14d   : > { %v605_v49 = vpop.f32.mrb[46].mxu0 }
 0x14e   : > { %v606_v50 = vadd.f32 %v3760_v58, %v605_v49  ;;  %v3056_v51 = vpop.f32.mrb[47].mxu0  ;;  %3098 = vmatmul.mubr.msk.bf16.gmra.mrb[92].mxu0 %vm440_vm1, %v3665_v28 }
 0x14f   : > { %3101 = vmatprep.mubr.msk.bf16.mxu0 %vm3500_vm0, %v3499_v1 }
 0x150   : > { %v627_v53 = vpack.c.bf16 %v606_v50, %v603_v46 }
 0x152   : > { %2930 = vmatmul.mubr.msk.bf16.gmra.mrb[24].mxu1 %vm440_vm1, %v627_v53 }
 0x153   : > { %v610_v57 = vpop.f32.mrb[48].mxu0  ;;  %820 = vmatprep.mubr.bf16.mxu1 %v5194_v3 }
 0x154   : > { %v611_v60 = vadd.f32 %v3760_v58, %v610_v57  ;;  %v3059_v61 = vpop.f32.mrb[49].mxu0 }
 0x155   : > { %v613_v62 = vpop.f32.mrb[50].mxu0 }
 0x156   : > { %v628_v63 = vpack.c.bf16 %v611_v60, %v611_v60  ;;  %v3060_v0 = vpop.f32.mrb[51].mxu0  ;;  %3102 = vmatmul.mubr.msk.bf16.gmra.mrb[96].mxu0 %vm440_vm1, %v3677_v32 }
 0x157   : > { %3105 = vmatprep.mubr.msk.bf16.mxu0 %vm3500_vm0, %v3499_v1 }
 0x15a   : > { %2931 = vmatmul.mubr.msk.bf16.gmra.mrb[28].mxu1 %vm440_vm1, %v628_v63 }
 0x15e   : > { %3106 = vmatmul.mubr.msk.bf16.gmra.mrb[100].mxu0 %vm440_vm1, %v3689_v36 }
 0x15f   : > { %3109 = vmatprep.mubr.msk.bf16.mxu0 %vm3500_vm0, %v3499_v1 }
 0x166   : > { %3110 = vmatmul.mubr.msk.bf16.gmra.mrb[104].mxu0 %vm440_vm1, %v3701_v40 }
 0x167   : > { %3113 = vmatprep.mubr.msk.bf16.mxu0 %vm3500_vm0, %v3499_v1 }
 0x16e   : > { %3114 = vmatmul.mubr.msk.bf16.gmra.mrb[108].mxu0 %vm440_vm1, %v3713_v44 }
 0x16f   : > { %3117 = vmatprep.mubr.msk.bf16.mxu0 %vm3500_vm0, %v3499_v1 }
 0x176   : > { %3118 = vmatmul.mubr.msk.bf16.gmra.mrb[112].mxu0 %vm440_vm1, %v3725_v48 }
 0x177   : > { %3121 = vmatprep.mubr.msk.bf16.mxu0 %vm3500_vm0, %v3499_v1 }
 0x17e   : > { %3122 = vmatmul.mubr.msk.bf16.gmra.mrb[116].mxu0 %vm440_vm1, %v3737_v52 }
 0x17f   : > { %3125 = vmatprep.mubr.msk.bf16.mxu0 %vm3500_vm0, %v3499_v1 }
 0x186   : > { %3126 = vmatmul.mubr.msk.bf16.gmra.mrb[120].mxu0 %vm440_vm1, %v3748_v55 }
 0x1cd   : > { %v3887_v8 = vpop.f32.mrb[52].mxu0 }
 0x1ce   : > { %v3889_v12 = vpop.f32.mrb[53].mxu0 }
 0x1cf   : > { %v3891_v16 = vpop.f32.mrb[54].mxu0  ;;  %v830_v20 = vsel %vm829_vm2, %v3889_v12, -inf }
 0x1d0   : > { %v3895_v24 = vpop.f32.mrb[55].mxu0  ;;  %v831_v28 = vmax.f32 %v3887_v8, %v830_v20 }
 0x1d1   : > { %v834_v1 = vsel %vm829_vm2, %v3895_v24, -inf }
 0x1d2   : > { %832 = vmax.xlane.f32.xlu0 %v831_v28  ;;  %v835_v32 = vmax.f32 %v3891_v16, %v834_v1 }
 0x1d5   : > { %v3901_v36 = vpop.f32.mrb[56].mxu0 }
 0x1d6   : > { %836 = vmax.xlane.f32.xlu0 %v835_v32  ;;  %v3903_v40 = vpop.f32.mrb[57].mxu0 }
 0x1d7   : > { %v3905_v44 = vpop.f32.mrb[58].mxu0  ;;  %v838_v48 = vsel %vm829_vm2, %v3903_v40, -inf }
 0x1d8   : > { %v3909_v52 = vpop.f32.mrb[59].mxu0  ;;  %v839_v55 = vmax.f32 %v3901_v36, %v838_v48 }
 0x1d9   : > { %v842_v58 = vsel %vm829_vm2, %v3909_v52, -inf }
 0x1da   : > { %840 = vmax.xlane.f32.xlu1 %v839_v55  ;;  %v843_v2 = vmax.f32 %v3905_v44, %v842_v58 }
 0x1dd   : > { %v3915_v4 = vpop.f32.mrb[60].mxu0 }
 0x1de   : > { %844 = vmax.xlane.f32.xlu1 %v843_v2  ;;  %v3917_v5 = vpop.f32.mrb[61].mxu0 }
 0x1df   : > { %v846_v6 = vsel %vm829_vm2, %v3917_v5, -inf  ;;  %v3921_v7 = vpop.f32.mrb[62].mxu0 }
 0x1e0   : > { %v3923_v9 = vpop.f32.mrb[63].mxu0  ;;  %v847_v10 = vmax.f32 %v3915_v4, %v846_v6 }
 0x1e1   : > { %v850_v11 = vsel %vm829_vm2, %v3923_v9, -inf }
 0x1e2   : > { %848 = vmax.xlane.f32.xlu0 %v847_v10  ;;  %v851_v13 = vmax.f32 %v3921_v7, %v850_v11 }
 0x1e4   : > { %852 = vmax.xlane.f32.xlu1 %v851_v13 }
 0x1e5   : > { %v3929_v14 = vpop.f32.mrb[64].mxu0 }
 0x1e6   : > { %v3931_v15 = vpop.f32.mrb[65].mxu0 }
 0x1e7   : > { %v854_v17 = vsel %vm829_vm2, %v3931_v15, -inf  ;;  %v3935_v18 = vpop.f32.mrb[66].mxu0 }
 0x1e8   : > { %v3937_v19 = vpop.f32.mrb[67].mxu0  ;;  %v855_v21 = vmax.f32 %v3929_v14, %v854_v17 }
 0x1e9   : > { %v858_v22 = vsel %vm829_vm2, %v3937_v19, -inf }
 0x1ea   : > { %856 = vmax.xlane.f32.xlu0 %v855_v21  ;;  %v859_v23 = vmax.f32 %v3935_v18, %v858_v22 }
 0x1ec   : > { %860 = vmax.xlane.f32.xlu1 %v859_v23 }
 0x1ed   : > { %v3943_v25 = vpop.f32.mrb[68].mxu0 }
 0x1ee   : > { %v3945_v26 = vpop.f32.mrb[69].mxu0 }
 0x1ef   : > { %v862_v27 = vsel %vm829_vm2, %v3945_v26, -inf  ;;  %v3949_v29 = vpop.f32.mrb[70].mxu0 }
 0x1f0   : > { %v3951_v30 = vpop.f32.mrb[71].mxu0  ;;  %v863_v31 = vmax.f32 %v3943_v25, %v862_v27 }
 0x1f1   : > { %v866_v33 = vsel %vm829_vm2, %v3951_v30, -inf }
 0x1f2   : > { %864 = vmax.xlane.f32.xlu0 %v863_v31  ;;  %v867_v34 = vmax.f32 %v3949_v29, %v866_v33 }
 0x1f4   : > { %868 = vmax.xlane.f32.xlu1 %v867_v34 }
 0x1f5   : > { %v3957_v35 = vpop.f32.mrb[0].mxu1 }
 0x1f6   : > { %v3959_v37 = vpop.f32.mrb[1].mxu1 }
 0x1f7   : > { %v870_v38 = vsel %vm829_vm2, %v3959_v37, -inf  ;;  %v3963_v39 = vpop.f32.mrb[2].mxu1 }
 0x1f8   : > { %v3965_v41 = vpop.f32.mrb[3].mxu1  ;;  %v871_v42 = vmax.f32 %v3957_v35, %v870_v38 }
 0x1f9   : > { %v874_v43 = vsel %vm829_vm2, %v3965_v41, -inf }
 0x1fa   : > { %872 = vmax.xlane.f32.xlu0 %v871_v42  ;;  %v875_v45 = vmax.f32 %v3963_v39, %v874_v43 }
 0x1fc   : > { %876 = vmax.xlane.f32.xlu1 %v875_v45 }
 0x1fd   : > { %v3971_v46 = vpop.f32.mrb[4].mxu1 }
 0x1fe   : > { %v3973_v47 = vpop.f32.mrb[5].mxu1 }
 0x1ff   : > { %v878_v49 = vsel %vm829_vm2, %v3973_v47, -inf  ;;  %v3977_v50 = vpop.f32.mrb[6].mxu1 }
 0x200   : > { %v3979_v51 = vpop.f32.mrb[7].mxu1  ;;  %v879_v53 = vmax.f32 %v3971_v46, %v878_v49 }
 0x201   : > { %v882_v54 = vsel %vm829_vm2, %v3979_v51, -inf }
 0x202   : > { %880 = vmax.xlane.f32.xlu0 %v879_v53  ;;  %v883_v56 = vmax.f32 %v3977_v50, %v882_v54 }
 0x204   : > { %884 = vmax.xlane.f32.xlu1 %v883_v56 }
 0x205   : > { %v3985_v57 = vpop.f32.mrb[8].mxu1 }
 0x206   : > { %v3987_v59 = vpop.f32.mrb[9].mxu1 }
 0x207   : > { %v886_v60 = vsel %vm829_vm2, %v3987_v59, -inf  ;;  %v3991_v61 = vpop.f32.mrb[10].mxu1 }
 0x208   : > { %v3993_v62 = vpop.f32.mrb[11].mxu1  ;;  %v887_v63 = vmax.f32 %v3985_v57, %v886_v60 }
 0x209   : > { %v890_v0 = vsel %vm829_vm2, %v3993_v62, -inf }
 0x20a   : > { %888 = vmax.xlane.f32.xlu0 %v887_v63  ;;  %v891_v20 = vmax.f32 %v3991_v61, %v890_v0 }
 0x20c   : > { %892 = vmax.xlane.f32.xlu1 %v891_v20 }
 0x20d   : > { %v3999_v28 = vpop.f32.mrb[12].mxu1 }
 0x20e   : > { %v4001_v1 = vpop.f32.mrb[13].mxu1 }
 0x20f   : > { %v894_v32 = vsel %vm829_vm2, %v4001_v1, -inf  ;;  %v4005_v48 = vpop.f32.mrb[14].mxu1 }
 0x210   : > { %v4007_v55 = vpop.f32.mrb[15].mxu1  ;;  %v895_v58 = vmax.f32 %v3999_v28, %v894_v32 }
 0x211   : > { %v898_v2 = vsel %vm829_vm2, %v4007_v55, -inf }
 0x212   : > { %896 = vmax.xlane.f32.xlu0 %v895_v58  ;;  %v899_v6 = vmax.f32 %v4005_v48, %v898_v2 }
 0x214   : > { %900 = vmax.xlane.f32.xlu1 %v899_v6 }
 0x215   : > { %v4013_v10 = vpop.f32.mrb[16].mxu1 }
 0x216   : > { %v4015_v11 = vpop.f32.mrb[17].mxu1 }
 0x217   : > { %v902_v13 = vsel %vm829_vm2, %v4015_v11, -inf  ;;  %v4019_v17 = vpop.f32.mrb[18].mxu1 }
 0x218   : > { %v4021_v21 = vpop.f32.mrb[19].mxu1  ;;  %v903_v22 = vmax.f32 %v4013_v10, %v902_v13 }
 0x219   : > { %v906_v23 = vsel %vm829_vm2, %v4021_v21, -inf }
 0x21a   : > { %904 = vmax.xlane.f32.xlu0 %v903_v22  ;;  %v907_v27 = vmax.f32 %v4019_v17, %v906_v23 }
 0x21c   : > { %908 = vmax.xlane.f32.xlu1 %v907_v27 }
 0x21d   : > { %v4027_v31 = vpop.f32.mrb[20].mxu1 }
 0x21e   : > { %v4029_v33 = vpop.f32.mrb[21].mxu1 }
 0x21f   : > { %v910_v34 = vsel %vm829_vm2, %v4029_v33, -inf  ;;  %v4033_v38 = vpop.f32.mrb[22].mxu1 }
 0x220   : > { %v4035_v42 = vpop.f32.mrb[23].mxu1  ;;  %v911_v43 = vmax.f32 %v4027_v31, %v910_v34  ;;  %v1340_v34 = vpop.f32.mrb[72].mxu0 }
 0x221   : > { %v914_v45 = vsel %vm829_vm2, %v4035_v42, -inf }
 0x222   : > { %912 = vmax.xlane.f32.xlu0 %v911_v43  ;;  %v915_v49 = vmax.f32 %v4033_v38, %v914_v45  ;;  %v3079_v43 = vpop.f32.mrb[73].mxu0 }
 0x223   : > { %v1343_v45 = vpop.f32.mrb[74].mxu0 }
 0x224   : > { %916 = vmax.xlane.f32.xlu1 %v915_v49  ;;  %v4072_v49 = vld [vmem:[%s5187_s4] ss:$0 sm:$0xff] }
 0x225   : > { %v4041_v53 = vpop.f32.mrb[24].mxu1 }
 0x226   : > { %v4043_v54 = vpop.f32.mrb[25].mxu1 }
 0x227   : > { %5208 = vst [vmem:[#allocation4_spill] sm:$0xff] %v4043_v54  ;;  %v918_v56 = vsel %vm829_vm2, %v4043_v54, -inf  ;;  %v4047_v60 = vpop.f32.mrb[26].mxu1 }
 0x228   : > { %5209 = vst [vmem:[#allocation5_spill] sm:$0xff] %v4047_v60  ;;  %v4049_v63 = vpop.f32.mrb[27].mxu1  ;;  %v919_v0 = vmax.f32 %v4041_v53, %v918_v56  ;;  %v3080_v56 = vpop.f32.mrb[75].mxu0 }
 0x229   : > { %5210 = vst [vmem:[#allocation6_spill] sm:$0xff] %v4049_v63  ;;  %v922_v20 = vsel %vm829_vm2, %v4049_v63, -inf  ;;  %v1348_v3 = vpop.f32.mrb[76].mxu0 }
 0x22a   : > { %920 = vmax.xlane.f32.xlu0 %v919_v0  ;;  %v923_v32 = vmax.f32 %v4047_v60, %v922_v20  ;;  %v1341_v0 = vadd.f32 %v4072_v49, %v1340_v34  ;;  %v1344_v20 = vadd.f32 %v4072_v49, %v1343_v45  ;;  %v1349_v43 = vadd.f32 %v4072_v49, %v1348_v3 }
 0x22c   : > { %924 = vmax.xlane.f32.xlu1 %v923_v32  ;;  %v1468_v32 = vpack.c.bf16 %v1344_v20, %v1341_v0 }
 0x22d   : > { %v4055_v58 = vpop.f32.mrb[28].mxu1 }
 0x22e   : > { %5211 = vst [vmem:[#allocation7_spill] sm:$0xff] %v4055_v58  ;;  %v4059_v2 = vsel %vm926_vm3, %v4055_v58, -inf  ;;  %v4061_v6 = vpop.f32.mrb[29].mxu1  ;;  %1525 = vmatpush1.bf16.msra.mxu1 %v1468_v32 }
 0x22f   : > { %5212 = vst [vmem:[#allocation8_spill] sm:$0xff] %v4061_v6  ;;  %v4065_v13 = vsel %vm928_vm4, %v4061_v6, -inf  ;;  %v826_v22 = vpop.f32.mrb[30].mxu1 }
 0x230   : > { %v827_v23 = vpop.f32.mrb[31].mxu1  ;;  %v3083_v22 = vpop.f32.mrb[77].mxu0 }
 0x231   : > { %v5213_v23 = vmov 0   ;;  %v1351_v27 = vpop.f32.mrb[78].mxu0 }
 0x232   : > { %1526 = vmatprep.subr.bf16.mxu1 %v5213_v23  ;;  %v3084_v6 = vpop.f32.mrb[79].mxu0  ;;  %v1352_v58 = vadd.f32 %v4072_v49, %v1351_v27 }
 0x233   : > { %v1356_v60 = vpop.f32.mrb[80].mxu0 }
 0x234   : > { %v1469_v63 = vpack.c.bf16 %v1352_v58, %v1349_v43  ;;  %v1357_v56 = vadd.f32 %v4072_v49, %v1356_v60  ;;  %v3087_v54 = vpop.f32.mrb[81].mxu0 }
 0x235   : > { %v1359_v34 = vpop.f32.mrb[82].mxu0 }
 0x236   : > { %1527 = vmatpush1.bf16.msra.mxu1 %v1469_v63  ;;  %v1360_v45 = vadd.f32 %v4072_v49, %v1359_v34  ;;  %v3088_v0 = vpop.f32.mrb[83].mxu0 }
 0x237   : > { %1528 = vmatprep.subr.bf16.mxu1 %v5213_v23  ;;  %v1364_v32 = vpop.f32.mrb[84].mxu0 }
 0x238   : > { %v1470_v20 = vpack.c.bf16 %v1360_v45, %v1357_v56  ;;  %v1365_v6 = vadd.f32 %v4072_v49, %v1364_v32  ;;  %v3091_v3 = vpop.f32.mrb[85].mxu0 }
 0x239   : > { %v1367_v22 = vpop.f32.mrb[86].mxu0 }
 0x23a   : > { %1529 = vmatpush1.bf16.msra.mxu1 %v1470_v20  ;;  %v1368_v58 = vadd.f32 %v4072_v49, %v1367_v22  ;;  %v3092_v60 = vpop.f32.mrb[87].mxu0 }
 0x23b   : > { %1530 = vmatprep.subr.bf16.mxu1 %v5213_v23  ;;  %v1372_v63 = vpop.f32.mrb[88].mxu0 }
 0x23c   : > { %v1471_v54 = vpack.c.bf16 %v1368_v58, %v1365_v6  ;;  %v1373_v27 = vadd.f32 %v4072_v49, %v1372_v63  ;;  %v3095_v43 = vpop.f32.mrb[89].mxu0 }
 0x23d   : > { %v1375_v56 = vpop.f32.mrb[90].mxu0 }
 0x23e   : > { %1531 = vmatpush1.bf16.msra.mxu1 %v1471_v54  ;;  %v1376_v34 = vadd.f32 %v4072_v49, %v1375_v56  ;;  %v3096_v45 = vpop.f32.mrb[91].mxu0 }
 0x23f   : > { %1532 = vmatprep.subr.bf16.mxu1 %v5213_v23  ;;  %v1380_v20 = vpop.f32.mrb[92].mxu0 }
 0x240   : > { %v1472_v0 = vpack.c.bf16 %v1376_v34, %v1373_v27  ;;  %v1381_v32 = vadd.f32 %v4072_v49, %v1380_v20  ;;  %v3099_v3 = vpop.f32.mrb[93].mxu0 }
 0x241   : > { %v1383_v22 = vpop.f32.mrb[94].mxu0 }
 0x242   : > { %1533 = vmatpush1.bf16.msra.mxu1 %v1472_v0  ;;  %v1384_v6 = vadd.f32 %v4072_v49, %v1383_v22  ;;  %v3100_v58 = vpop.f32.mrb[95].mxu0 }
 0x243   : > { %1534 = vmatprep.subr.bf16.mxu1 %v5213_v23  ;;  %v1388_v54 = vpop.f32.mrb[96].mxu0 }
 0x244   : > { %v1473_v60 = vpack.c.bf16 %v1384_v6, %v1381_v32  ;;  %v1389_v63 = vadd.f32 %v4072_v49, %v1388_v54  ;;  %v3103_v43 = vpop.f32.mrb[97].mxu0 }
 0x245   : > { %v1391_v27 = vpop.f32.mrb[98].mxu0 }
 0x246   : > { %1535 = vmatpush1.bf16.msra.mxu1 %v1473_v60  ;;  %v1392_v56 = vadd.f32 %v4072_v49, %v1391_v27  ;;  %v3104_v34 = vpop.f32.mrb[99].mxu0 }
 0x247   : > { %1536 = vmatprep.subr.bf16.mxu1 %v5213_v23  ;;  %v1396_v6 = vpop.f32.mrb[100].mxu0 }
 0x248   : > { %v1474_v3 = vpack.c.bf16 %v1392_v56, %v1389_v63  ;;  %v1397_v43 = vadd.f32 %v4072_v49, %v1396_v6  ;;  %v3107_v27 = vpop.f32.mrb[101].mxu0 }
 0x24a   : > { %1537 = vmatpush1.bf16.msra.mxu1 %v1474_v3 }
 0x24b   : > { %1538 = vmatprep.subr.bf16.mxu1 %v5213_v23 }
 0x25f   : > { %v833_v45 = vpop.xlane.xlu0 %832 }
 0x260   : > { %v933_v0 = vsub.f32 %v3887_v8, %v833_v45  ;;  %v934_v20 = vsub.f32 %v3889_v12, %v833_v45  ;;  %v1399_v8 = vpop.f32.mrb[102].mxu0 }
 0x261   : > { %v1400_v63 = vadd.f32 %v4072_v49, %v1399_v8  ;;  %v3108_v56 = vpop.f32.mrb[103].mxu0 }
 0x262   : > { %v983_v22 = vmul.f32 1.442695, %v933_v0  ;;  %v985_v58 = vmul.f32 1.442695, %v934_v20 }
 0x263   : > { %v837_v32 = vpop.xlane.xlu0 %836  ;;  %v1475_v3 = vpack.c.bf16 %v1400_v63, %v1397_v43 }
 0x264   : > { %3312 = vpow2.f32 %v983_v22  ;;  %v935_v60 = vsub.f32 %v3891_v16, %v837_v32  ;;  %v936_v54 = vsub.f32 %v3895_v24, %v837_v32  ;;  %v1404_v32 = vpop.f32.mrb[104].mxu0 }
 0x265   : > { %3314 = vpow2.f32 %v985_v58  ;;  %1539 = vmatpush1.bf16.msra.mxu1 %v1475_v3 }
 0x266   : > { %v987_v34 = vmul.f32 1.442695, %v935_v60  ;;  %v989_v12 = vmul.f32 1.442695, %v936_v54  ;;  %1540 = vmatprep.subr.bf16.mxu1 %v5213_v23  ;;  %v3111_v60 = vpop.f32.mrb[105].mxu0 }
 0x267   : > { %v841_v45 = vpop.xlane.xlu1 %840  ;;  %v1407_v54 = vpop.f32.mrb[106].mxu0 }
 0x268   : > { %3316 = vpow2.f32 %v987_v34  ;;  %v937_v0 = vsub.f32 %v3901_v36, %v841_v45  ;;  %v938_v20 = vsub.f32 %v3903_v40, %v841_v45  ;;  %v1405_v36 = vadd.f32 %v4072_v49, %v1404_v32  ;;  %v3112_v34 = vpop.f32.mrb[107].mxu0 }
 0x269   : > { %3318 = vpow2.f32 %v989_v12  ;;  %v1408_v8 = vadd.f32 %v4072_v49, %v1407_v54 }
 0x26a   : > { %v991_v16 = vmul.f32 1.442695, %v937_v0  ;;  %v993_v24 = vmul.f32 1.442695, %v938_v20 }
 0x26b   : > { %v845_v22 = vpop.xlane.xlu1 %844  ;;  %v1476_v20 = vpack.c.bf16 %v1408_v8, %v1405_v36 }
 0x26c   : > { %3320 = vpow2.f32 %v991_v16  ;;  %v939_v58 = vsub.f32 %v3905_v44, %v845_v22  ;;  %v940_v6 = vsub.f32 %v3909_v52, %v845_v22 }
 0x26d   : > { %3322 = vpow2.f32 %v993_v24  ;;  %1541 = vmatpush1.bf16.msra.mxu1 %v1476_v20 }
 0x26e   : > { %v4107_v40 = vpop.eup %3312  ;;  %v995_v43 = vmul.f32 1.442695, %v939_v58  ;;  %v997_v27 = vmul.f32 1.442695, %v940_v6  ;;  %1542 = vmatprep.subr.bf16.mxu1 %v5213_v23 }
 0x26f   : > { %v4110_v12 = vpop.eup %3314  ;;  %v849_v63 = vpop.xlane.xlu0 %848 }
 0x270   : > { %3324 = vpow2.f32 %v995_v43  ;;  %v941_v44 = vsub.f32 %v3915_v4, %v849_v63  ;;  %v942_v52 = vsub.f32 %v3917_v5, %v849_v63  ;;  %v1083_v56 = vsel %vm829_vm2, %v4110_v12, 0.0  ;;  %v1412_v4 = vpop.f32.mrb[108].mxu0 }
 0x271   : > { %3326 = vpow2.f32 %v997_v27  ;;  %v853_v45 = vpop.xlane.xlu1 %852  ;;  %v1084_v0 = vadd.f32 %v4107_v40, %v1083_v56  ;;  %v3115_v36 = vpop.f32.mrb[109].mxu0  ;;  %v5214_v63 = vmax.f32 %v4059_v2, %v4065_v13 }
 0x272   : > { %v4117_v3 = vpop.eup %3316  ;;  %v999_v16 = vmul.f32 1.442695, %v941_v44  ;;  %v1001_v24 = vmul.f32 1.442695, %v942_v52  ;;  %v943_v22 = vsub.f32 %v3921_v7, %v853_v45  ;;  %v944_v32 = vsub.f32 %v3923_v9, %v853_v45  ;;  %v1415_v9 = vpop.f32.mrb[110].mxu0 }
 0x273   : > { %v4121_v58 = vpop.eup %3318  ;;  %1085 = vadd.xlane.f32.xlu0 %v1084_v0  ;;  %v1413_v7 = vadd.f32 %v4072_v49, %v1412_v4  ;;  %v1416_v27 = vadd.f32 %v4072_v49, %v1415_v9  ;;  %v3116_v8 = vpop.f32.mrb[111].mxu0 }
 0x274   : > { %3328 = vpow2.f32 %v999_v16  ;;  %v1003_v5 = vmul.f32 1.442695, %v943_v22  ;;  %v1005_v6 = vmul.f32 1.442695, %v944_v32  ;;  %v1087_v60 = vsel %vm829_vm2, %v4121_v58, 0.0 }
 0x275   : > { %3330 = vpow2.f32 %v1001_v24  ;;  %v1088_v54 = vadd.f32 %v4117_v3, %v1087_v60  ;;  %v1477_v0 = vpack.c.bf16 %v1416_v27, %v1413_v7 }
 0x276   : > { %v4128_v43 = vpop.eup %3320  ;;  %3332 = vpow2.f32 %v1003_v5 }
 0x277   : > { %v4131_v34 = vpop.eup %3322  ;;  %3334 = vpow2.f32 %v1005_v6  ;;  %931 = vmax.xlane.f32.xlu0 %v5214_v63  ;;  %1089 = vadd.xlane.f32.xlu1 %v1088_v54  ;;  %v857_v44 = vpop.xlane.xlu0 %856 }
 0x278   : > { %v945_v52 = vsub.f32 %v3929_v14, %v857_v44  ;;  %v946_v56 = vsub.f32 %v3931_v15, %v857_v44  ;;  %v1091_v45 = vsel %vm829_vm2, %v4131_v34, 0.0  ;;  %1543 = vmatpush1.bf16.msra.mxu1 %v1477_v0  ;;  %v1420_v44 = vpop.f32.mrb[112].mxu0 }
 0x279   : > { %v861_v20 = vpop.xlane.xlu1 %860  ;;  %v1092_v16 = vadd.f32 %v4128_v43, %v1091_v45  ;;  %1544 = vmatprep.subr.bf16.mxu1 %v5213_v23 }
 0x27a   : > { %v4141_v24 = vpop.eup %3324  ;;  %v1007_v22 = vmul.f32 1.442695, %v945_v52  ;;  %v1009_v32 = vmul.f32 1.442695, %v946_v56  ;;  %v947_v2 = vsub.f32 %v3935_v18, %v861_v20  ;;  %v948_v13 = vsub.f32 %v3937_v19, %v861_v20  ;;  %v3119_v20 = vpop.f32.mrb[113].mxu0 }
 0x27b   : > { %v4145_v4 = vpop.eup %3326  ;;  %1093 = vadd.xlane.f32.xlu1 %v1092_v16 }
 0x27c   : > { %3336 = vpow2.f32 %v1007_v22  ;;  %v1011_v14 = vmul.f32 1.442695, %v947_v2  ;;  %v1013_v15 = vmul.f32 1.442695, %v948_v13  ;;  %v1095_v5 = vsel %vm829_vm2, %v4145_v4, 0.0 }
 0x27d   : > { %3338 = vpow2.f32 %v1009_v32  ;;  %v1096_v6 = vadd.f32 %v4141_v24, %v1095_v5  ;;  %v1421_v13 = vadd.f32 %v4072_v49, %v1420_v44 }
 0x27e   : > { %v4151_v60 = vpop.eup %3328  ;;  %3340 = vpow2.f32 %v1011_v14 }
 0x27f   : > { %v4153_v18 = vpop.eup %3330  ;;  %3342 = vpow2.f32 %v1013_v15  ;;  %1097 = vadd.xlane.f32.xlu0 %v1096_v6  ;;  %v865_v19 = vpop.xlane.xlu0 %864 }
 0x280   : > { %v4155_v36 = vpop.eup %3332  ;;  %v949_v54 = vsub.f32 %v3943_v25, %v865_v19  ;;  %v950_v7 = vsub.f32 %v3945_v26, %v865_v19  ;;  %v1099_v9 = vsel %vm829_vm2, %v4153_v18, 0.0  ;;  %v1423_v26 = vpop.f32.mrb[114].mxu0 }
 0x281   : > { %v4161_v27 = vpop.eup %3334  ;;  %v869_v8 = vpop.xlane.xlu1 %868  ;;  %v1100_v63 = vadd.f32 %v4151_v60, %v1099_v9  ;;  %v1424_v14 = vadd.f32 %v4072_v49, %v1423_v26 }
 0x282   : > { %v1015_v52 = vmul.f32 1.442695, %v949_v54  ;;  %v1017_v56 = vmul.f32 1.442695, %v950_v7  ;;  %v951_v45 = vsub.f32 %v3949_v29, %v869_v8  ;;  %v952_v0 = vsub.f32 %v3951_v30, %v869_v8  ;;  %v3120_v2 = vpop.f32.mrb[115].mxu0 }
 0x283   : > { %1101 = vadd.xlane.f32.xlu1 %v1100_v63  ;;  %v1103_v25 = vsel %vm829_vm2, %v4161_v27, 0.0  ;;  %v1478_v5 = vpack.c.bf16 %v1424_v14, %v1421_v13  ;;  %v1428_v9 = vpop.f32.mrb[116].mxu0 }
 0x284   : > { %3344 = vpow2.f32 %v1015_v52  ;;  %v1019_v16 = vmul.f32 1.442695, %v951_v45  ;;  %v1021_v22 = vmul.f32 1.442695, %v952_v0  ;;  %v1104_v32 = vadd.f32 %v4155_v36, %v1103_v25  ;;  %v3123_v52 = vpop.f32.mrb[117].mxu0 }
 0x285   : > { %3346 = vpow2.f32 %v1017_v56  ;;  %1545 = vmatpush1.bf16.msra.mxu1 %v1478_v5  ;;  %v1431_v25 = vpop.f32.mrb[118].mxu0 }
 0x286   : > { %v4171_v29 = vpop.eup %3336  ;;  %3348 = vpow2.f32 %v1019_v16  ;;  %1105 = vadd.xlane.f32.xlu0 %v1104_v32  ;;  %1546 = vmatprep.subr.bf16.mxu1 %v5213_v23  ;;  %v3124_v32 = vpop.f32.mrb[119].mxu0 }
 0x287   : > { %v4173_v30 = vpop.eup %3338  ;;  %3350 = vpow2.f32 %v1021_v22  ;;  %v873_v15 = vpop.xlane.xlu0 %872 }
 0x288   : > { %v4175_v6 = vpop.eup %3340  ;;  %v953_v19 = vsub.f32 %v3957_v35, %v873_v15  ;;  %v954_v54 = vsub.f32 %v3959_v37, %v873_v15  ;;  %v1107_v7 = vsel %vm829_vm2, %v4173_v30, 0.0  ;;  %v1429_v37 = vadd.f32 %v4072_v49, %v1428_v9 }
 0x289   : > { %v4181_v8 = vpop.eup %3342  ;;  %v877_v63 = vpop.xlane.xlu1 %876  ;;  %v1108_v44 = vadd.f32 %v4171_v29, %v1107_v7 }
 0x28a   : > { %v1023_v56 = vmul.f32 1.442695, %v953_v19  ;;  %v1025_v45 = vmul.f32 1.442695, %v954_v54  ;;  %v955_v0 = vsub.f32 %v3963_v39, %v877_v63  ;;  %v956_v20 = vsub.f32 %v3965_v41, %v877_v63  ;;  %v1436_v41 = vpop.f32.mrb[120].mxu0 }
 0x28b   : > { %1109 = vadd.xlane.f32.xlu1 %v1108_v44  ;;  %v1111_v35 = vsel %vm829_vm2, %v4181_v8, 0.0  ;;  %v1432_v39 = vadd.f32 %v4072_v49, %v1431_v25  ;;  %v1437_v5 = vadd.f32 %v4072_v49, %v1436_v41  ;;  %v3127_v19 = vpop.f32.mrb[121].mxu0 }
 0x28c   : > { %3352 = vpow2.f32 %v1023_v56  ;;  %v1027_v26 = vmul.f32 1.442695, %v955_v0  ;;  %v1029_v16 = vmul.f32 1.442695, %v956_v20  ;;  %v1112_v22 = vadd.f32 %v4175_v6, %v1111_v35  ;;  %v1439_v44 = vpop.f32.mrb[122].mxu0 }
 0x28d   : > { %3354 = vpow2.f32 %v1025_v45  ;;  %v1479_v15 = vpack.c.bf16 %v1432_v39, %v1429_v37  ;;  %v1480_v0 = vpack.c.bf16 %v1437_v5, %v1437_v5  ;;  %v3128_v49 = vpop.f32.mrb[123].mxu0 }
 0x28e   : > { %v4192_v2 = vpop.eup %3344  ;;  %3356 = vpow2.f32 %v1027_v26  ;;  %1113 = vadd.xlane.f32.xlu0 %v1112_v22 }
 0x28f   : > { %v4194_v13 = vpop.eup %3346  ;;  %3358 = vpow2.f32 %v1029_v16  ;;  %v881_v14 = vpop.xlane.xlu0 %880  ;;  %1547 = vmatpush1.bf16.msra.mxu1 %v1479_v15  ;;  %v1522_v25 = vsel %vm1520_vm5, %v1480_v0, 0 }
 0x290   : > { %v4197_v54 = vpop.eup %3348  ;;  %v957_v7 = vsub.f32 %v3971_v46, %v881_v14  ;;  %v958_v9 = vsub.f32 %v3973_v47, %v881_v14  ;;  %v1115_v63 = vsel %vm829_vm2, %v4194_v13, 0.0  ;;  %1548 = vmatprep.subr.bf16.mxu1 %v5213_v23 }
 0x291   : > { %v4203_v52 = vpop.eup %3350  ;;  %v885_v56 = vpop.xlane.xlu1 %884  ;;  %v1116_v45 = vadd.f32 %v4192_v2, %v1115_v63 }
 0x292   : > { %v1031_v20 = vmul.f32 1.442695, %v957_v7  ;;  %v1033_v35 = vmul.f32 1.442695, %v958_v9  ;;  %v959_v37 = vsub.f32 %v3977_v50, %v885_v56  ;;  %v960_v46 = vsub.f32 %v3979_v51, %v885_v56 }
 0x293   : > { %1117 = vadd.xlane.f32.xlu1 %v1116_v45  ;;  %v1119_v47 = vsel %vm829_vm2, %v4203_v52, 0.0  ;;  %1549 = vmatpush1.bf16.msra.mxu1 %v1522_v25 }
 0x294   : > { %3360 = vpow2.f32 %v1031_v20  ;;  %v1035_v26 = vmul.f32 1.442695, %v959_v37  ;;  %v1037_v16 = vmul.f32 1.442695, %v960_v46  ;;  %v1120_v22 = vadd.f32 %v4197_v54, %v1119_v47 }
 0x295   : > { %3362 = vpow2.f32 %v1033_v35 }
 0x296   : > { %v4213_v32 = vpop.eup %3352  ;;  %3364 = vpow2.f32 %v1035_v26  ;;  %1121 = vadd.xlane.f32.xlu0 %v1120_v22 }
 0x297   : > { %v4215_v50 = vpop.eup %3354  ;;  %3366 = vpow2.f32 %v1037_v16  ;;  %v889_v51 = vpop.xlane.xlu0 %888 }
 0x298   : > { %v4217_v23 = vpop.eup %3356  ;;  %v961_v39 = vsub.f32 %v3985_v57, %v889_v51  ;;  %v962_v41 = vsub.f32 %v3987_v59, %v889_v51  ;;  %v1123_v14 = vsel %vm829_vm2, %v4215_v50, 0.0 }
 0x299   : > { %v4223_v15 = vpop.eup %3358  ;;  %v893_v5 = vpop.xlane.xlu1 %892  ;;  %v1124_v19 = vadd.f32 %v4213_v32, %v1123_v14 }
 0x29a   : > { %v1039_v7 = vmul.f32 1.442695, %v961_v39  ;;  %v1041_v9 = vmul.f32 1.442695, %v962_v41  ;;  %v963_v63 = vsub.f32 %v3991_v61, %v893_v5  ;;  %v964_v44 = vsub.f32 %v3993_v62, %v893_v5 }
 0x29b   : > { %1125 = vadd.xlane.f32.xlu1 %v1124_v19  ;;  %v1127_v57 = vsel %vm829_vm2, %v4223_v15, 0.0 }
 0x29c   : > { %3368 = vpow2.f32 %v1039_v7  ;;  %v1043_v59 = vmul.f32 1.442695, %v963_v63  ;;  %v1045_v56 = vmul.f32 1.442695, %v964_v44  ;;  %v1128_v45 = vadd.f32 %v4217_v23, %v1127_v57 }
 0x29d   : > { %3370 = vpow2.f32 %v1041_v9 }
 0x29e   : > { %v4231_v0 = vpop.eup %3360  ;;  %3372 = vpow2.f32 %v1043_v59  ;;  %1129 = vadd.xlane.f32.xlu0 %v1128_v45 }
 0x29f   : > { %v4233_v49 = vpop.eup %3362  ;;  %3374 = vpow2.f32 %v1045_v56  ;;  %v897_v61 = vpop.xlane.xlu0 %896 }
 0x2a0   : > { %v4235_v20 = vpop.eup %3364  ;;  %v965_v62 = vsub.f32 %v3999_v28, %v897_v61  ;;  %v966_v35 = vsub.f32 %v4001_v1, %v897_v61  ;;  %v1131_v37 = vsel %vm829_vm2, %v4233_v49, 0.0 }
 0x2a1   : > { %v4241_v46 = vpop.eup %3366  ;;  %v901_v47 = vpop.xlane.xlu1 %900  ;;  %v1132_v25 = vadd.f32 %v4231_v0, %v1131_v37 }
 0x2a2   : > { %v1047_v26 = vmul.f32 1.442695, %v965_v62  ;;  %v1049_v16 = vmul.f32 1.442695, %v966_v35  ;;  %v967_v22 = vsub.f32 %v4005_v48, %v901_v47  ;;  %v968_v51 = vsub.f32 %v4007_v55, %v901_v47 }
 0x2a3   : > { %1133 = vadd.xlane.f32.xlu1 %v1132_v25  ;;  %v1135_v28 = vsel %vm829_vm2, %v4241_v46, 0.0 }
 0x2a4   : > { %3376 = vpow2.f32 %v1047_v26  ;;  %v1051_v1 = vmul.f32 1.442695, %v967_v22  ;;  %v1053_v39 = vmul.f32 1.442695, %v968_v51  ;;  %v1136_v41 = vadd.f32 %v4235_v20, %v1135_v28 }
 0x2a5   : > { %3378 = vpow2.f32 %v1049_v16 }
 0x2a6   : > { %v4249_v14 = vpop.eup %3368  ;;  %3380 = vpow2.f32 %v1051_v1  ;;  %1137 = vadd.xlane.f32.xlu0 %v1136_v41 }
 0x2a7   : > { %v4251_v5 = vpop.eup %3370  ;;  %3382 = vpow2.f32 %v1053_v39  ;;  %v905_v48 = vpop.xlane.xlu0 %904 }
 0x2a8   : > { %v4253_v19 = vpop.eup %3372  ;;  %v969_v55 = vsub.f32 %v4013_v10, %v905_v48  ;;  %v970_v7 = vsub.f32 %v4015_v11, %v905_v48  ;;  %v1139_v9 = vsel %vm829_vm2, %v4251_v5, 0.0 }
 0x2a9   : > { %v4259_v63 = vpop.eup %3374  ;;  %v909_v44 = vpop.xlane.xlu1 %908  ;;  %v1140_v57 = vadd.f32 %v4249_v14, %v1139_v9 }
 0x2aa   : > { %v1055_v59 = vmul.f32 1.442695, %v969_v55  ;;  %v1057_v56 = vmul.f32 1.442695, %v970_v7  ;;  %v971_v45 = vsub.f32 %v4019_v17, %v909_v44  ;;  %v972_v61 = vsub.f32 %v4021_v21, %v909_v44 }
 0x2ab   : > { %1141 = vadd.xlane.f32.xlu1 %v1140_v57  ;;  %v1143_v10 = vsel %vm829_vm2, %v4259_v63, 0.0 }
 0x2ac   : > { %3384 = vpow2.f32 %v1055_v59  ;;  %v1059_v11 = vmul.f32 1.442695, %v971_v45  ;;  %v1061_v62 = vmul.f32 1.442695, %v972_v61  ;;  %v1144_v35 = vadd.f32 %v4253_v19, %v1143_v10  ;;  %v5215_v59 = vld [vmem:[#allocation4_spill] sm:$0xff] }
 0x2ad   : > { %3386 = vpow2.f32 %v1057_v56 }
 0x2ae   : > { %v4267_v37 = vpop.eup %3376  ;;  %3388 = vpow2.f32 %v1059_v11  ;;  %1145 = vadd.xlane.f32.xlu0 %v1144_v35 }
 0x2af   : > { %v4269_v47 = vpop.eup %3378  ;;  %3390 = vpow2.f32 %v1061_v62  ;;  %v913_v17 = vpop.xlane.xlu0 %912 }
 0x2b0   : > { %v4271_v25 = vpop.eup %3380  ;;  %v973_v21 = vsub.f32 %v4027_v31, %v913_v17  ;;  %v974_v26 = vsub.f32 %v4029_v33, %v913_v17  ;;  %v1147_v16 = vsel %vm829_vm2, %v4269_v47, 0.0  ;;  %v5216_v17 = vld [vmem:[#allocation5_spill] sm:$0xff] }
 0x2b1   : > { %v4277_v22 = vpop.eup %3382  ;;  %v917_v51 = vpop.xlane.xlu1 %916  ;;  %v1148_v28 = vadd.f32 %v4267_v37, %v1147_v16 }
 0x2b2   : > { %v1063_v1 = vmul.f32 1.442695, %v973_v21  ;;  %v1065_v39 = vmul.f32 1.442695, %v974_v26  ;;  %v975_v41 = vsub.f32 %v4033_v38, %v917_v51  ;;  %v976_v48 = vsub.f32 %v4035_v42, %v917_v51  ;;  %v5217_v26 = vld [vmem:[#allocation6_spill] sm:$0xff] }
 0x2b3   : > { %1149 = vadd.xlane.f32.xlu1 %v1148_v28  ;;  %v1151_v31 = vsel %vm829_vm2, %v4277_v22, 0.0 }
 0x2b4   : > { %3392 = vpow2.f32 %v1063_v1  ;;  %v1067_v33 = vmul.f32 1.442695, %v975_v41  ;;  %v1069_v55 = vmul.f32 1.442695, %v976_v48  ;;  %v1152_v7 = vadd.f32 %v4271_v25, %v1151_v31 }
 0x2b5   : > { %3394 = vpow2.f32 %v1065_v39 }
 0x2b6   : > { %v4285_v9 = vpop.eup %3384  ;;  %3396 = vpow2.f32 %v1067_v33  ;;  %1153 = vadd.xlane.f32.xlu0 %v1152_v7 }
 0x2b7   : > { %v4287_v44 = vpop.eup %3386  ;;  %3398 = vpow2.f32 %v1069_v55  ;;  %v921_v38 = vpop.xlane.xlu0 %920 }
 0x2b8   : > { %v4289_v57 = vpop.eup %3388  ;;  %v977_v42 = vsub.f32 %v4041_v53, %v921_v38  ;;  %v978_v56 = vsub.f32 %v5215_v59, %v921_v38  ;;  %v1155_v45 = vsel %vm829_vm2, %v4287_v44, 0.0 }
 0x2b9   : > { %v4295_v61 = vpop.eup %3390  ;;  %v925_v10 = vpop.xlane.xlu1 %924  ;;  %v1156_v11 = vadd.f32 %v4285_v9, %v1155_v45 }
 0x2ba   : > { %v1071_v62 = vmul.f32 1.442695, %v977_v42  ;;  %v1073_v35 = vmul.f32 1.442695, %v978_v56  ;;  %v979_v21 = vsub.f32 %v5216_v17, %v925_v10  ;;  %v980_v16 = vsub.f32 %v5217_v26, %v925_v10  ;;  %v4334_v17 = vld [vmem:[%s5189_s6] sm:$0xff] }
 0x2bb   : > { %1157 = vadd.xlane.f32.xlu1 %v1156_v11  ;;  %v1159_v53 = vsel %vm829_vm2, %v4295_v61, 0.0 }
 0x2bc   : > { %3400 = vpow2.f32 %v1071_v62  ;;  %v1075_v51 = vmul.f32 1.442695, %v979_v21  ;;  %v1077_v28 = vmul.f32 1.442695, %v980_v16  ;;  %v1160_v1 = vadd.f32 %v4289_v57, %v1159_v53  ;;  %v4339_v21 = vld [vmem:[%s5190_s7] sm:$0xff]  ;;  %v1717_v16 = vld [vmem:[%s5189_s6 + $0x28] sm:$0xff] }
 0x2bd   : > { %3402 = vpow2.f32 %v1073_v35  ;;  %5220 = vst [vmem:[#allocation6_spill] sm:$0xff] %v4339_v21  ;;  %v2323_v26 = vmul.f32 %v4339_v21, %v4334_v17  ;;  %v4349_v53 = vld [vmem:[%s5190_s7 + $0x28] sm:$0xff] }
 0x2be   : > { %v4303_v39 = vpop.eup %3392  ;;  %3404 = vpow2.f32 %v1075_v51  ;;  %1161 = vadd.xlane.f32.xlu0 %v1160_v1  ;;  %v2328_v51 = vmul.f32 %v4349_v53, %v1717_v16  ;;  %v4358_v1 = vld [vmem:[%s5190_s7 + $0x38] sm:$0xff] }
 0x2bf   : > { %v4305_v41 = vpop.eup %3394  ;;  %3406 = vpow2.f32 %v1077_v28  ;;  %v1719_v28 = vld [vmem:[%s5189_s6 + $0x38] sm:$0xff] }
 0x2c0   : > { %v4307_v48 = vpop.eup %3396  ;;  %v1163_v31 = vsel %vm829_vm2, %v4305_v41, 0.0 }
 0x2c1   : > { %v4311_v33 = vpop.eup %3398  ;;  %v1164_v55 = vadd.f32 %v4303_v39, %v1163_v31  ;;  %v2330_v31 = vmul.f32 %v4358_v1, %v1719_v28 }
 0x2c2   : > { %v1167_v7 = vsel %vm829_vm2, %v4311_v33, 0.0 }
 0x2c3   : > { %1165 = vadd.xlane.f32.xlu1 %v1164_v55  ;;  %v1168_v38 = vadd.f32 %v4307_v48, %v1167_v7  ;;  %v1721_v55 = vld [vmem:[%s5189_s6 + $0x48] sm:$0xff] }
 0x2c4   : > { %v4367_v7 = vld [vmem:[%s5190_s7 + $0x48] sm:$0xff] }
 0x2c5   : > { %1169 = vadd.xlane.f32.xlu0 %v1168_v38  ;;  %5221 = vst [vmem:[#allocation9_spill] sm:$0xff] %v4367_v7  ;;  %v2332_v38 = vmul.f32 %v4367_v7, %v1721_v55 }
 0x2c6   : > { %v4317_v42 = vpop.eup %3400 }
 0x2c7   : > { %5218 = vst [vmem:[#allocation4_spill] sm:$0xff] %v4317_v42  ;;  %v4319_v59 = vpop.eup %3402 }
 0x2c8   : > { %v4321_v56 = vpop.eup %3404  ;;  %v1171_v45 = vsel %vm829_vm2, %v4319_v59, 0.0 }
 0x2c9   : > { %5219 = vst [vmem:[#allocation5_spill] sm:$0xff] %v4321_v56  ;;  %v4325_v10 = vpop.eup %3406  ;;  %v1172_v11 = vadd.f32 %v4317_v42, %v1171_v45  ;;  %v1723_v45 = vld [vmem:[%s5189_s6 + $0x58] sm:$0xff] }
 0x2ca   : > { %v1175_v62 = vsel %vm829_vm2, %v4325_v10, 0.0 }
 0x2cb   : > { %1173 = vadd.xlane.f32.xlu1 %v1172_v11  ;;  %v1176_v35 = vadd.f32 %v4321_v56, %v1175_v62  ;;  %v4376_v11 = vld [vmem:[%s5190_s7 + $0x58] sm:$0xff] }
 0x2cc   : > { %5222 = vst [vmem:[#allocation10_spill] sm:$0xff] %v4376_v11  ;;  %v2334_v62 = vmul.f32 %v4376_v11, %v1723_v45  ;;  %v5225_v11 = vld [vmem:[#allocation8_spill] sm:$0xff]  ;;  %v1727_v56 = vld [vmem:[%s5189_s6 + $0x78] sm:$0xff] }
 0x2cd   : > { %1177 = vadd.xlane.f32.xlu0 %v1176_v35 }
 0x2e3   : > { %2350 = vperm.xlu0 %3181, %v2323_v26   ;;  %v1725_v26 = vld [vmem:[%s5189_s6 + $0x68] sm:$0xff] }
 0x2e7   : > { %2375 = vperm.xlu0 %3181, %v2328_v51  }
 0x2eb   : > { %1893 = vperm.xlu0 %3181, %v1717_v16   ;;  %v4385_v16 = vld [vmem:[%s5190_s7 + $0x68] sm:$0xff] }
 0x2ec   : > { %5223 = vst [vmem:[#allocation11_spill] sm:$0xff] %v4385_v16  ;;  %v2336_v51 = vmul.f32 %v4385_v16, %v1725_v26 }
 0x2ef   : > { %2385 = vperm.xlu0 %3181, %v2330_v31  }
 0x2f3   : > { %1903 = vperm.xlu0 %3181, %v1719_v28  }
 0x2f7   : > { %2395 = vperm.xlu0 %3181, %v2332_v38  }
 0x2fb   : > { %1913 = vperm.xlu0 %3181, %v1721_v55   ;;  %v5224_v55 = vld [vmem:[#allocation7_spill] sm:$0xff] }
 0x2ff   : > { %2405 = vperm.xlu0 %3181, %v2334_v62  }
 0x300   : > { %v1086_v35 = vpop.xlane.xlu0 %1085 }
 0x301   : > { %3408 = vrcp.f32 %v1086_v35 }
 0x303   : > { %1923 = vperm.xlu0 %3181, %v1723_v45   ;;  %v4396_v45 = vld [vmem:[%s5190_s7 + $0x78] sm:$0xff] }
 0x304   : > { %v932_v28 = vpop.xlane.xlu0 %931  ;;  %v1090_v31 = vpop.xlane.xlu1 %1089  ;;  %5226 = vst [vmem:[#allocation7_spill] sm:$0xff] %v4396_v45 }
 0x305   : > { %v981_v38 = vsub.f32 %v5224_v55, %v932_v28  ;;  %v982_v62 = vsub.f32 %v5225_v11, %v932_v28  ;;  %3410 = vrcp.f32 %v1090_v31  ;;  %v2338_v11 = vmul.f32 %v4396_v45, %v1727_v56 }
 0x307   : > { %v1079_v7 = vmul.f32 1.442695, %v981_v38  ;;  %v1081_v21 = vmul.f32 1.442695, %v982_v62  ;;  %2415 = vperm.xlu0 %3181, %v2336_v51  }
 0x308   : > { %v1094_v42 = vpop.xlane.xlu1 %1093 }
 0x309   : > { %3412 = vpow2.f32 %v1079_v7 }
 0x30a   : > { %3414 = vpow2.f32 %v1081_v21 }
 0x30b   : > { %3416 = vrcp.f32 %v1094_v42  ;;  %1933 = vperm.xlu0 %3181, %v1725_v26   ;;  %v3409_v28 = vpop.eup %3408 }
 0x30c   : > { %v1098_v35 = vpop.xlane.xlu0 %1097  ;;  %v1209_v31 = vmul.f32 %v3409_v28, %v4107_v40  ;;  %v1210_v62 = vmul.f32 %v3409_v28, %v4110_v12  ;;  %v1729_v12 = vld [vmem:[%s5189_s6 + $0x88] sm:$0xff] }
 0x30d   : > { %3418 = vrcp.f32 %v1098_v35 }
 0x30f   : > { %v3411_v51 = vpop.eup %3410  ;;  %2425 = vperm.xlu0 %3181, %v2338_v11   ;;  %v1738_v11 = vld [vmem:[%s5190_s7 + $0x8] sm:$0xff] }
 0x310   : > { %v1211_v55 = vmul.f32 %v3411_v51, %v4117_v3  ;;  %v1102_v38 = vpop.xlane.xlu1 %1101  ;;  %v1212_v16 = vmul.f32 %v3411_v51, %v4121_v58  ;;  %v4416_v3 = vld [vmem:[%s5190_s7 + $0x88] sm:$0xff] }
 0x311   : > { %3420 = vrcp.f32 %v1102_v38  ;;  %v2340_v28 = vmul.f32 %v4416_v3, %v1729_v12 }
 0x312   : > { %v1443_v21 = vpack.c.bf16 %v1212_v16, %v1210_v62  ;;  %v1442_v42 = vpack.c.bf16 %v1211_v55, %v1209_v31 }
 0x313   : > { %v4403_v7 = vpop.eup %3412  ;;  %v1106_v26 = vpop.xlane.xlu0 %1105  ;;  %1943 = vperm.xlu0 %3181, %v1727_v56  }
 0x314   : > { %v4405_v45 = vpop.eup %3414  ;;  %3422 = vrcp.f32 %v1106_v26  ;;  %2946 = vmatprep.mubr.msk.bf16.mxu1 %vm829_vm2, %v1443_v21  ;;  %v1179_v40 = vsel %vm926_vm3, %v4403_v7, 0.0 }
 0x315   : > { %v3417_v58 = vpop.eup %3416  ;;  %1557 = vmatmul.mubr.bf16.vlgmr.msra.gmra.mrb[32].mxu1 %v1442_v42  ;;  %v1180_v56 = vsel %vm928_vm4, %v4405_v45, 0.0 }
 0x316   : > { %v1181_v16 = vadd.f32 %v1180_v56, %v1179_v40  ;;  %v1214_v31 = vmul.f32 %v3417_v58, %v4131_v34  ;;  %v1213_v38 = vmul.f32 %v3417_v58, %v4128_v43  ;;  %v4438_v58 = vld [vmem:[%s5190_s7 + $0x98] sm:$0xff] }
 0x317   : > { %v3419_v35 = vpop.eup %3418  ;;  %2101 = vperm.xlu0 %3181, %v1738_v11  }
 0x318   : > { %1182 = vadd.xlane.f32.xlu1 %v1181_v16  ;;  %v1110_v51 = vpop.xlane.xlu1 %1109  ;;  %v1216_v55 = vmul.f32 %v3419_v35, %v4145_v4  ;;  %v1215_v62 = vmul.f32 %v3419_v35, %v4141_v24  ;;  %v1731_v24 = vld [vmem:[%s5189_s6 + $0x98] sm:$0xff] }
 0x319   : > { %3424 = vrcp.f32 %v1110_v51  ;;  %v2342_v51 = vmul.f32 %v4438_v58, %v1731_v24 }
 0x31a   : > { %v1445_v21 = vpack.c.bf16 %v1216_v55, %v1214_v31  ;;  %v1444_v42 = vpack.c.bf16 %v1215_v62, %v1213_v38 }
 0x31b   : > { %v1114_v26 = vpop.xlane.xlu0 %1113  ;;  %2435 = vperm.xlu0 %3181, %v2340_v28   ;;  %v3421_v40 = vpop.eup %3420 }
 0x31c   : > { %3426 = vrcp.f32 %v1114_v26  ;;  %2947 = vmatprep.mubr.msk.bf16.mxu1 %vm829_vm2, %v1445_v21  ;;  %v1218_v16 = vmul.f32 %v3421_v40, %v4153_v18  ;;  %v1217_v28 = vmul.f32 %v3421_v40, %v4151_v60  ;;  %v1713_v18 = vld [vmem:[%s5189_s6 + $0x8] sm:$0xff] }
 0x31d   : > { %1565 = vmatmul.mubr.bf16.gmra.mrb[36].mxu1 %v1444_v42  ;;  %v2324_v60 = vmul.f32 %v1738_v11, %v1713_v18 }
 0x31e   : > { %v3423_v56 = vpop.eup %3422 }
 0x31f   : > { %v1220_v34 = vmul.f32 %v3423_v56, %v4161_v27  ;;  %v1219_v4 = vmul.f32 %v3423_v56, %v4155_v36  ;;  %1953 = vperm.xlu0 %3181, %v1729_v12   ;;  %v1740_v36 = vld [vmem:[%s5190_s7 + $0x18] sm:$0xff] }
 0x320   : > { %v1118_v43 = vpop.xlane.xlu1 %1117 }
 0x321   : > { %v1447_v35 = vpack.c.bf16 %v1220_v34, %v1218_v16  ;;  %3428 = vrcp.f32 %v1118_v43  ;;  %v1446_v12 = vpack.c.bf16 %v1219_v4, %v1217_v28  ;;  %v4469_v34 = vld [vmem:[%s5190_s7 + $0x10] sm:$0xff] }
 0x323   : > { %v1122_v27 = vpop.xlane.xlu0 %1121  ;;  %2948 = vmatprep.mubr.msk.bf16.mxu1 %vm829_vm2, %v1447_v35  ;;  %2111 = vperm.xlu0 %3181, %v1740_v36   ;;  %v3425_v31 = vpop.eup %3424 }
 0x324   : > { %3430 = vrcp.f32 %v1122_v27  ;;  %v1222_v38 = vmul.f32 %v3425_v31, %v4173_v30  ;;  %v1221_v40 = vmul.f32 %v3425_v31, %v4171_v29  ;;  %v1733_v30 = vld [vmem:[%s5189_s6 + $0xa8] sm:$0xff] }
 0x325   : > { %1573 = vmatmul.mubr.bf16.gmra.mrb[40].mxu1 %v1446_v12 }
 0x326   : > { %v3427_v55 = vpop.eup %3426 }
 0x327   : > { %v1224_v62 = vmul.f32 %v3427_v55, %v4181_v8  ;;  %v1223_v21 = vmul.f32 %v3427_v55, %v4175_v6  ;;  %2445 = vperm.xlu0 %3181, %v2342_v51   ;;  %v4460_v6 = vld [vmem:[%s5190_s7 + $0xa8] sm:$0xff]  ;;  %v1714_v8 = vld [vmem:[%s5189_s6 + $0x10] sm:$0xff] }
 0x328   : > { %v1126_v42 = vpop.xlane.xlu1 %1125  ;;  %v2325_v27 = vmul.f32 %v4469_v34, %v1714_v8 }
 0x329   : > { %2355 = vperm.xlu1 %3182, %v2324_v60   ;;  %v1449_v26 = vpack.c.bf16 %v1224_v62, %v1222_v38  ;;  %3432 = vrcp.f32 %v1126_v42  ;;  %v1448_v16 = vpack.c.bf16 %v1223_v21, %v1221_v40  ;;  %v4488_v38 = vld [vmem:[%s5189_s6 + $0xb8] sm:$0xff]  ;;  %v1716_v40 = vld [vmem:[%s5189_s6 + $0x20] sm:$0xff] }
 0x32a   : > { %v4493_v62 = vld [vmem:[%s5190_s7 + $0xb8] sm:$0xff] }
 0x32b   : > { %v1130_v56 = vpop.xlane.xlu0 %1129  ;;  %2949 = vmatprep.mubr.msk.bf16.mxu1 %vm829_vm2, %v1449_v26  ;;  %1963 = vperm.xlu0 %3181, %v1731_v24   ;;  %v3429_v11 = vpop.eup %3428  ;;  %v2346_v21 = vmul.f32 %v4493_v62, %v4488_v38 }
 0x32c   : > { %3434 = vrcp.f32 %v1130_v56  ;;  %v1226_v4 = vmul.f32 %v3429_v11, %v4194_v13  ;;  %v1225_v12 = vmul.f32 %v3429_v11, %v4192_v2  ;;  %v1715_v13 = vld [vmem:[%s5189_s6 + $0x18] sm:$0xff] }
 0x32d   : > { %1868 = vperm.xlu1 %3182, %v4334_v17   ;;  %1581 = vmatmul.mubr.bf16.gmra.mrb[44].mxu1 %v1448_v16  ;;  %v2344_v17 = vmul.f32 %v4460_v6, %v1733_v30 }
 0x32e   : > { %v3431_v29 = vpop.eup %3430 }
 0x32f   : > { %v1228_v43 = vmul.f32 %v3431_v29, %v4203_v52  ;;  %v1227_v24 = vmul.f32 %v3431_v29, %v4197_v54  ;;  %2121 = vperm.xlu0 %3181, %v4349_v53   ;;  %v2326_v53 = vmul.f32 %v1740_v36, %v1715_v13 }
 0x330   : > { %v1134_v35 = vpop.xlane.xlu1 %1133 }
 0x331   : > { %1873 = vperm.xlu1 %3182, %v1713_v18   ;;  %v1451_v28 = vpack.c.bf16 %v1228_v43, %v1226_v4  ;;  %3436 = vrcp.f32 %v1134_v35  ;;  %v1450_v54 = vpack.c.bf16 %v1227_v24, %v1225_v12 }
 0x333   : > { %v1138_v51 = vpop.xlane.xlu0 %1137  ;;  %2950 = vmatprep.mubr.msk.bf16.mxu1 %vm829_vm2, %v1451_v28  ;;  %2455 = vperm.xlu0 %3181, %v2344_v17   ;;  %v3433_v52 = vpop.eup %3432 }
 0x334   : > { %3438 = vrcp.f32 %v1138_v51  ;;  %v1230_v31 = vmul.f32 %v3433_v52, %v4215_v50  ;;  %v1229_v50 = vmul.f32 %v3433_v52, %v4213_v32  ;;  %v4506_v32 = vld [vmem:[%s5190_s7 + $0x20] sm:$0xff] }
 0x335   : > { %2360 = vperm.xlu1 %3182, %v2325_v27   ;;  %1589 = vmatmul.mubr.bf16.gmra.mrb[48].mxu1 %v1450_v54  ;;  %v2327_v29 = vmul.f32 %v4506_v32, %v1716_v40 }
 0x336   : > { %v3435_v18 = vpop.eup %3434 }
 0x337   : > { %v1232_v2 = vmul.f32 %v3435_v18, %v4223_v15  ;;  %v1231_v60 = vmul.f32 %v3435_v18, %v4217_v23  ;;  %1973 = vperm.xlu0 %3181, %v1733_v30  }
 0x338   : > { %v1142_v55 = vpop.xlane.xlu1 %1141 }
 0x339   : > { %2365 = vperm.xlu1 %3182, %v2326_v53   ;;  %v1453_v36 = vpack.c.bf16 %v1232_v2, %v1230_v31  ;;  %3440 = vrcp.f32 %v1142_v55  ;;  %v1452_v23 = vpack.c.bf16 %v1231_v60, %v1229_v50 }
 0x33b   : > { %v1146_v15 = vpop.xlane.xlu0 %1145  ;;  %2951 = vmatprep.mubr.msk.bf16.mxu1 %vm829_vm2, %v1453_v36  ;;  %2131 = vperm.xlu0 %3181, %v4358_v1   ;;  %v3437_v42 = vpop.eup %3436 }
 0x33c   : > { %3442 = vrcp.f32 %v1146_v15  ;;  %v1234_v56 = vmul.f32 %v3437_v42, %v4233_v49 }
 0x33d   : > { %1878 = vperm.xlu1 %3182, %v1714_v8   ;;  %1597 = vmatmul.mubr.bf16.gmra.mrb[52].mxu1 %v1452_v23  ;;  %v1233_v8 = vmul.f32 %v3437_v42, %v4231_v0 }
 0x33e   : > { %v3439_v26 = vpop.eup %3438 }
 0x33f   : > { %v1236_v1 = vmul.f32 %v3439_v26, %v4241_v46  ;;  %v1235_v16 = vmul.f32 %v3439_v26, %v4235_v20  ;;  %2465 = vperm.xlu0 %3181, %v2346_v21   ;;  %v1718_v20 = vld [vmem:[%s5189_s6 + $0x30] sm:$0xff] }
 0x340   : > { %v1150_v11 = vpop.xlane.xlu1 %1149  ;;  %v4520_v46 = vld [vmem:[%s5190_s7 + $0x30] sm:$0xff] }
 0x341   : > { %1883 = vperm.xlu1 %3182, %v1715_v13   ;;  %v1455_v30 = vpack.c.bf16 %v1236_v1, %v1234_v56  ;;  %3444 = vrcp.f32 %v1150_v11  ;;  %v1454_v43 = vpack.c.bf16 %v1235_v16, %v1233_v8  ;;  %v2329_v12 = vmul.f32 %v4520_v46, %v1718_v20 }
 0x343   : > { %v1154_v4 = vpop.xlane.xlu0 %1153  ;;  %2952 = vmatprep.mubr.msk.bf16.mxu1 %vm829_vm2, %v1455_v30  ;;  %v3441_v24 = vpop.eup %3440 }
 0x344   : > { %3446 = vrcp.f32 %v1154_v4  ;;  %v1238_v0 = vmul.f32 %v3441_v24, %v4251_v5  ;;  %v1237_v13 = vmul.f32 %v3441_v24, %v4249_v14 }
 0x345   : > { %2370 = vperm.xlu1 %3182, %v2327_v29   ;;  %1605 = vmatmul.mubr.bf16.gmra.mrb[56].mxu1 %v1454_v43 }
 0x346   : > { %v3443_v49 = vpop.eup %3442 }
 0x347   : > { %v1240_v17 = vmul.f32 %v3443_v49, %v4259_v63  ;;  %v1239_v35 = vmul.f32 %v3443_v49, %v4253_v19  ;;  %v1720_v19 = vld [vmem:[%s5189_s6 + $0x40] sm:$0xff] }
 0x348   : > { %v1158_v28 = vpop.xlane.xlu1 %1157  ;;  %v4534_v63 = vld [vmem:[%s5190_s7 + $0x40] sm:$0xff] }
 0x349   : > { %1888 = vperm.xlu1 %3182, %v1716_v40   ;;  %v1457_v27 = vpack.c.bf16 %v1240_v17, %v1238_v0  ;;  %3448 = vrcp.f32 %v1158_v28  ;;  %v1456_v54 = vpack.c.bf16 %v1239_v35, %v1237_v13  ;;  %v2331_v60 = vmul.f32 %v4534_v63, %v1720_v19  ;;  %v4578_v0 = vld [vmem:[%s5190_s7 + $0x70] sm:$0xff]  ;;  %v4590_v13 = vld [vmem:[%s5190_s7 + $0x80] sm:$0xff] }
 0x34b   : > { %v1162_v51 = vpop.xlane.xlu0 %1161  ;;  %2953 = vmatprep.mubr.msk.bf16.mxu1 %vm829_vm2, %v1457_v27  ;;  %v3445_v52 = vpop.eup %3444  ;;  %v5228_v27 = vld [vmem:[#allocation4_spill] sm:$0xff] }
 0x34c   : > { %3450 = vrcp.f32 %v1162_v51  ;;  %v1242_v14 = vmul.f32 %v3445_v52, %v4269_v47  ;;  %v1241_v55 = vmul.f32 %v3445_v52, %v4267_v37  ;;  %v5229_v51 = vld [vmem:[#allocation6_spill] sm:$0xff] }
 0x34d   : > { %2380 = vperm.xlu1 %3182, %v2329_v12   ;;  %1613 = vmatmul.mubr.bf16.gmra.mrb[60].mxu1 %v1456_v54  ;;  %v1730_v52 = vld [vmem:[%s5189_s6 + $0x90] sm:$0xff] }
 0x34e   : > { %v3447_v5 = vpop.eup %3446 }
 0x34f   : > { %v1244_v53 = vmul.f32 %v3447_v5, %v4277_v22  ;;  %v1243_v18 = vmul.f32 %v3447_v5, %v4271_v25  ;;  %v1722_v25 = vld [vmem:[%s5189_s6 + $0x50] sm:$0xff] }
 0x350   : > { %v1166_v31 = vpop.xlane.xlu1 %1165  ;;  %v4548_v22 = vld [vmem:[%s5190_s7 + $0x50] sm:$0xff] }
 0x351   : > { %1898 = vperm.xlu1 %3182, %v1718_v20   ;;  %3452 = vrcp.f32 %v1166_v31  ;;  %v1459_v2 = vpack.c.bf16 %v1244_v53, %v1242_v14  ;;  %v1458_v50 = vpack.c.bf16 %v1243_v18, %v1241_v55  ;;  %v2333_v40 = vmul.f32 %v4548_v22, %v1722_v25  ;;  %v4600_v5 = vld [vmem:[%s5190_s7 + $0x90] sm:$0xff]  ;;  %v1732_v14 = vld [vmem:[%s5189_s6 + $0xa0] sm:$0xff] }
 0x352   : > { %v1170_v36 = vpop.xlane.xlu0 %1169  ;;  %v4610_v53 = vld [vmem:[%s5190_s7 + $0xa0] sm:$0xff]  ;;  %v4622_v31 = vld [vmem:[%s5190_s7 + $0xb0] sm:$0xff] }
 0x353   : > { %3454 = vrcp.f32 %v1170_v36  ;;  %2954 = vmatprep.mubr.msk.bf16.mxu1 %vm829_vm2, %v1459_v2  ;;  %v3449_v15 = vpop.eup %3448  ;;  %v2343_v18 = vmul.f32 %v4610_v53, %v1732_v14 }
 0x354   : > { %v1246_v37 = vmul.f32 %v3449_v15, %v4287_v44  ;;  %v1245_v56 = vmul.f32 %v3449_v15, %v4285_v9  ;;  %v4564_v9 = vld [vmem:[%s5190_s7 + $0x60] sm:$0xff] }
 0x355   : > { %2390 = vperm.xlu1 %3182, %v2331_v60   ;;  %1621 = vmatmul.mubr.bf16.gmra.mrb[64].mxu1 %v1458_v50 }
 0x356   : > { %v3451_v47 = vpop.eup %3450 }
 0x357   : > { %v1248_v23 = vmul.f32 %v3451_v47, %v4295_v61  ;;  %v1247_v21 = vmul.f32 %v3451_v47, %v4289_v57  ;;  %v1724_v61 = vld [vmem:[%s5189_s6 + $0x60] sm:$0xff] }
 0x358   : > { %v1174_v42 = vpop.xlane.xlu1 %1173  ;;  %v2335_v4 = vmul.f32 %v4564_v9, %v1724_v61 }
 0x359   : > { %1908 = vperm.xlu1 %3182, %v1720_v19   ;;  %3456 = vrcp.f32 %v1174_v42  ;;  %v1461_v26 = vpack.c.bf16 %v1248_v23, %v1246_v37  ;;  %v1460_v11 = vpack.c.bf16 %v1247_v21, %v1245_v56  ;;  %v2341_v19 = vmul.f32 %v4600_v5, %v1730_v52 }
 0x35a   : > { %v1178_v1 = vpop.xlane.xlu0 %1177 }
 0x35b   : > { %v3453_v16 = vpop.eup %3452  ;;  %3458 = vrcp.f32 %v1178_v1  ;;  %2955 = vmatprep.mubr.msk.bf16.mxu1 %vm829_vm2, %v1461_v26 }
 0x35c   : > { %v1250_v44 = vmul.f32 %v3453_v16, %v4305_v41  ;;  %v1249_v43 = vmul.f32 %v3453_v16, %v4303_v39  ;;  %v5227_v39 = vld [vmem:[#allocation5_spill] sm:$0xff] }
 0x35d   : > { %v3455_v30 = vpop.eup %3454  ;;  %2400 = vperm.xlu1 %3182, %v2333_v40   ;;  %1629 = vmatmul.mubr.bf16.gmra.mrb[68].mxu1 %v1460_v11 }
 0x35e   : > { %v1252_v57 = vmul.f32 %v3455_v30, %v4311_v33  ;;  %v1251_v29 = vmul.f32 %v3455_v30, %v4307_v48  ;;  %v1726_v48 = vld [vmem:[%s5189_s6 + $0x70] sm:$0xff] }
 0x35f   : > { %v2337_v28 = vmul.f32 %v4578_v0, %v1726_v48 }
 0x360   : > { %v1463_v8 = vpack.c.bf16 %v1252_v57, %v1250_v44  ;;  %v1462_v33 = vpack.c.bf16 %v1251_v29, %v1249_v43  ;;  %v4660_v29 = vstv %s1660_s11 }
 0x361   : > { %1918 = vperm.xlu1 %3182, %v1722_v25  }
 0x362   : > { %2956 = vmatprep.mubr.msk.bf16.mxu1 %vm829_vm2, %v1463_v8  ;;  %v2351_v42 = vpop.permute.xlu0 %2350 }
 0x363   : > { %v3457_v41 = vpop.eup %3456 }
 0x364   : > { %v1254_v49 = vmul.f32 %v3457_v41, %v4319_v59  ;;  %v1253_v12 = vmul.f32 %v3457_v41, %v5228_v27 }
 0x365   : > { %v3459_v24 = vpop.eup %3458  ;;  %2410 = vperm.xlu1 %3182, %v2335_v4   ;;  %1637 = vmatmul.mubr.bf16.gmra.mrb[72].mxu1 %v1462_v33 }
 0x366   : > { %v1256_v20 = vmul.f32 %v3459_v24, %v4325_v10  ;;  %v1255_v17 = vmul.f32 %v3459_v24, %v5227_v39  ;;  %v1728_v10 = vld [vmem:[%s5189_s6 + $0x80] sm:$0xff]  ;;  %v4640_v40 = vpop.permute.xlu0 %2375 }
 0x367   : > { %v2339_v54 = vmul.f32 %v4590_v13, %v1728_v10  ;;  %v3467_v39 = vld [vmem:[%s3597_s26] sm:$0xff] }
 0x368   : > { %v1465_v35 = vpack.c.bf16 %v1256_v20, %v1254_v49  ;;  %v1464_v59 = vpack.c.bf16 %v1255_v17, %v1253_v12  ;;  %v3466_v20 = vld [vmem:[%s3597_s26 + $0x8] sm:$0xff] }
 0x369   : > { %1928 = vperm.xlu1 %3182, %v1724_v61  }
 0x36a   : > { %2957 = vmatprep.mubr.msk.bf16.mxu1 %vm829_vm2, %v1465_v35 }
 0x36d   : > { %2420 = vperm.xlu1 %3182, %v2337_v28   ;;  %1645 = vmatmul.mubr.bf16.gmra.mrb[76].mxu1 %v1464_v59 }
 0x371   : > { %1938 = vperm.xlu1 %3182, %v1726_v48  }
 0x375   : > { %2096 = vperm.xlu1 %3182, %v5229_v51  }
 0x379   : > { %2430 = vperm.xlu1 %3182, %v2339_v54   ;;  %v3468_v54 = vld [vmem:[%s3597_s26 + $0x10] sm:$0xff] }
 0x37d   : > { %1948 = vperm.xlu1 %3182, %v1728_v10  }
 0x381   : > { %2106 = vperm.xlu1 %3182, %v4469_v34   ;;  %v4617_v34 = vld [vmem:[%s5189_s6 + $0xb0] sm:$0xff] }
 0x382   : > { %v2345_v2 = vmul.f32 %v4622_v31, %v4617_v34 }
 0x385   : > { %2440 = vperm.xlu1 %3182, %v2341_v19  }
 0x389   : > { %1958 = vperm.xlu1 %3182, %v1730_v52  }
 0x38d   : > { %2116 = vperm.xlu1 %3182, %v4506_v32  }
 0x391   : > { %2450 = vperm.xlu1 %3182, %v2343_v18  }
 0x395   : > { %1968 = vperm.xlu1 %3182, %v1732_v14  }
 0x399   : > { %2126 = vperm.xlu1 %3182, %v4520_v46  }
 0x39d   : > { %2460 = vperm.xlu1 %3182, %v2345_v2  }
 0x3a5   : > { %v1183_v32 = vpop.xlane.xlu1 %1182 }
 0x3a6   : > { %3460 = vrcp.f32 %v1183_v32 }
 0x3a9   : > { %v4627_v60 = vpop.permute.xlu1 %2355 }
 0x3ad   : > { %v1869_v55 = vpop.permute.xlu1 %1868 }
 0x3b0   : > { %v3461_v36 = vpop.eup %3460 }
 0x3b1   : > { %v1874_v50 = vpop.permute.xlu1 %1873  ;;  %v1258_v15 = vmul.f32 %v3461_v36, %v4405_v45  ;;  %v1257_v47 = vmul.f32 %v3461_v36, %v4403_v7  ;;  %v4644_v45 = vpop.permute.xlu0 %1893  ;;  %v3469_v36 = vld [vmem:[%s3597_s26 + $0x18] sm:$0xff] }
 0x3b3   : > { %v1467_v25 = vpack.c.bf16 %v1258_v15, %v1258_v15  ;;  %v1466_v37 = vpack.c.bf16 %v1257_v47, %v1257_v47 }
 0x3b5   : > { %2958 = vmatprep.mubr.msk.bf16.mxu1 %vm829_vm2, %v1467_v25  ;;  %v4632_v46 = vpop.permute.xlu1 %2360  ;;  %v4648_v1 = vpop.permute.xlu0 %2385 }
 0x3b6   : > { %1653 = vmatmul.mubr.bf16.gmra.mrb[80].mxu1 %v1466_v37 }
 0x3b9   : > { %v4634_v23 = vpop.permute.xlu1 %2365  ;;  %v4652_v11 = vpop.permute.xlu0 %1903 }
 0x3bd   : > { %v4636_v21 = vpop.permute.xlu1 %1878  ;;  %v4656_v44 = vpop.permute.xlu0 %2395 }
 0x3c1   : > { %v4638_v26 = vpop.permute.xlu1 %1883  ;;  %v4664_v24 = vpop.permute.xlu0 %1913 }
 0x3c5   : > { %v4642_v56 = vpop.permute.xlu1 %2370  ;;  %v4676_v59 = vpop.permute.xlu0 %2405 }
 0x3c9   : > { %v4646_v7 = vpop.permute.xlu1 %1888 }
 0x3cd   : > { %v4650_v16 = vpop.permute.xlu1 %2380 }
 0x3d1   : > { %v4654_v30 = vpop.permute.xlu1 %1898 }
 0x3d5   : > { %v4658_v57 = vpop.permute.xlu1 %2390 }
 0x3d9   : > { %v4666_v49 = vpop.permute.xlu1 %1908 }
 0x3dd   : > { %v4678_v51 = vpop.permute.xlu1 %2400 }
 0x3e8   : > { %v1558_v61 = vpop.f32.mrb[32].mxu1 }
 0x3e9   : > { %v1560_v8 = vpop.f32.mrb[33].mxu1  ;;  %v1662_v43 = vmul.f32 %v4660_v29, %v1558_v61 }
 0x3ea   : > { %v1561_v4 = vpop.f32.mrb[34].mxu1  ;;  %v4694_v8 = vpop.permute.xlu0 %1923 }
 0x3eb   : > { %v1663_v41 = vmul.f32 %v4660_v29, %v1561_v4  ;;  %v1563_v33 = vpop.f32.mrb[35].mxu1  ;;  %v4672_v17 = vadd.f32 %v3467_v39, %v1662_v43 }
 0x3ed   : > { %v4669_v48 = vadd.f32 %v3466_v20, %v1663_v41  ;;  %v1788_v18 = vrot.slane %v4672_v17, 1  ;;  %v4697_v20 = vpop.permute.xlu1 %1918 }
 0x3ef   : > { %v1789_v12 = vrot.slane %v4669_v48, 1  ;;  %v2245_v25 = vrot.slane %v4669_v48, 7 }
 0x3f0   : > { %v1566_v35 = vpop.f32.mrb[36].mxu1 }
 0x3f1   : > { %v1664_v28 = vmul.f32 %v4660_v29, %v1566_v35  ;;  %v1568_v27 = vpop.f32.mrb[37].mxu1  ;;  %v1790_v47 = vsel %vm1787_vm6, %v1788_v18, %v1789_v12 }
 0x3f2   : > { %v1569_v10 = vpop.f32.mrb[38].mxu1  ;;  %v1991_v43 = vmul.f32 %v1869_v55, %v1790_v47 }
 0x3f3   : > { %v4681_v52 = vadd.f32 %v3468_v54, %v1664_v28  ;;  %v1665_v19 = vmul.f32 %v4660_v29, %v1569_v10  ;;  %v1571_v14 = vpop.f32.mrb[39].mxu1 }
 0x3f4   : > { %v3470_v14 = vld [vmem:[%s3597_s26 + $0x20] sm:$0xff] }
 0x3f5   : > { %v1791_v2 = vrot.slane %v4681_v52, 1  ;;  %v2246_v32 = vrot.slane %v4681_v52, 7  ;;  %v4688_v15 = vadd.f32 %v3469_v36, %v1665_v19 }
 0x3f7   : > { %v2248_v37 = vrot.slane %v4688_v15, 7  ;;  %v1792_v61 = vsel %vm1787_vm6, %v1789_v12, %v1791_v2  ;;  %v2247_v33 = vsel %vm2244_vm7, %v2245_v25, %v2246_v32  ;;  %v1793_v39 = vrot.slane %v4688_v15, 1 }
 0x3f8   : > { %v1574_v4 = vpop.f32.mrb[40].mxu1  ;;  %v1992_v41 = vmul.f32 %v1874_v50, %v1792_v61  ;;  %v2473_v12 = vmul.f32 %v2351_v42, %v2247_v33 }
 0x3f9   : > { %v1666_v35 = vmul.f32 %v4660_v29, %v1574_v4  ;;  %v1576_v28 = vpop.f32.mrb[41].mxu1  ;;  %v2249_v27 = vsel %vm2244_vm7, %v2246_v32, %v2248_v37  ;;  %v3471_v32 = vld [vmem:[%s3597_s26 + $0x28] sm:$0xff]  ;;  %v1794_v42 = vsel %vm1787_vm6, %v1791_v2, %v1793_v39  ;;  %v4717_v4 = vpop.permute.xlu1 %2410 }
 0x3fa   : > { %v1577_v10 = vpop.f32.mrb[42].mxu1  ;;  %v3183_v54 = vpack.i.bf16 %v1992_v41, %v1991_v43  ;;  %v2474_v19 = vmul.f32 %v4627_v60, %v2249_v27  ;;  %v4714_v60 = vpop.permute.xlu0 %2415 }
 0x3fb   : > { %v4704_v55 = vadd.f32 %v3470_v14, %v1666_v35  ;;  %v1667_v50 = vmul.f32 %v4660_v29, %v1577_v10  ;;  %v1579_v18 = vpop.f32.mrb[43].mxu1  ;;  %v1993_v35 = vmul.f32 %v4636_v21, %v1794_v42  ;;  %v3472_v14 = vld [vmem:[%s3597_s26 + $0x30] sm:$0xff] }
 0x3fc   : > { %3184 = vrot.lane.b32.xlu0 %v3183_v54, %s3503_s12  ;;  %v3188_v36 = vpack.i.bf16 %v2474_v19, %v2473_v12 }
 0x3fd   : > { %v1795_v47 = vrot.slane %v4704_v55, 1  ;;  %v2250_v25 = vrot.slane %v4704_v55, 7  ;;  %v4711_v61 = vadd.f32 %v3471_v32, %v1667_v50 }
 0x3fe   : > { %3189 = vrot.lane.b32.xlu1 %v3188_v36, %s3503_s12  ;;  %v4735_v18 = vpop.permute.xlu0 %1933 }
 0x3ff   : > { %v2252_v43 = vrot.slane %v4711_v61, 7  ;;  %v1796_v41 = vsel %vm1787_vm6, %v1793_v39, %v1795_v47  ;;  %v2251_v2 = vsel %vm2244_vm7, %v2248_v37, %v2250_v25  ;;  %v1797_v27 = vrot.slane %v4711_v61, 1 }
 0x400   : > { %v1582_v33 = vpop.f32.mrb[44].mxu1  ;;  %1983 = vperm.xlu0 %3181, %v4488_v38   ;;  %v1994_v28 = vmul.f32 %v4638_v26, %v1796_v41  ;;  %v2475_v38 = vmul.f32 %v4632_v46, %v2251_v2  ;;  %v3473_v46 = vld [vmem:[%s3597_s26 + $0x38] sm:$0xff] }
 0x401   : > { %v1668_v10 = vmul.f32 %v4660_v29, %v1582_v33  ;;  %v1584_v54 = vpop.f32.mrb[45].mxu1  ;;  %v2253_v12 = vsel %vm2244_vm7, %v2250_v25, %v2252_v43  ;;  %v4738_v25 = vpop.permute.xlu1 %1928 }
 0x402   : > { %v1585_v19 = vpop.f32.mrb[46].mxu1  ;;  %1978 = vperm.xlu1 %3182, %v4617_v34   ;;  %v3193_v39 = vpack.i.bf16 %v1994_v28, %v1993_v35  ;;  %v2476_v21 = vmul.f32 %v4634_v23, %v2253_v12  ;;  %v1798_v23 = vsel %vm1787_vm6, %v1795_v47, %v1797_v27  ;;  %v5230_v28 = vld [vmem:[#allocation9_spill] sm:$0xff] }
 0x403   : > { %v4732_v26 = vadd.f32 %v3472_v14, %v1668_v10  ;;  %v1669_v37 = vmul.f32 %v4660_v29, %v1585_v19  ;;  %v1587_v50 = vpop.f32.mrb[47].mxu1  ;;  %v1995_v2 = vmul.f32 %v4646_v7, %v1798_v23  ;;  %v3475_v23 = vld [vmem:[%s3597_s26 + $0x48] sm:$0xff] }
 0x404   : > { %3194 = vrot.lane.b32.xlu0 %v3193_v39, %s3503_s12  ;;  %v3198_v36 = vpack.i.bf16 %v2476_v21, %v2475_v38  ;;  %v4756_v38 = vpop.permute.xlu0 %2425 }
 0x405   : > { %v1799_v34 = vrot.slane %v4732_v26, 1  ;;  %v2254_v32 = vrot.slane %v4732_v26, 7  ;;  %v4743_v42 = vadd.f32 %v3473_v46, %v1669_v37  ;;  %v4761_v14 = vpop.permute.xlu1 %2420 }
 0x406   : > { %3199 = vrot.lane.b32.xlu1 %v3198_v36, %s3503_s12 }
 0x407   : > { %v2256_v41 = vrot.slane %v4743_v42, 7  ;;  %v1800_v33 = vsel %vm1787_vm6, %v1797_v27, %v1799_v34  ;;  %v2255_v54 = vsel %vm2244_vm7, %v2252_v43, %v2254_v32  ;;  %v1801_v12 = vrot.slane %v4743_v42, 1  ;;  %v3474_v43 = vld [vmem:[%s3597_s26 + $0x40] sm:$0xff] }
 0x408   : > { %v1590_v35 = vpop.f32.mrb[48].mxu1  ;;  %2141 = vperm.xlu0 %3181, %v5230_v28   ;;  %v1996_v10 = vmul.f32 %v4644_v45, %v1800_v33  ;;  %v2477_v7 = vmul.f32 %v4642_v56, %v2255_v54 }
 0x409   : > { %v1670_v47 = vmul.f32 %v4660_v29, %v1590_v35  ;;  %v1592_v19 = vpop.f32.mrb[49].mxu1  ;;  %v2257_v39 = vsel %vm2244_vm7, %v2254_v32, %v2256_v41  ;;  %v1736_v32 = vld [vmem:[%s5189_s6 + $0xc0] sm:$0xf]  ;;  %v1802_v35 = vsel %vm1787_vm6, %v1799_v34, %v1801_v12  ;;  %v4791_v34 = vpop.permute.xlu1 %1938 }
 0x40a   : > { %v1593_v27 = vpop.f32.mrb[50].mxu1  ;;  %2136 = vperm.xlu1 %3182, %v4534_v63   ;;  %v3203_v21 = vpack.i.bf16 %v1996_v10, %v1995_v2  ;;  %v2478_v45 = vmul.f32 %v4640_v40, %v2257_v39  ;;  %v4773_v63 = vld [vmem:[%s5190_s7 + $0xc0] sm:$0xf]  ;;  %v1997_v39 = vmul.f32 %v4654_v30, %v1802_v35  ;;  %v3476_v30 = vld [vmem:[%s3597_s26 + $0x50] sm:$0xff] }
 0x40b   : > { %v4764_v37 = vadd.f32 %v3474_v43, %v1670_v47  ;;  %v1671_v50 = vmul.f32 %v4660_v29, %v1593_v27  ;;  %v1595_v36 = vpop.f32.mrb[51].mxu1  ;;  %v2347_v28 = vmul.f32 %v4773_v63, %v1736_v32  ;;  %v4787_v47 = vpop.permute.xlu0 %1943 }
 0x40c   : > { %3204 = vrot.lane.b32.xlu0 %v3203_v21, %s3503_s12  ;;  %v3208_v40 = vpack.i.bf16 %v2478_v45, %v2477_v7 }
 0x40d   : > { %v1803_v56 = vrot.slane %v4764_v37, 1  ;;  %v2258_v46 = vrot.slane %v4764_v37, 7  ;;  %v4779_v33 = vadd.f32 %v3475_v23, %v1671_v50 }
 0x40e   : > { %3209 = vrot.lane.b32.xlu1 %v3208_v40, %s3503_s12 }
 0x40f   : > { %v2260_v2 = vrot.slane %v4779_v33, 7  ;;  %v1804_v10 = vsel %vm1787_vm6, %v1801_v12, %v1803_v56  ;;  %v2259_v54 = vsel %vm2244_vm7, %v2256_v41, %v2258_v46  ;;  %v1805_v21 = vrot.slane %v4779_v33, 1 }
 0x410   : > { %v1598_v19 = vpop.f32.mrb[52].mxu1  ;;  %1988 = vperm.xlu0 %3181, %v1736_v32   ;;  %v1998_v27 = vmul.f32 %v4652_v11, %v1804_v10  ;;  %v2479_v50 = vmul.f32 %v4650_v16, %v2259_v54  ;;  %v3477_v10 = vld [vmem:[%s3597_s26 + $0x58] sm:$0xff]  ;;  %v4809_v54 = vpop.permute.xlu0 %2101 }
 0x411   : > { %v1672_v7 = vmul.f32 %v4660_v29, %v1598_v19  ;;  %v1600_v45 = vpop.f32.mrb[53].mxu1  ;;  %v2261_v12 = vsel %vm2244_vm7, %v2258_v46, %v2260_v2  ;;  %v1806_v16 = vsel %vm1787_vm6, %v1803_v56, %v1805_v21 }
 0x412   : > { %v1601_v41 = vpop.f32.mrb[54].mxu1  ;;  %2470 = vperm.xlu1 %3182, %v2347_v28   ;;  %v3213_v43 = vpack.i.bf16 %v1998_v27, %v1997_v39  ;;  %v2480_v36 = vmul.f32 %v4648_v1, %v2261_v12  ;;  %v4812_v1 = vpop.permute.xlu1 %2096  ;;  %v5231_v45 = vld [vmem:[#allocation10_spill] sm:$0xff]  ;;  %v1999_v12 = vmul.f32 %v4666_v49, %v1806_v16 }
 0x413   : > { %v4799_v32 = vadd.f32 %v3476_v30, %v1672_v7  ;;  %v1673_v11 = vmul.f32 %v4660_v29, %v1601_v41  ;;  %v1603_v40 = vpop.f32.mrb[55].mxu1 }
 0x414   : > { %3214 = vrot.lane.b32.xlu0 %v3213_v43, %s3503_s12  ;;  %v3218_v23 = vpack.i.bf16 %v2480_v36, %v2479_v50  ;;  %v3478_v40 = vld [vmem:[%s3597_s26 + $0x60] sm:$0xff] }
 0x415   : > { %v1807_v35 = vrot.slane %v4799_v32, 1  ;;  %v2262_v46 = vrot.slane %v4799_v32, 7  ;;  %v4806_v28 = vadd.f32 %v3477_v10, %v1673_v11  ;;  %v4830_v10 = vpop.permute.xlu0 %2435 }
 0x416   : > { %3219 = vrot.lane.b32.xlu1 %v3218_v23, %s3503_s12  ;;  %v4833_v16 = vpop.permute.xlu1 %2430 }
 0x417   : > { %v2264_v19 = vrot.slane %v4806_v28, 7  ;;  %v1808_v39 = vsel %vm1787_vm6, %v1805_v21, %v1807_v35  ;;  %v2263_v27 = vsel %vm2244_vm7, %v2260_v2, %v2262_v46  ;;  %v1809_v41 = vrot.slane %v4806_v28, 1 }
 0x418   : > { %v1606_v7 = vpop.f32.mrb[56].mxu1  ;;  %2151 = vperm.xlu0 %3181, %v5231_v45   ;;  %v2000_v56 = vmul.f32 %v4664_v24, %v1808_v39  ;;  %v2481_v2 = vmul.f32 %v4658_v57, %v2263_v27  ;;  %v3479_v57 = vld [vmem:[%s3597_s26 + $0x68] sm:$0xff] }
 0x419   : > { %v1674_v43 = vmul.f32 %v4660_v29, %v1606_v7  ;;  %v1608_v50 = vpop.f32.mrb[57].mxu1  ;;  %v2265_v36 = vsel %vm2244_vm7, %v2262_v46, %v2264_v19 }
 0x41a   : > { %v1609_v30 = vpop.f32.mrb[58].mxu1  ;;  %2146 = vperm.xlu1 %3182, %v4548_v22   ;;  %v3223_v21 = vpack.i.bf16 %v2000_v56, %v1999_v12  ;;  %v2482_v11 = vmul.f32 %v4656_v44, %v2265_v36  ;;  %v1810_v44 = vsel %vm1787_vm6, %v1807_v35, %v1809_v41 }
 0x41b   : > { %v4827_v49 = vadd.f32 %v3478_v40, %v1674_v43  ;;  %v1675_v24 = vmul.f32 %v4660_v29, %v1609_v30  ;;  %v1611_v23 = vpop.f32.mrb[59].mxu1  ;;  %v5232_v43 = vld [vmem:[#allocation11_spill] sm:$0xff]  ;;  %v2001_v50 = vmul.f32 %v4697_v20, %v1810_v44 }
 0x41c   : > { %3224 = vrot.lane.b32.xlu0 %v3223_v21, %s3503_s12  ;;  %v3228_v46 = vpack.i.bf16 %v2482_v11, %v2481_v2  ;;  %v4851_v11 = vpop.permute.xlu0 %1953 }
 0x41d   : > { %v1811_v22 = vrot.slane %v4827_v49, 1  ;;  %v2266_v39 = vrot.slane %v4827_v49, 7  ;;  %v4838_v27 = vadd.f32 %v3479_v57, %v1675_v24  ;;  %v4856_v24 = vpop.permute.xlu1 %1948 }
 0x41e   : > { %3229 = vrot.lane.b32.xlu1 %v3228_v46, %s3503_s12 }
 0x41f   : > { %v2268_v7 = vrot.slane %v4838_v27, 7  ;;  %v1812_v45 = vsel %vm1787_vm6, %v1809_v41, %v1811_v22  ;;  %v2267_v12 = vsel %vm2244_vm7, %v2264_v19, %v2266_v39  ;;  %v1813_v30 = vrot.slane %v4838_v27, 1 }
 0x420   : > { %v1614_v56 = vpop.f32.mrb[60].mxu1  ;;  %2161 = vperm.xlu0 %3181, %v5232_v43   ;;  %v2002_v36 = vmul.f32 %v4694_v8, %v1812_v45  ;;  %v2483_v40 = vmul.f32 %v4678_v51, %v2267_v12  ;;  %v3480_v8 = vld [vmem:[%s3597_s26 + $0x70] sm:$0xff]  ;;  %v3481_v45 = vld [vmem:[%s3597_s26 + $0x78] sm:$0xff] }
 0x421   : > { %v1676_v35 = vmul.f32 %v4660_v29, %v1614_v56  ;;  %v1616_v21 = vpop.f32.mrb[61].mxu1  ;;  %v2269_v2 = vsel %vm2244_vm7, %v2266_v39, %v2268_v7 }
 0x422   : > { %v1617_v41 = vpop.f32.mrb[62].mxu1  ;;  %2156 = vperm.xlu1 %3182, %v4564_v9   ;;  %v3233_v19 = vpack.i.bf16 %v2002_v36, %v2001_v50  ;;  %v2484_v20 = vmul.f32 %v4676_v59, %v2269_v2  ;;  %v1814_v59 = vsel %vm1787_vm6, %v1811_v22, %v1813_v30  ;;  %v4873_v50 = vpop.permute.xlu0 %2111 }
 0x423   : > { %v4859_v23 = vadd.f32 %v3480_v8, %v1676_v35  ;;  %v1677_v46 = vmul.f32 %v4660_v29, %v1617_v41  ;;  %v1619_v57 = vpop.f32.mrb[63].mxu1  ;;  %v5233_v35 = vld [vmem:[#allocation7_spill] sm:$0xff]  ;;  %v2003_v21 = vmul.f32 %v4738_v25, %v1814_v59  ;;  %v4878_v41 = vpop.permute.xlu1 %2106 }
 0x424   : > { %3234 = vrot.lane.b32.xlu0 %v3233_v19, %s3503_s12  ;;  %v3238_v39 = vpack.i.bf16 %v2484_v20, %v2483_v40 }
 0x425   : > { %v1815_v44 = vrot.slane %v4859_v23, 1  ;;  %v2270_v9 = vrot.slane %v4859_v23, 7  ;;  %v4866_v56 = vadd.f32 %v3481_v45, %v1677_v46  ;;  %v3482_v46 = vld [vmem:[%s3597_s26 + $0x80] sm:$0xff] }
 0x426   : > { %3239 = vrot.lane.b32.xlu1 %v3238_v39, %s3503_s12 }
 0x427   : > { %v2272_v51 = vrot.slane %v4866_v56, 7  ;;  %v1816_v12 = vsel %vm1787_vm6, %v1813_v30, %v1815_v44  ;;  %v2271_v43 = vsel %vm2244_vm7, %v2268_v7, %v2270_v9  ;;  %v1817_v22 = vrot.slane %v4866_v56, 1 }
 0x428   : > { %v1622_v36 = vpop.f32.mrb[64].mxu1  ;;  %2171 = vperm.xlu0 %3181, %v5233_v35   ;;  %v2004_v2 = vmul.f32 %v4735_v18, %v1816_v12  ;;  %v2485_v8 = vmul.f32 %v4717_v4, %v2271_v43  ;;  %v3483_v12 = vld [vmem:[%s3597_s26 + $0x88] sm:$0xff]  ;;  %v4897_v43 = vpop.permute.xlu0 %2445 }
 0x429   : > { %v1678_v19 = vmul.f32 %v4660_v29, %v1622_v36  ;;  %v1624_v30 = vpop.f32.mrb[65].mxu1  ;;  %v2273_v7 = vsel %vm2244_vm7, %v2270_v9, %v2272_v51  ;;  %v1818_v4 = vsel %vm1787_vm6, %v1815_v44, %v1817_v22 }
 0x42a   : > { %v1625_v40 = vpop.f32.mrb[66].mxu1  ;;  %2166 = vperm.xlu1 %3182, %v4578_v0   ;;  %v3243_v20 = vpack.i.bf16 %v2004_v2, %v2003_v21  ;;  %v2486_v25 = vmul.f32 %v4714_v60, %v2273_v7  ;;  %v4900_v60 = vpop.permute.xlu1 %2440 }
 0x42b   : > { %v4887_v18 = vadd.f32 %v3482_v46, %v1678_v19  ;;  %v1679_v57 = vmul.f32 %v4660_v29, %v1625_v40  ;;  %v1627_v39 = vpop.f32.mrb[67].mxu1  ;;  %v2005_v19 = vmul.f32 %v4791_v34, %v1818_v4 }
 0x42c   : > { %3244 = vrot.lane.b32.xlu0 %v3243_v20, %s3503_s12  ;;  %v3248_v45 = vpack.i.bf16 %v2486_v25, %v2485_v8  ;;  %v3484_v25 = vld [vmem:[%s3597_s26 + $0x90] sm:$0xff] }
 0x42d   : > { %v1819_v59 = vrot.slane %v4887_v18, 1  ;;  %v2274_v9 = vrot.slane %v4887_v18, 7  ;;  %v4894_v0 = vadd.f32 %v3483_v12, %v1679_v57  ;;  %v1964_v57 = vpop.permute.xlu0 %1963  ;;  %v3485_v12 = vld [vmem:[%s3597_s26 + $0x98] sm:$0xff] }
 0x42e   : > { %3249 = vrot.lane.b32.xlu1 %v3248_v45, %s3503_s12  ;;  %v1959_v45 = vpop.permute.xlu1 %1958 }
 0x42f   : > { %v2276_v36 = vrot.slane %v4894_v0, 7  ;;  %v1820_v35 = vsel %vm1787_vm6, %v1817_v22, %v1819_v59  ;;  %v2275_v21 = vsel %vm2244_vm7, %v2272_v51, %v2274_v9  ;;  %v1821_v30 = vrot.slane %v4894_v0, 1 }
 0x430   : > { %v1630_v2 = vpop.f32.mrb[68].mxu1  ;;  %2181 = vperm.xlu0 %3181, %v4416_v3   ;;  %v2006_v44 = vmul.f32 %v4787_v47, %v1820_v35  ;;  %v2487_v51 = vmul.f32 %v4761_v14, %v2275_v21 }
 0x431   : > { %v1680_v7 = vmul.f32 %v4660_v29, %v1630_v2  ;;  %v1632_v40 = vpop.f32.mrb[69].mxu1  ;;  %v2277_v20 = vsel %vm2244_vm7, %v2274_v9, %v2276_v36 }
 0x432   : > { %v1633_v8 = vpop.f32.mrb[70].mxu1  ;;  %2176 = vperm.xlu1 %3182, %v4590_v13   ;;  %v3253_v22 = vpack.i.bf16 %v2006_v44, %v2005_v19  ;;  %v2488_v3 = vmul.f32 %v4756_v38, %v2277_v20  ;;  %v1822_v38 = vsel %vm1787_vm6, %v1819_v59, %v1821_v30 }
 0x433   : > { %v4915_v34 = vadd.f32 %v3484_v25, %v1680_v7  ;;  %v1681_v47 = vmul.f32 %v4660_v29, %v1633_v8  ;;  %v1635_v46 = vpop.f32.mrb[71].mxu1  ;;  %v2007_v19 = vmul.f32 %v4856_v24, %v1822_v38  ;;  %v4935_v8 = vpop.permute.xlu0 %2121 }
 0x434   : > { %3254 = vrot.lane.b32.xlu0 %v3253_v22, %s3503_s12  ;;  %v3258_v39 = vpack.i.bf16 %v2488_v3, %v2487_v51  ;;  %v4940_v22 = vpop.permute.xlu1 %2116 }
 0x435   : > { %v1823_v9 = vrot.slane %v4915_v34, 1  ;;  %v2278_v13 = vrot.slane %v4915_v34, 7  ;;  %v4922_v4 = vadd.f32 %v3485_v12, %v1681_v47 }
 0x436   : > { %3259 = vrot.lane.b32.xlu1 %v3258_v39, %s3503_s12  ;;  %v3487_v39 = vld [vmem:[%s3597_s26 + $0xa8] sm:$0xff] }
 0x437   : > { %v2280_v14 = vrot.slane %v4922_v4, 7  ;;  %v1824_v35 = vsel %vm1787_vm6, %v1821_v30, %v1823_v9  ;;  %v2279_v21 = vsel %vm2244_vm7, %v2276_v36, %v2278_v13  ;;  %v1825_v7 = vrot.slane %v4922_v4, 1 }
 0x438   : > { %v1638_v2 = vpop.f32.mrb[72].mxu1  ;;  %2191 = vperm.xlu0 %3181, %v4438_v58   ;;  %v2008_v44 = vmul.f32 %v4851_v11, %v1824_v35  ;;  %v2489_v58 = vmul.f32 %v4833_v16, %v2279_v21  ;;  %v3486_v11 = vld [vmem:[%s3597_s26 + $0xa0] sm:$0xff]  ;;  %v2456_v35 = vpop.permute.xlu0 %2455 }
 0x439   : > { %v1682_v59 = vmul.f32 %v4660_v29, %v1638_v2  ;;  %v1640_v40 = vpop.f32.mrb[73].mxu1  ;;  %v2281_v20 = vsel %vm2244_vm7, %v2278_v13, %v2280_v14 }
 0x43a   : > { %v1641_v30 = vpop.f32.mrb[74].mxu1  ;;  %2186 = vperm.xlu1 %3182, %v4600_v5   ;;  %v3263_v36 = vpack.i.bf16 %v2008_v44, %v2007_v19  ;;  %v2490_v24 = vmul.f32 %v4830_v10, %v2281_v20  ;;  %v1826_v10 = vsel %vm1787_vm6, %v1823_v9, %v1825_v7  ;;  %v2451_v44 = vpop.permute.xlu1 %2450 }
 0x43b   : > { %v4943_v51 = vadd.f32 %v3486_v11, %v1682_v59  ;;  %v1683_v3 = vmul.f32 %v4660_v29, %v1641_v30  ;;  %v1643_v25 = vpop.f32.mrb[75].mxu1  ;;  %v2009_v2 = vmul.f32 %v1959_v45, %v1826_v10 }
 0x43c   : > { %3264 = vrot.lane.b32.xlu0 %v3263_v36, %s3503_s12  ;;  %v3268_v47 = vpack.i.bf16 %v2490_v24, %v2489_v58  ;;  %v3489_v25 = vld [vmem:[%s3597_s26 + $0xb8] sm:$0xff] }
 0x43d   : > { %v1827_v46 = vrot.slane %v4943_v51, 1  ;;  %v2282_v5 = vrot.slane %v4943_v51, 7  ;;  %v4950_v13 = vadd.f32 %v3487_v39, %v1683_v3 }
 0x43e   : > { %3269 = vrot.lane.b32.xlu1 %v3268_v47, %s3503_s12  ;;  %v1969_v47 = vpop.permute.xlu1 %1968 }
 0x43f   : > { %v2284_v16 = vrot.slane %v4950_v13, 7  ;;  %v1828_v12 = vsel %vm1787_vm6, %v1825_v7, %v1827_v46  ;;  %v2283_v38 = vsel %vm2244_vm7, %v2280_v14, %v2282_v5  ;;  %v1829_v59 = vrot.slane %v4950_v13, 1 }
 0x440   : > { %v1646_v21 = vpop.f32.mrb[76].mxu1  ;;  %2201 = vperm.xlu0 %3181, %v4460_v6   ;;  %v2010_v19 = vmul.f32 %v1964_v57, %v1828_v12  ;;  %v2491_v7 = vmul.f32 %v4900_v60, %v2283_v38  ;;  %v3488_v6 = vld [vmem:[%s3597_s26 + $0xb0] sm:$0xff] }
 0x441   : > { %v1684_v9 = vmul.f32 %v4660_v29, %v1646_v21  ;;  %v1648_v40 = vpop.f32.mrb[77].mxu1  ;;  %v2285_v20 = vsel %vm2244_vm7, %v2282_v5, %v2284_v16  ;;  %v1830_v60 = vsel %vm1787_vm6, %v1827_v46, %v1829_v59 }
 0x442   : > { %v1649_v30 = vpop.f32.mrb[78].mxu1  ;;  %2196 = vperm.xlu1 %3182, %v4610_v53   ;;  %v3273_v14 = vpack.i.bf16 %v2010_v19, %v2009_v2  ;;  %v2492_v36 = vmul.f32 %v4897_v43, %v2285_v20  ;;  %v1974_v43 = vpop.permute.xlu0 %1973  ;;  %v2011_v12 = vmul.f32 %v1969_v47, %v1830_v60  ;;  %v2017_v40 = vrot.slane %v4681_v52, 6 }
 0x443   : > { %v4965_v45 = vadd.f32 %v3488_v6, %v1684_v9  ;;  %v1685_v57 = vmul.f32 %v4660_v29, %v1649_v30  ;;  %v1651_v58 = vpop.f32.mrb[79].mxu1 }
 0x444   : > { %3274 = vrot.lane.b32.xlu0 %v3273_v14, %s3503_s12  ;;  %v3278_v24 = vpack.i.bf16 %v2492_v36, %v2491_v7 }
 0x445   : > { %v1831_v11 = vrot.slane %v4965_v45, 1  ;;  %v2286_v3 = vrot.slane %v4965_v45, 7  ;;  %v4972_v53 = vadd.f32 %v3489_v25, %v1685_v57 }
 0x446   : > { %3279 = vrot.lane.b32.xlu1 %v3278_v24, %s3503_s12 }
 0x447   : > { %v2288_v5 = vrot.slane %v4972_v53, 7  ;;  %v1832_v39 = vsel %vm1787_vm6, %v1829_v59, %v1831_v11  ;;  %v2287_v10 = vsel %vm2244_vm7, %v2284_v16, %v2286_v3  ;;  %v4989_v16 = vpop.permute.xlu0 %2131 }
 0x448   : > { %2211 = vperm.xlu0 %3181, %v4493_v62   ;;  %v2012_v38 = vmul.f32 %v1974_v43, %v1832_v39  ;;  %v2493_v2 = vmul.f32 %v2451_v44, %v2287_v10  ;;  %v4991_v62 = vpop.permute.xlu1 %2126  ;;  %v2016_v44 = vrot.slane %v4669_v48, 6  ;;  %v2023_v10 = vrot.slane %v4711_v61, 6 }
 0x449   : > { %v2289_v46 = vsel %vm2244_vm7, %v2286_v3, %v2288_v5 }
 0x44a   : > { %2206 = vperm.xlu1 %3182, %v4622_v31   ;;  %v3288_v21 = vpack.i.bf16 %v2012_v38, %v2011_v12  ;;  %v2494_v19 = vmul.f32 %v2456_v35, %v2289_v46  ;;  %v2019_v31 = vrot.slane %v4688_v15, 6  ;;  %v2018_v20 = vsel %vm1520_vm5, %v2016_v44, %v2017_v40 }
 0x44b   : > { %v4993_v59 = vpop.permute.xlu0 %2465  ;;  %v2219_v6 = vmul.f32 %v4812_v1, %v2018_v20  ;;  %v2021_v1 = vrot.slane %v4704_v55, 6  ;;  %v2027_v44 = vrot.slane %v4743_v42, 6 }
 0x44c   : > { %3289 = vrot.lane.b32.xlu0 %v3288_v21, %s3503_s12  ;;  %v3283_v9 = vpack.i.bf16 %v2494_v19, %v2493_v2  ;;  %v4998_v35 = vpop.permute.xlu1 %2460  ;;  %v2020_v14 = vsel %vm1520_vm5, %v2017_v40, %v2019_v31 }
 0x44d   : > { %v2220_v24 = vmul.f32 %v4809_v54, %v2020_v14  ;;  %v2022_v38 = vsel %vm1520_vm5, %v2019_v31, %v2021_v1  ;;  %v2024_v21 = vsel %vm1520_vm5, %v2021_v1, %v2023_v10 }
 0x44e   : > { %3284 = vrot.lane.b32.xlu1 %v3283_v9, %s3503_s12  ;;  %v2221_v9 = vmul.f32 %v4878_v41, %v2022_v38  ;;  %v2222_v14 = vmul.f32 %v4873_v50, %v2024_v21 }
 0x452   : > { %2216 = vperm.xlu1 %3182, %v4773_v63  }
 0x46e   : > { %v3185_v30 = vpop.permute.xlu0 %3184 }
 0x46f   : > { %v3187_v63 = vunpack.i.h.bf16 %v3185_v30  ;;  %v3186_v7 = vunpack.i.l.bf16 %v3185_v30 }
 0x470   : > { %v3190_v36 = vpop.permute.xlu1 %3189 }
 0x471   : > { %v3192_v57 = vunpack.i.h.bf16 %v3190_v36  ;;  %v3191_v58 = vunpack.i.l.bf16 %v3190_v36  ;;  %v2699_v3 = vsel %vm440_vm1, %v4669_v48, %v3187_v63  ;;  %v2698_v25 = vsel %vm440_vm1, %v4672_v17, %v3186_v7 }
 0x472   : > { %v2748_v39 = vpack.c.bf16 %v2699_v3, %v2698_v25  ;;  %v2025_v36 = vrot.slane %v4732_v26, 6 }
 0x473   : > { %v2723_v60 = vsel %vm440_vm1, %v2219_v6, %v3191_v58  ;;  %v2724_v43 = vsel %vm440_vm1, %v2220_v24, %v3192_v57  ;;  %v2317_v57 = vrot.slane %v4669_v48, 3 }
 0x474   : > { %v2749_v47 = vpack.c.bf16 %v2724_v43, %v2723_v60  ;;  %v2028_v25 = vsel %vm1520_vm5, %v2025_v36, %v2027_v44  ;;  %v2316_v60 = vrot.slane %v4672_v17, 3 }
 0x476   : > { %2788 = vmatprep.subr.bf16.mxu0 %v2749_v47 }
 0x477   : > { %2789 = vmatpush1.bf16.xpose.msra.mxu0 %v2748_v39  ;;  %v3490_v39 = vld [vmem:[%s3597_s26 + $0xc0] sm:$0xf] }
 0x47f   : > { %v5012_v12 = vpop.permute.xlu0 %1983 }
 0x481   : > { %v1979_v54 = vpop.permute.xlu1 %1978 }
 0x483   : > { %v3195_v46 = vpop.permute.xlu0 %3194 }
 0x484   : > { %v3197_v2 = vunpack.i.h.bf16 %v3195_v46  ;;  %v3196_v19 = vunpack.i.l.bf16 %v3195_v46 }
 0x485   : > { %v3200_v40 = vpop.permute.xlu1 %3199 }
 0x486   : > { %v3202_v20 = vunpack.i.h.bf16 %v3200_v40  ;;  %v3201_v30 = vunpack.i.l.bf16 %v3200_v40  ;;  %v2701_v63 = vsel %vm440_vm1, %v4688_v15, %v3197_v2  ;;  %v2700_v31 = vsel %vm440_vm1, %v4681_v52, %v3196_v19 }
 0x487   : > { %v5023_v7 = vpop.permute.xlu0 %2141  ;;  %v2750_v15 = vpack.c.bf16 %v2701_v63, %v2700_v31  ;;  %v2318_v2 = vsel %vm2315_vm8, %v2316_v60, %v2317_v57  ;;  %v1833_v19 = vrot.slane %v4972_v53, 1  ;;  %v2224_v40 = vmul.f32 %v4935_v8, %v2028_v25 }
 0x488   : > { %v2725_v41 = vsel %vm440_vm1, %v2221_v9, %v3201_v30  ;;  %v2726_v6 = vsel %vm440_vm1, %v2222_v14, %v3202_v20  ;;  %v2029_v30 = vrot.slane %v4764_v37, 6  ;;  %v2031_v31 = vrot.slane %v4779_v33, 6 }
 0x489   : > { %v1654_v58 = vpop.f32.mrb[80].mxu1  ;;  %v5029_v24 = vpop.permute.xlu1 %2136  ;;  %v2751_v50 = vpack.c.bf16 %v2726_v6, %v2725_v41 }
 0x48a   : > { %v1686_v3 = vmul.f32 %v4660_v29, %v1654_v58  ;;  %v1656_v52 = vpop.f32.mrb[81].mxu1  ;;  %v2026_v29 = vsel %vm1520_vm5, %v2023_v10, %v2025_v36 }
 0x48b   : > { %v1657_v43 = vpop.f32.mrb[82].mxu1  ;;  %v3205_v47 = vpop.permute.xlu0 %3204  ;;  %2790 = vmatprep.subr.bf16.mxu0 %v2751_v50  ;;  %v2223_v20 = vmul.f32 %v4940_v22, %v2026_v29  ;;  %v1834_v50 = vsel %vm1787_vm6, %v1831_v11, %v1833_v19  ;;  %v2032_v11 = vsel %vm1520_vm5, %v2029_v30, %v2031_v31 }
 0x48c   : > { %v5037_v1 = vadd.f32 %v3490_v39, %v1686_v3  ;;  %v1658_v38 = vpop.f32.mrb[83].mxu1  ;;  %v3207_v46 = vunpack.i.h.bf16 %v3205_v47  ;;  %v3206_v21 = vunpack.i.l.bf16 %v3205_v47  ;;  %2791 = vmatpush1.bf16.xpose.msra.mxu0 %v2750_v15  ;;  %v2013_v25 = vmul.f32 %v1979_v54, %v1834_v50 }
 0x48d   : > { %v3210_v9 = vpop.permute.xlu1 %3209  ;;  %v2496_v39 = vmul.f32 %v4993_v59, %v2318_v2  ;;  %v2030_v54 = vsel %vm1520_vm5, %v2027_v44, %v2029_v30 }
 0x48e   : > { %v2290_v14 = vrot.slane %v5037_v1, 7  ;;  %v3212_v63 = vunpack.i.h.bf16 %v3210_v9  ;;  %v3211_v41 = vunpack.i.l.bf16 %v3210_v9  ;;  %v1835_v6 = vrot.slane %v5037_v1, 1 }
 0x48f   : > { %v1989_v58 = vpop.permute.xlu0 %1988  ;;  %v2703_v10 = vsel %vm440_vm1, %v4711_v61, %v3207_v46  ;;  %v2702_v8 = vsel %vm440_vm1, %v4704_v55, %v3206_v21  ;;  %v1862_v55 = vrot.slane %v4672_v17, 5  ;;  %v2225_v2 = vmul.f32 %v4991_v62, %v2030_v54 }
 0x490   : > { %v2728_v22 = vsel %vm440_vm1, %v2224_v40, %v3212_v63  ;;  %v2291_v36 = vsel %vm2244_vm7, %v2288_v5, %v2290_v14  ;;  %v2727_v3 = vsel %vm440_vm1, %v2223_v20, %v3211_v41  ;;  %v1836_v52 = vsel %vm1787_vm6, %v1833_v19, %v1835_v6 }
 0x491   : > { %v2471_v15 = vpop.permute.xlu1 %2470  ;;  %v2322_v61 = vsel %vm2315_vm8, %v2291_v36, %v2316_v60  ;;  %v2753_v43 = vpack.c.bf16 %v2728_v22, %v2727_v3  ;;  %v2014_v47 = vmul.f32 %v5012_v12, %v1836_v52  ;;  %v2752_v5 = vpack.c.bf16 %v2703_v10, %v2702_v8 }
 0x492   : > { %v2495_v46 = vmul.f32 %v4998_v35, %v2322_v61  ;;  %v1865_v21 = vsel %vm1864_vm9, %v1835_v6, %v1862_v55  ;;  %v2497_v9 = vmul.f32 %v2471_v15, %v2317_v57  ;;  %v2226_v20 = vmul.f32 %v4989_v16, %v2032_v11  ;;  %v5085_v16 = vld.sshfl [vmem:[%s5188_s5] sm:$0x33 pattern:$0x76325410] }
 0x493   : > { %v3215_v38 = vpop.permute.xlu0 %3214  ;;  %2792 = vmatprep.subr.bf16.mxu0 %v2753_v43  ;;  %v3298_v60 = vpack.i.bf16 %v2014_v47, %v2013_v25  ;;  %v2033_v14 = vrot.slane %v4799_v32, 6  ;;  %v2015_v63 = vmul.f32 %v1989_v58, %v1865_v21  ;;  %v2035_v6 = vrot.slane %v4806_v28, 6 }
 0x494   : > { %v3217_v29 = vunpack.i.h.bf16 %v3215_v38  ;;  %v3216_v19 = vunpack.i.l.bf16 %v3215_v38  ;;  %2793 = vmatpush1.bf16.xpose.msra.mxu0 %v2752_v5  ;;  %v3293_v12 = vpack.i.bf16 %v2496_v39, %v2495_v46  ;;  %v2039_v11 = vrot.slane %v4838_v27, 6 }
 0x495   : > { %v3220_v59 = vpop.permute.xlu1 %3219  ;;  %3299 = vrot.lane.b32.xlu1 %v3298_v60, %s3503_s12  ;;  %v3303_v58 = vpack.i.bf16 %v2015_v63, %v2497_v9  ;;  %v2036_v15 = vsel %vm1520_vm5, %v2033_v14, %v2035_v6  ;;  %v2034_v3 = vsel %vm1520_vm5, %v2031_v31, %v2033_v14  ;;  %v2037_v31 = vrot.slane %v4827_v49, 6 }
 0x496   : > { %v3222_v35 = vunpack.i.h.bf16 %v3220_v59  ;;  %v3221_v40 = vunpack.i.l.bf16 %v3220_v59  ;;  %3294 = vrot.lane.b32.xlu0 %v3293_v12, %s3503_s12  ;;  %v2705_v44 = vsel %vm440_vm1, %v4743_v42, %v3217_v29  ;;  %v2704_v57 = vsel %vm440_vm1, %v4732_v26, %v3216_v19 }
 0x497   : > { %v2152_v41 = vpop.permute.xlu0 %2151  ;;  %v2785_v42 = vcombine.high %v5085_v16, %v5085_v16  ;;  %v2754_v22 = vpack.c.bf16 %v2705_v44, %v2704_v57  ;;  %v2228_v61 = vmul.f32 %v5023_v7, %v2036_v15  ;;  %v2227_v25 = vmul.f32 %v5029_v24, %v2034_v3 }
 0x498   : > { %v2729_v62 = vsel %vm440_vm1, %v2225_v2, %v3221_v40  ;;  %v2730_v30 = vsel %vm440_vm1, %v2226_v20, %v3222_v35  ;;  %v2038_v54 = vsel %vm1520_vm5, %v2035_v6, %v2037_v31  ;;  %v2041_v44 = vrot.slane %v4859_v23, 6 }
 0x499   : > { %v2147_v10 = vpop.permute.xlu1 %2146  ;;  %v2755_v8 = vpack.c.bf16 %v2730_v30, %v2729_v62  ;;  %2820 = vmatprep.mubr.bf16.mxu0 %v2785_v42  ;;  %v2043_v57 = vrot.slane %v4866_v56, 6 }
 0x49a   : > { %3304 = vrot.lane.b32.xlu0 %v3303_v58, %s3503_s12  ;;  %v2229_v12 = vmul.f32 %v2147_v10, %v2038_v54 }
 0x49b   : > { %v3225_v26 = vpop.permute.xlu0 %3224  ;;  %2794 = vmatprep.subr.bf16.mxu0 %v2755_v8  ;;  %v2042_v8 = vsel %vm1520_vm5, %v2039_v11, %v2041_v44 }
 0x49c   : > { %v3227_v36 = vunpack.i.h.bf16 %v3225_v26  ;;  %v3226_v50 = vunpack.i.l.bf16 %v3225_v26  ;;  %2795 = vmatpush1.bf16.xpose.msra.mxu0 %v2754_v22 }
 0x49d   : > { %v3230_v52 = vpop.permute.xlu1 %3229 }
 0x49e   : > { %v3232_v55 = vunpack.i.h.bf16 %v3230_v52  ;;  %v3231_v43 = vunpack.i.l.bf16 %v3230_v52  ;;  %v2707_v39 = vsel %vm440_vm1, %v4779_v33, %v3227_v36  ;;  %v2706_v5 = vsel %vm440_vm1, %v4764_v37, %v3226_v50 }
 0x49f   : > { %v2162_v47 = vpop.permute.xlu0 %2161  ;;  %v2756_v24 = vpack.c.bf16 %v2707_v39, %v2706_v5  ;;  %v2040_v33 = vsel %vm1520_vm5, %v2037_v31, %v2039_v11 }
 0x4a0   : > { %v2731_v38 = vsel %vm440_vm1, %v2227_v25, %v3231_v43  ;;  %v2732_v46 = vsel %vm440_vm1, %v2228_v61, %v3232_v55  ;;  %v2230_v9 = vmul.f32 %v2152_v41, %v2040_v33  ;;  %v2045_v25 = vrot.slane %v4887_v18, 6 }
 0x4a1   : > { %v2157_v7 = vpop.permute.xlu1 %2156  ;;  %v2757_v21 = vpack.c.bf16 %v2732_v46, %v2731_v38  ;;  %v2047_v55 = vrot.slane %v4894_v0, 6 }
 0x4a2   : > { %v2231_v22 = vmul.f32 %v2157_v7, %v2042_v8  ;;  %v2046_v31 = vsel %vm1520_vm5, %v2043_v57, %v2045_v25  ;;  %v2055_v8 = vrot.slane %v4950_v13, 6 }
 0x4a3   : > { %v3235_v29 = vpop.permute.xlu0 %3234  ;;  %2796 = vmatprep.subr.bf16.mxu0 %v2757_v21 }
 0x4a4   : > { %v3237_v19 = vunpack.i.h.bf16 %v3235_v29  ;;  %v3236_v60 = vunpack.i.l.bf16 %v3235_v29  ;;  %2797 = vmatpush1.bf16.xpose.msra.mxu0 %v2756_v24 }
 0x4a5   : > { %v3240_v37 = vpop.permute.xlu1 %3239 }
 0x4a6   : > { %v3242_v59 = vunpack.i.h.bf16 %v3240_v37  ;;  %v3241_v2 = vunpack.i.l.bf16 %v3240_v37  ;;  %v2709_v40 = vsel %vm440_vm1, %v4806_v28, %v3237_v19  ;;  %v2708_v20 = vsel %vm440_vm1, %v4799_v32, %v3236_v60 }
 0x4a7   : > { %v2172_v35 = vpop.permute.xlu0 %2171  ;;  %v2758_v30 = vpack.c.bf16 %v2709_v40, %v2708_v20  ;;  %v2044_v28 = vsel %vm1520_vm5, %v2041_v44, %v2043_v57  ;;  %v2049_v37 = vrot.slane %v4915_v34, 6 }
 0x4a8   : > { %v2733_v14 = vsel %vm440_vm1, %v2229_v12, %v3241_v2  ;;  %v2734_v63 = vsel %vm440_vm1, %v2230_v9, %v3242_v59  ;;  %v2232_v42 = vmul.f32 %v2162_v47, %v2044_v28  ;;  %v2051_v9 = vrot.slane %v4922_v4, 6 }
 0x4a9   : > { %v2167_v62 = vpop.permute.xlu1 %2166  ;;  %v2759_v41 = vpack.c.bf16 %v2734_v63, %v2733_v14  ;;  %v2050_v14 = vsel %vm1520_vm5, %v2047_v55, %v2049_v37  ;;  %v2053_v28 = vrot.slane %v4943_v51, 6 }
 0x4aa   : > { %v2233_v7 = vmul.f32 %v2167_v62, %v2046_v31 }
 0x4ab   : > { %v3245_v6 = vpop.permute.xlu0 %3244  ;;  %2798 = vmatprep.subr.bf16.mxu0 %v2759_v41 }
 0x4ac   : > { %v3247_v58 = vunpack.i.h.bf16 %v3245_v6  ;;  %v3246_v10 = vunpack.i.l.bf16 %v3245_v6  ;;  %2799 = vmatpush1.bf16.xpose.msra.mxu0 %v2758_v30 }
 0x4ad   : > { %v3250_v32 = vpop.permute.xlu1 %3249 }
 0x4ae   : > { %v3252_v26 = vunpack.i.h.bf16 %v3250_v32  ;;  %v3251_v36 = vunpack.i.l.bf16 %v3250_v32  ;;  %v2711_v15 = vsel %vm440_vm1, %v4838_v27, %v3247_v58  ;;  %v2710_v3 = vsel %vm440_vm1, %v4827_v49, %v3246_v10 }
 0x4af   : > { %v2182_v50 = vpop.permute.xlu0 %2181  ;;  %v2760_v39 = vpack.c.bf16 %v2711_v15, %v2710_v3  ;;  %v2048_v27 = vsel %vm1520_vm5, %v2045_v25, %v2047_v55  ;;  %v2054_v15 = vsel %vm1520_vm5, %v2051_v9, %v2053_v28 }
 0x4b0   : > { %v2735_v52 = vsel %vm440_vm1, %v2231_v22, %v3251_v36  ;;  %v2736_v61 = vsel %vm440_vm1, %v2232_v42, %v3252_v26  ;;  %v2234_v11 = vmul.f32 %v2172_v35, %v2048_v27 }
 0x4b1   : > { %v2177_v43 = vpop.permute.xlu1 %2176  ;;  %v2761_v47 = vpack.c.bf16 %v2736_v61, %v2735_v52 }
 0x4b2   : > { %v2235_v44 = vmul.f32 %v2177_v43, %v2050_v14 }
 0x4b3   : > { %v3255_v5 = vpop.permute.xlu0 %3254  ;;  %2800 = vmatprep.subr.bf16.mxu0 %v2761_v47 }
 0x4b4   : > { %v3257_v38 = vunpack.i.h.bf16 %v3255_v5  ;;  %v3256_v46 = vunpack.i.l.bf16 %v3255_v5  ;;  %2801 = vmatpush1.bf16.xpose.msra.mxu0 %v2760_v39 }
 0x4b5   : > { %v3260_v49 = vpop.permute.xlu1 %3259 }
 0x4b6   : > { %v3262_v21 = vunpack.i.h.bf16 %v3260_v49  ;;  %v3261_v24 = vunpack.i.l.bf16 %v3260_v49  ;;  %v2713_v19 = vsel %vm440_vm1, %v4866_v56, %v3257_v38  ;;  %v2712_v60 = vsel %vm440_vm1, %v4859_v23, %v3256_v46 }
 0x4b7   : > { %v2192_v29 = vpop.permute.xlu0 %2191  ;;  %v2762_v2 = vpack.c.bf16 %v2713_v19, %v2712_v60  ;;  %v2052_v56 = vsel %vm1520_vm5, %v2049_v37, %v2051_v9  ;;  %v2057_v38 = vrot.slane %v4965_v45, 6  ;;  %v2059_v46 = vrot.slane %v4972_v53, 6 }
 0x4b8   : > { %v2737_v33 = vsel %vm440_vm1, %v2233_v7, %v3261_v24  ;;  %v2738_v54 = vsel %vm440_vm1, %v2234_v11, %v3262_v21  ;;  %v2236_v63 = vmul.f32 %v2182_v50, %v2052_v56 }
 0x4b9   : > { %v2187_v12 = vpop.permute.xlu1 %2186  ;;  %v2763_v59 = vpack.c.bf16 %v2738_v54, %v2737_v33  ;;  %v2058_v24 = vsel %vm1520_vm5, %v2055_v8, %v2057_v38 }
 0x4ba   : > { %v2237_v52 = vmul.f32 %v2187_v12, %v2054_v15 }
 0x4bb   : > { %v3265_v35 = vpop.permute.xlu0 %3264  ;;  %2802 = vmatprep.subr.bf16.mxu0 %v2763_v59 }
 0x4bc   : > { %v3267_v40 = vunpack.i.h.bf16 %v3265_v35  ;;  %v3266_v20 = vunpack.i.l.bf16 %v3265_v35  ;;  %2803 = vmatpush1.bf16.xpose.msra.mxu0 %v2762_v2  ;;  %v2061_v35 = vrot.slane %v5037_v1, 6 }
 0x4bd   : > { %v3270_v23 = vpop.permute.xlu1 %3269 }
 0x4be   : > { %v3272_v57 = vunpack.i.h.bf16 %v3270_v23  ;;  %v3271_v62 = vunpack.i.l.bf16 %v3270_v23  ;;  %v2715_v30 = vsel %vm440_vm1, %v4894_v0, %v3267_v40  ;;  %v2714_v6 = vsel %vm440_vm1, %v4887_v18, %v3266_v20 }
 0x4bf   : > { %v2202_v41 = vpop.permute.xlu0 %2201  ;;  %v2764_v22 = vpack.c.bf16 %v2715_v30, %v2714_v6  ;;  %v2056_v0 = vsel %vm1520_vm5, %v2053_v28, %v2055_v8  ;;  %v2088_v20 = vrot.slane %v4669_v48, 2  ;;  %v2062_v56 = vsel %vm1520_vm5, %v2059_v46, %v2061_v35 }
 0x4c0   : > { %v2739_v58 = vsel %vm440_vm1, %v2235_v44, %v3271_v62  ;;  %v2740_v10 = vsel %vm440_vm1, %v2236_v63, %v3272_v57  ;;  %v2238_v3 = vmul.f32 %v2192_v29, %v2056_v0  ;;  %v2776_v0 = vstv %s2775_s19 }
 0x4c1   : > { %v2197_v32 = vpop.permute.xlu1 %2196  ;;  %v2765_v42 = vpack.c.bf16 %v2740_v10, %v2739_v58 }
 0x4c2   : > { %v2239_v19 = vmul.f32 %v2197_v32, %v2058_v24 }
 0x4c3   : > { %v3275_v26 = vpop.permute.xlu0 %3274  ;;  %2804 = vmatprep.subr.bf16.mxu0 %v2765_v42 }
 0x4c4   : > { %v3277_v36 = vunpack.i.h.bf16 %v3275_v26  ;;  %v3276_v50 = vunpack.i.l.bf16 %v3275_v26  ;;  %2805 = vmatpush1.bf16.xpose.msra.mxu0 %v2764_v22 }
 0x4c5   : > { %v3280_v18 = vpop.permute.xlu1 %3279 }
 0x4c6   : > { %v3282_v61 = vunpack.i.h.bf16 %v3280_v18  ;;  %v3281_v25 = vunpack.i.l.bf16 %v3280_v18  ;;  %v2717_v43 = vsel %vm440_vm1, %v4922_v4, %v3277_v36  ;;  %v2716_v47 = vsel %vm440_vm1, %v4915_v34, %v3276_v50 }
 0x4c7   : > { %v2212_v55 = vpop.permute.xlu0 %2211  ;;  %v2766_v49 = vpack.c.bf16 %v2717_v43, %v2716_v47  ;;  %v2060_v4 = vsel %vm1520_vm5, %v2057_v38, %v2059_v46 }
 0x4c8   : > { %v2741_v39 = vsel %vm440_vm1, %v2237_v52, %v3281_v25  ;;  %v2742_v5 = vsel %vm440_vm1, %v2238_v3, %v3282_v61  ;;  %v2240_v29 = vmul.f32 %v2202_v41, %v2060_v4 }
 0x4c9   : > { %v2207_v27 = vpop.permute.xlu1 %2206  ;;  %v2767_v31 = vpack.c.bf16 %v2742_v5, %v2741_v39 }
 0x4cb   : > { %v3290_v11 = vpop.permute.xlu0 %3289  ;;  %2806 = vmatprep.subr.bf16.mxu0 %v2767_v31 }
 0x4cc   : > { %v3292_v7 = vunpack.i.h.bf16 %v3290_v11  ;;  %v3291_v21 = vunpack.i.l.bf16 %v3290_v11  ;;  %2807 = vmatpush1.bf16.xpose.msra.mxu0 %v2766_v49 }
 0x4cd   : > { %v3285_v34 = vpop.permute.xlu1 %3284 }
 0x4ce   : > { %v3287_v60 = vunpack.i.h.bf16 %v3285_v34  ;;  %v3286_v33 = vunpack.i.l.bf16 %v3285_v34  ;;  %v2719_v54 = vsel %vm440_vm1, %v4950_v13, %v3292_v7  ;;  %v2718_v37 = vsel %vm440_vm1, %v4943_v51, %v3291_v21 }
 0x4cf   : > { %v2768_v2 = vpack.c.bf16 %v2719_v54, %v2718_v37  ;;  %v2087_v13 = vrot.slane %v4672_v17, 2 }
 0x4d0   : > { %v2743_v9 = vsel %vm440_vm1, %v2239_v19, %v3286_v33  ;;  %v2744_v12 = vsel %vm440_vm1, %v2240_v29, %v3287_v60 }
 0x4d1   : > { %v2769_v59 = vpack.c.bf16 %v2744_v12, %v2743_v9  ;;  %v2217_v40 = vpop.permute.xlu1 %2216  ;;  %v2089_v51 = vsel %vm2086_vm10, %v2087_v13, %v2088_v20  ;;  %v2093_v23 = vsel %vm2086_vm10, %v2062_v56, %v2087_v13 }
 0x4d2   : > { %v2242_v62 = vmul.f32 %v2212_v55, %v2089_v51  ;;  %v2241_v41 = vmul.f32 %v2207_v27, %v2093_v23  ;;  %v2243_v32 = vmul.f32 %v2217_v40, %v2088_v20 }
 0x4d3   : > { %2808 = vmatprep.subr.bf16.mxu0 %v2769_v59 }
 0x4d4   : > { %2809 = vmatpush1.bf16.xpose.msra.mxu0 %v2768_v2 }
 0x507   : > { %v3300_v14 = vpop.permute.xlu1 %3299 }
 0x508   : > { %v3302_v63 = vunpack.i.h.bf16 %v3300_v14  ;;  %v3301_v44 = vunpack.i.l.bf16 %v3300_v14  ;;  %v3295_v57 = vpop.permute.xlu0 %3294 }
 0x509   : > { %v3297_v30 = vunpack.i.h.bf16 %v3295_v57  ;;  %v3296_v6 = vunpack.i.l.bf16 %v3295_v57 }
 0x50a   : > { %v2721_v58 = vsel %vm440_vm1, %v4972_v53, %v3302_v63  ;;  %v2720_v48 = vsel %vm440_vm1, %v4965_v45, %v3301_v44 }
 0x50b   : > { %v2745_v10 = vsel %vm440_vm1, %v2241_v41, %v3296_v6  ;;  %v2746_v17 = vsel %vm440_vm1, %v2242_v62, %v3297_v30  ;;  %v2770_v42 = vpack.c.bf16 %v2721_v58, %v2720_v48 }
 0x50c   : > { %v3305_v28 = vpop.permute.xlu0 %3304  ;;  %v2771_v8 = vpack.c.bf16 %v2746_v17, %v2745_v10 }
 0x50d   : > { %v3306_v22 = vunpack.i.l.bf16 %v3305_v28  ;;  %v3307_v26 = vunpack.i.h.bf16 %v3305_v28 }
 0x50e   : > { %2810 = vmatprep.subr.bf16.mxu0 %v2771_v8 }
 0x50f   : > { %2811 = vmatpush1.bf16.xpose.msra.mxu0 %v2770_v42  ;;  %v2747_v36 = vsel %vm440_vm1, %v2243_v32, %v3306_v22  ;;  %v2722_v53 = vsel %vm440_vm1, %v5037_v1, %v3307_v26 }
 0x510   : > { %v2773_v50 = vpack.c.bf16 %v2747_v36, %v2747_v36  ;;  %v2772_v45 = vpack.c.bf16 %v2722_v53, %v2722_v53 }
 0x512   : > { %2812 = vmatprep.subr.bf16.mxu0 %v2773_v50 }
 0x517   : > { %2813 = vmatpush1.bf16.xpose.msra.mxu0 %v2772_v45 }
 0x51e   : > { %2821 = vmatmul.mubr.bf16.vlgmr.msra.gmra.mrb[124].mxu0 %v5085_v16 }
 0x5f1   : > { %v2822_v15 = vpop.f32.mrb[124].mxu0 }
 0x5f2   : > { %v2823_v18 = vadd.f32 %v2822_v15, %v2776_v0  ;;  %v2824_v3 = vpop.f32.mrb[125].mxu0 }
 0x5f3   : > { %v2825_v52 = vadd.f32 %v2824_v3, %v2776_v0  ;;  %v2826_v61 = vpop.f32.mrb[126].mxu0 }
 0x5f4   : > { %3462 = vtanh.f32 %v2823_v18  ;;  %v2827_v25 = vpop.f32.mrb[127].mxu0 }
 0x5f5   : > { %3464 = vtanh.f32 %v2825_v52 }
 0x5fe   : > { %v3463_v55 = vpop.eup %3462 }
 0x5ff   : > { %v3465_v1 = vpop.eup %3464 }
 0x600   : > { %v2833_v16 = vcombine.low %v3463_v55, %v3465_v1 }
 0x602   : > { %2837 = vst.msk [vmem:[%s361_s22] sm:$0xff] %vm2836_vm12, %v2833_v16 }
 0x603 PF: > { %s22_s17 = sadd.s32 1, %s3497_s17  }
 0x604   : > { %p19_p4 = scmp.ge.s32.totalorder %s22_s17, 4  }
 0x606   :  { %21 = sbr.rel (!%p19_p4) target bundleno = 3 (0x3), region = 90 }

// kernel: _lambda_.2
= control target key start
LH: loop header
LB: loop body
LE: loop exit
PB: predicated region body
PF: predicated region fallthrough
CT: control target
= control target key end

     0   :  { %16 = vsyncpa [#allocation3], 0  ;;  %s4671_s0 = inlined_call_operand.vmem [shape: f32[2,10], index: 0, kind: input, shape index: {}]   ;;  %s4672_s1 = inlined_call_operand.vmem [shape: f32[10,49,128], index: 1, kind: input, shape index: {}]   ;;  %s4673_s2 = inlined_call_operand.vmem [shape: f32[49,128], index: 2, kind: input, shape index: {}]   ;;  %s4674_s3 = inlined_call_operand.vmem [shape: f32[1,128], index: 3, kind: input, shape index: {}]   ;;  %s4675_s4 = inlined_call_operand.vmem [shape: f32[1,128], index: 4, kind: input, shape index: {}]   ;;  %s4676_s5 = inlined_call_operand.vmem [shape: bf16[4,128,256], index: 5, kind: input, shape index: {}]   ;;  %s4677_s6 = inlined_call_operand.vmem [shape: f32[1,256], index: 6, kind: input, shape index: {}]   ;;  %s4678_s7 = inlined_call_operand.vmem [shape: f32[1,256], index: 7, kind: input, shape index: {}]   ;;  %s4679_s8 = inlined_call_operand.vmem [shape: f32[1,256], index: 8, kind: input, shape index: {}]   ;;  %s4680_s9 = inlined_call_operand.vmem [shape: f32[98,1], index: 9, kind: input, shape index: {}]   ;;  %s4681_s10 = inlined_call_operand.vmem [shape: f32[98,1], index: 10, kind: input, shape index: {}]   ;;  %s4682_s11 = inlined_call_operand.vmem [shape: f32[98,256], index: 11, kind: output, shape index: {}]  }
   0x1   :  { %s23_s19 = sshll.u32 %s4671_s0, 4  ;;  %s24_s19 = int_to_ptr.vmem [resolvable:$true] %s23_s19 }
   0x2   :  { %s2596_s20 = scalar_lea.vmem %s24_s19, 32  ;;  %p2601_p1 = scmp.lt.s32.totalorder %s24_s19, %s24_s19 }
   0x3   :  { %p2597_p0 = scmp.ne.s32.totalorder %s24_s19, %s2596_s20  ;;  %p2602_p2 = scmp.lt.s32.totalorder %s2596_s20, %s2596_s20 }
   0x5   :  { %p2603_p3 = por %p2602_p2, %p2601_p1 }
   0x7   :  { %p2604_p4 = pnand %p2603_p3, %p2597_p0 }
   0x9   :  { %2607 = shalt.err (!%p2604_p4)
}
   0xa   :  { %s2610_s21 = smov [#allocation2]  }
   0xb   :  { %26 = dma.vmem_to_smem %s24_s19, 32, %s2610_s21, [#allocation3]  }
   0xc   :  { %2608 = dma.done.wait [#allocation3], 32  }
   0xd   :  { %2609 = vsyncadd [#allocation3], 4294967264 }
   0xe   :  { %50 = sfence }
   0xf   :  { %v2679_v0 = vld [vmem:[%s4681_s10] sm:$0xff]  ;;  %v4683_v2 = vmov 0   ;;  %v2693_v3 = vld [vmem:[%s4681_s10 + $0x8] sm:$0xff]  ;;  %v2707_v5 = vld [vmem:[%s4680_s9 + $0x18] sm:$0xff]  ;;  %s2782_s12 = sld [smem:[#allocation2]]  ;;  %s2790_s17 = sld [smem:[#allocation2 + $0x1]] }
  0x10   :  { %v2684_v1 = vld [vmem:[%s4680_s9] sm:$0xff]  ;;  %2495 = vset.pattern.permute.xlu1 %v4683_v2  ;;  %2494 = vset.pattern.permute.xlu0 %v4683_v2  ;;  %v2698_v4 = vld [vmem:[%s4680_s9 + $0x8] sm:$0xff]  ;;  %v2712_v6 = vld [vmem:[%s4680_s9 + $0x10] sm:$0xff]  ;;  %s2811_s27 = sld [smem:[#allocation2 + $0x2]]  ;;  %s2856_s13 = sld [smem:[#allocation2 + $0x3]]  ;;  %vm465_vm0 = vcmask 1040384  }
  0x11   :  { %825 = vperm.xlu1 %2495, %v2679_v0   ;;  %700 = vperm.xlu0 %2494, %v2684_v1   ;;  %v2717_v7 = vld [vmem:[%s4681_s10 + $0x18] sm:$0xff]  ;;  %v2722_v8 = vld [vmem:[%s4681_s10 + $0x10] sm:$0xff]  ;;  %v2496_v9 = vld [vmem:[%s4676_s5 + $0x84] ss:$8 sps:$4 sm:$0xff]   ;;  %v2860_v44 = vmul.f32 %v2679_v0, %v2684_v1  ;;  %v2864_v45 = vmul.f32 %v2693_v3, %v2698_v4  ;;  %s3002_s21 = sld [smem:[#allocation2 + $0x4]]  ;;  %s3044_s15 = sld [smem:[#allocation2 + $0x5]] }
  0x12   :  { %1154 = vmatprep.mubr.bf16.mxu1 %v4683_v2  ;;  %1533 = vmatprep.mubr.bf16.mxu0 %v4683_v2  ;;  %v2498_v10 = vld [vmem:[%s4676_s5 + $0x80] ss:$8 sps:$4 sm:$0xff]   ;;  %v2499_v11 = vld [vmem:[%s4676_s5 + $0x104] ss:$8 sps:$4 sm:$0xff]   ;;  %v2502_v13 = vld [vmem:[%s4676_s5 + $0x94] ss:$8 sps:$4 sm:$0xff]   ;;  %v2889_v51 = vmul.f32 %v2717_v7, %v2707_v5  ;;  %v2893_v52 = vmul.f32 %v2722_v8, %v2712_v6 }
  0x13   :  { %1122 = vmatprep.subr.bf16.mxu1 %v2496_v9  ;;  %v2501_v12 = vld [vmem:[%s4676_s5 + $0x100] ss:$8 sps:$4 sm:$0xff]   ;;  %1501 = vmatprep.subr.bf16.mxu0 %v2499_v11  ;;  %v2504_v14 = vld [vmem:[%s4676_s5 + $0x90] ss:$8 sps:$4 sm:$0xff]   ;;  %v2505_v16 = vld [vmem:[%s4676_s5 + $0x114] ss:$8 sps:$4 sm:$0xff]  }
  0x14   :  { %1123 = vmatpush1.bf16.msra.mxu1 %v2498_v10  ;;  %v2747_v15 = vld [vmem:[%s4680_s9 + $0x28] sm:$0xff]  ;;  %1502 = vmatpush1.bf16.msra.mxu0 %v2501_v12  ;;  %v2507_v17 = vld [vmem:[%s4676_s5 + $0x110] ss:$8 sps:$4 sm:$0xff]   ;;  %v614_v19 = vld [vmem:[%s4680_s9 + $0x20] sm:$0xff]  ;;  %s3101_s14 = sld [smem:[#allocation2 + $0x6]]  ;;  %s3161_s16 = sld [smem:[#allocation2 + $0x8]] }
  0x15   :  { %830 = vperm.xlu1 %2495, %v2693_v3   ;;  %705 = vperm.xlu0 %2494, %v2698_v4   ;;  %v2508_v18 = vld [vmem:[%s4676_s5 + $0xa4] ss:$8 sps:$4 sm:$0xff]   ;;  %v2510_v20 = vld [vmem:[%s4676_s5 + $0xa0] ss:$8 sps:$4 sm:$0xff]   ;;  %v2514_v24 = vld [vmem:[%s4676_s5 + $0xb4] ss:$8 sps:$4 sm:$0xff]   ;;  %v67_v43 = vstv %s2782_s12 }
  0x16   :  { %1124 = vmatprep.subr.bf16.mxu1 %v2502_v13  ;;  %1503 = vmatprep.subr.bf16.mxu0 %v2505_v16  ;;  %v2511_v21 = vld [vmem:[%s4676_s5 + $0x124] ss:$8 sps:$4 sm:$0xff]   ;;  %v2513_v23 = vld [vmem:[%s4676_s5 + $0x120] ss:$8 sps:$4 sm:$0xff]   ;;  %v2517_v26 = vld [vmem:[%s4676_s5 + $0x134] ss:$8 sps:$4 sm:$0xff]   ;;  %v91_v4 = vstv %s2790_s17 }
  0x17   :  { %v628_v22 = vld [vmem:[%s4681_s10 + $0x28] sm:$0xff]  ;;  %v627_v25 = vld [vmem:[%s4681_s10 + $0x20] sm:$0xff]  ;;  %v2516_v27 = vld [vmem:[%s4676_s5 + $0xb0] ss:$8 sps:$4 sm:$0xff]   ;;  %s3199_s26 = sld [smem:[#allocation2 + $0x9]]  ;;  %s3224_s18 = sld [smem:[#allocation2 + $0x80]] }
  0x18   :  { %1125 = vmatpush1.bf16.msra.mxu1 %v2504_v14  ;;  %1504 = vmatpush1.bf16.msra.mxu0 %v2507_v17  ;;  %v2795_v28 = vld [vmem:[%s4680_s9 + $0x38] sm:$0xff]  ;;  %v2520_v30 = vld [vmem:[%s4676_s5 + $0xc4] ss:$8 sps:$4 sm:$0xff]   ;;  %v2806_v31 = vld [vmem:[%s4680_s9 + $0x30] sm:$0xff]  ;;  %v2896_v53 = vmul.f32 %v628_v22, %v2747_v15  ;;  %v2898_v54 = vmul.f32 %v627_v25, %v614_v19  ;;  %s3296_s19 = sld [smem:[#allocation2 + $0x81]]  ;;  %s3373_s12 = sld [smem:[#allocation2 + $0x86]] }
  0x19   :  { %715 = vperm.xlu1 %2495, %v2707_v5   ;;  %710 = vperm.xlu0 %2494, %v2712_v6   ;;  %v2519_v29 = vld [vmem:[%s4676_s5 + $0x130] ss:$8 sps:$4 sm:$0xff]   ;;  %v2523_v32 = vld [vmem:[%s4676_s5 + $0x144] ss:$8 sps:$4 sm:$0xff]   ;;  %v2522_v33 = vld [vmem:[%s4676_s5 + $0xc0] ss:$8 sps:$4 sm:$0xff]  }
  0x1a   :  { %1126 = vmatprep.subr.bf16.mxu1 %v2508_v18  ;;  %1505 = vmatprep.subr.bf16.mxu0 %v2511_v21  ;;  %v2525_v34 = vld [vmem:[%s4676_s5 + $0x140] ss:$8 sps:$4 sm:$0xff]   ;;  %v2822_v35 = vld [vmem:[%s4681_s10 + $0x38] sm:$0xff]  ;;  %v2827_v36 = vld [vmem:[%s4681_s10 + $0x30] sm:$0xff]  ;;  %s3416_s0 = sld [smem:[#allocation2 + $0x87]]  ;;  %vm498_vm1 = vcmask 1041408  }
  0x1b   :  { %v2526_v37 = vld [vmem:[%s4676_s5 + $0xd4] ss:$8 sps:$4 sm:$0xff]   ;;  %v2528_v39 = vld [vmem:[%s4676_s5 + $0xd0] ss:$8 sps:$4 sm:$0xff]   ;;  %v2843_v40 = vld [vmem:[%s4673_s2] sm:$0xff]  ;;  %vm656_vm2 = vcmask 1046528  }
  0x1c   :  { %1127 = vmatpush1.bf16.msra.mxu1 %v2510_v20  ;;  %1506 = vmatpush1.bf16.msra.mxu0 %v2513_v23  ;;  %v2529_v38 = vld [vmem:[%s4676_s5 + $0x154] ss:$8 sps:$4 sm:$0xff]   ;;  %v2848_v41 = vld [vmem:[%s4673_s2 + $0x8] sm:$0xff]  ;;  %v2531_v46 = vld [vmem:[%s4676_s5 + $0x150] ss:$8 sps:$4 sm:$0xff]   ;;  %vm821_vm3 = vcmask 1042432  }
  0x1d   :  { %840 = vperm.xlu1 %2495, %v2717_v7   ;;  %835 = vperm.xlu0 %2494, %v2722_v8   ;;  %v2853_v42 = vld [vmem:[%s4673_s2 + $0x10] sm:$0xff]  ;;  %v2532_v47 = vld [vmem:[%s4676_s5 + $0xe4] ss:$8 sps:$4 sm:$0xff]   ;;  %v2875_v48 = vld [vmem:[%s4673_s2 + $0x18] sm:$0xff]  ;;  %vm1945_vm4 = vcmask 523264  }
  0x1e   :  { %1128 = vmatprep.subr.bf16.mxu1 %v2514_v24  ;;  %1507 = vmatprep.subr.bf16.mxu0 %v2517_v26  ;;  %v2880_v49 = vld [vmem:[%s4673_s2 + $0x20] sm:$0xff]  ;;  %v2885_v50 = vld [vmem:[%s4673_s2 + $0x28] sm:$0xff]  ;;  %v2903_v55 = vld [vmem:[%s4673_s2 + $0x30] sm:$0x1] }
  0x1f   :  { %4729 = vst [vmem:[#allocation5_spill] sm:$0xff] %v2880_v49  ;;  %4730 = vst [vmem:[#allocation6_spill] sm:$0xff] %v2885_v50  ;;  %v2908_v56 = vld [vmem:[%s4672_s1] sm:$0xff]  ;;  %v2913_v57 = vld [vmem:[%s4672_s1 + $0x8] sm:$0xff] }
  0x20   :  { %1129 = vmatpush1.bf16.msra.mxu1 %v2516_v27  ;;  %1508 = vmatpush1.bf16.msra.mxu0 %v2519_v29  ;;  %4731 = vst [vmem:[#allocation7_spill] sm:$0xff] %v2903_v55  ;;  %v2918_v58 = vld [vmem:[%s4672_s1 + $0x10] sm:$0xff]  ;;  %v2923_v59 = vld [vmem:[%s4680_s9 + $0x48] sm:$0xff]  ;;  %v2928_v60 = vld [vmem:[%s4680_s9 + $0x40] sm:$0xff]  ;;  %v68_v0 = vmul.f32 %v67_v43, %v2908_v56  ;;  %v69_v1 = vmul.f32 %v67_v43, %v2913_v57 }
  0x21   :  { %725 = vperm.xlu1 %2495, %v2747_v15   ;;  %720 = vperm.xlu0 %2494, %v614_v19   ;;  %v2933_v61 = vld [vmem:[%s4672_s1 + $0x18] sm:$0xff]  ;;  %v2938_v62 = vld [vmem:[%s4672_s1 + $0x20] sm:$0xff]  ;;  %v2943_v63 = vld [vmem:[%s4672_s1 + $0x28] sm:$0xff]  ;;  %v70_v3 = vmul.f32 %v67_v43, %v2918_v58 }
  0x22   :  { %1130 = vmatprep.subr.bf16.mxu1 %v2520_v30  ;;  %1509 = vmatprep.subr.bf16.mxu0 %v2523_v32  ;;  %v2954_v5 = vld [vmem:[%s4672_s1 + $0x30] sm:$0x1]  ;;  %v71_v6 = vmul.f32 %v67_v43, %v2933_v61  ;;  %v72_v7 = vmul.f32 %v67_v43, %v2938_v62  ;;  %v73_v8 = vmul.f32 %v67_v43, %v2943_v63  ;;  %v2962_v9 = vld [vmem:[%s4672_s1 + $0x38] sm:$0xff]  ;;  %v2967_v10 = vld [vmem:[%s4672_s1 + $0x40] sm:$0xff]  ;;  %v115_v32 = vstv %s2811_s27 }
  0x23   :  { %4732 = vst [vmem:[#allocation8_spill] sm:$0xff] %v2967_v10  ;;  %v74_v11 = vmul.f32 %v67_v43, %v2954_v5  ;;  %v75_v12 = vadd.f32 %v68_v0, %v2843_v40  ;;  %v76_v13 = vadd.f32 %v69_v1, %v2848_v41  ;;  %v77_v14 = vadd.f32 %v70_v3, %v2853_v42  ;;  %v2976_v15 = vld [vmem:[%s4672_s1 + $0x48] sm:$0xff]  ;;  %v2981_v16 = vld [vmem:[%s4672_s1 + $0x50] sm:$0xff]  ;;  %v2986_v17 = vld [vmem:[%s4672_s1 + $0x58] sm:$0xff] }
  0x24   :  { %1131 = vmatpush1.bf16.msra.mxu1 %v2522_v33  ;;  %1510 = vmatpush1.bf16.msra.mxu0 %v2525_v34  ;;  %4733 = vst [vmem:[#allocation9_spill] sm:$0xff] %v2976_v15  ;;  %4734 = vst [vmem:[#allocation10_spill] sm:$0xff] %v2981_v16  ;;  %v78_v18 = vadd.f32 %v71_v6, %v2875_v48  ;;  %v79_v19 = vadd.f32 %v72_v7, %v2880_v49  ;;  %v2994_v21 = vld [vmem:[%s4672_s1 + $0x60] sm:$0xff]  ;;  %v3007_v24 = vld [vmem:[%s4681_s10 + $0x48] sm:$0xff] }
  0x25   :  { %850 = vperm.xlu1 %2495, %v628_v22   ;;  %845 = vperm.xlu0 %2494, %v627_v25   ;;  %4735 = vst [vmem:[#allocation11_spill] sm:$0xff] %v2986_v17  ;;  %v80_v20 = vadd.f32 %v73_v8, %v2885_v50  ;;  %4736 = vst [vmem:[#allocation12_spill] sm:$0xff] %v2994_v21  ;;  %v2999_v22 = vld [vmem:[%s4672_s1 + $0x68] sm:$0x1]  ;;  %v92_v23 = vmul.f32 %v2962_v9, %v91_v4  ;;  %v3012_v25 = vld [vmem:[%s4681_s10 + $0x40] sm:$0xff] }
  0x26   :  { %1132 = vmatprep.subr.bf16.mxu1 %v2526_v37  ;;  %1511 = vmatprep.subr.bf16.mxu0 %v2529_v38  ;;  %4737 = vst [vmem:[#allocation13_spill] sm:$0xff] %v2999_v22  ;;  %v81_v26 = vadd.f32 %v74_v11, %v2903_v55  ;;  %v93_v27 = vmul.f32 %v2967_v10, %v91_v4  ;;  %v3020_v30 = vld [vmem:[%s4672_s1 + $0x70] sm:$0xff]  ;;  %v3031_v38 = vld [vmem:[%s4672_s1 + $0x78] sm:$0xff]  ;;  %v3041_v43 = vld [vmem:[%s4672_s1 + $0x88] sm:$0xff] }
  0x27   :  { %v94_v29 = vmul.f32 %v2976_v15, %v91_v4  ;;  %4738 = vst [vmem:[#allocation14_spill] sm:$0xff] %v3020_v30  ;;  %v95_v33 = vmul.f32 %v2981_v16, %v91_v4  ;;  %v96_v34 = vmul.f32 %v2986_v17, %v91_v4  ;;  %v97_v37 = vmul.f32 %v2994_v21, %v91_v4  ;;  %v3050_v6 = vld [vmem:[%s4672_s1 + $0x90] sm:$0xff]  ;;  %v3055_v7 = vld [vmem:[%s4672_s1 + $0x98] sm:$0xff]  ;;  %v3060_v8 = vld [vmem:[%s4672_s1 + $0xa0] sm:$0x1] }
  0x28   :  { %1133 = vmatpush1.bf16.msra.mxu1 %v2528_v39  ;;  %1512 = vmatpush1.bf16.msra.mxu0 %v2531_v46  ;;  %4739 = vst [vmem:[#allocation15_spill] sm:$0xff] %v3031_v38  ;;  %v3036_v39 = vld [vmem:[%s4672_s1 + $0x80] sm:$0xff]  ;;  %4741 = vst [vmem:[#allocation17_spill] sm:$0xff] %v3041_v43  ;;  %v139_v46 = vstv %s2856_s13  ;;  %v99_v0 = vadd.f32 %v92_v23, %v75_v12  ;;  %v100_v1 = vadd.f32 %v93_v27, %v76_v13  ;;  %s3120_s13 = sld [smem:[#allocation2 + $0x7]] }
  0x29   :  { %735 = vperm.xlu1 %2495, %v2795_v28   ;;  %730 = vperm.xlu0 %2494, %v2806_v31   ;;  %4740 = vst [vmem:[#allocation16_spill] sm:$0xff] %v3036_v39  ;;  %v101_v3 = vadd.f32 %v94_v29, %v77_v14  ;;  %4742 = vst [vmem:[#allocation18_spill] sm:$0xff] %v3050_v6  ;;  %v102_v11 = vadd.f32 %v95_v33, %v78_v18  ;;  %v3066_v14 = vld [vmem:[%s4680_s9 + $0x58] sm:$0xff]  ;;  %v3074_v18 = vld [vmem:[%s4672_s1 + $0xa8] sm:$0xff]  ;;  %v163_v17 = vstv %s3002_s21  ;;  %s3332_s21 = sld [smem:[#allocation2 + $0x83]] }
  0x2a   :  { %1134 = vmatprep.subr.bf16.mxu1 %v2532_v47  ;;  %v98_v47 = vmul.f32 %v2999_v22, %v91_v4  ;;  %4743 = vst [vmem:[#allocation19_spill] sm:$0xff] %v3055_v7  ;;  %4744 = vst [vmem:[#allocation20_spill] sm:$0xff] %v3060_v8  ;;  %v103_v4 = vadd.f32 %v96_v34, %v79_v19  ;;  %v104_v12 = vadd.f32 %v97_v37, %v80_v20  ;;  %v3079_v19 = vld [vmem:[%s4672_s1 + $0xb0] sm:$0xff]  ;;  %v3089_v34 = vld [vmem:[%s4672_s1 + $0xb8] sm:$0xff] }
  0x2b   :  { %v116_v13 = vmul.f32 %v3020_v30, %v115_v32  ;;  %v117_v27 = vmul.f32 %v3031_v38, %v115_v32  ;;  %v118_v29 = vmul.f32 %v3036_v39, %v115_v32  ;;  %v119_v2 = vmul.f32 %v3041_v43, %v115_v32  ;;  %4745 = vst [vmem:[#allocation21_spill] sm:$0xff] %v3074_v18  ;;  %v3094_v37 = vld [vmem:[%s4672_s1 + $0xc0] sm:$0xff]  ;;  %v3111_v39 = vld [vmem:[%s4672_s1 + $0xd0] sm:$0xff]  ;;  %v3116_v38 = vld [vmem:[%s4672_s1 + $0xd8] sm:$0x1] }
  0x2c   :  { %v105_v23 = vadd.f32 %v98_v47, %v81_v26  ;;  %4746 = vst [vmem:[#allocation22_spill] sm:$0xff] %v3079_v19  ;;  %v120_v20 = vmul.f32 %v3050_v6, %v115_v32  ;;  %v121_v26 = vmul.f32 %v3055_v7, %v115_v32  ;;  %v122_v33 = vmul.f32 %v3060_v8, %v115_v32  ;;  %v3099_v47 = vld [vmem:[%s4672_s1 + $0xc8] sm:$0xff]  ;;  %v3106_v32 = vld [vmem:[%s4680_s9 + $0x50] sm:$0xff] }
  0x2d   :  { %860 = vperm.xlu1 %2495, %v2822_v35   ;;  %855 = vperm.xlu0 %2494, %v2827_v36   ;;  %4747 = vst [vmem:[#allocation23_spill] sm:$0xff] %v3089_v34  ;;  %4748 = vst [vmem:[#allocation24_spill] sm:$0xff] %v3094_v37  ;;  %v123_v8 = vadd.f32 %v116_v13, %v99_v0  ;;  %v124_v7 = vadd.f32 %v117_v27, %v100_v1 }
  0x2e   :  { %4749 = vst [vmem:[#allocation25_spill] sm:$0xff] %v3099_v47  ;;  %v125_v6 = vadd.f32 %v118_v29, %v101_v3  ;;  %v126_v43 = vadd.f32 %v119_v2, %v102_v11  ;;  %4750 = vst [vmem:[#allocation26_spill] sm:$0xff] %v3111_v39  ;;  %v127_v30 = vadd.f32 %v120_v20, %v103_v4  ;;  %v3129_v11 = vld [vmem:[%s4672_s1 + $0xe0] sm:$0xff]  ;;  %v3134_v4 = vld [vmem:[%s4672_s1 + $0xe8] sm:$0xff] }
  0x2f   :  { %4751 = vst [vmem:[#allocation27_spill] sm:$0xff] %v3116_v38  ;;  %v128_v22 = vadd.f32 %v121_v26, %v104_v12  ;;  %v140_v21 = vmul.f32 %v3074_v18, %v139_v46  ;;  %v141_v2 = vmul.f32 %v3079_v19, %v139_v46  ;;  %v142_v0 = vmul.f32 %v3089_v34, %v139_v46  ;;  %v3139_v12 = vld [vmem:[%s4672_s1 + $0xf0] sm:$0xff]  ;;  %v3148_v20 = vld [vmem:[%s4672_s1 + $0xf8] sm:$0xff]  ;;  %v3153_v26 = vld [vmem:[%s4672_s1 + $0x100] sm:$0xff] }
  0x30   :  { %v143_v1 = vmul.f32 %v3094_v37, %v139_v46  ;;  %v144_v3 = vmul.f32 %v3099_v47, %v139_v46  ;;  %4752 = vst [vmem:[#allocation28_spill] sm:$0xff] %v3129_v11  ;;  %4753 = vst [vmem:[#allocation29_spill] sm:$0xff] %v3134_v4  ;;  %v129_v13 = vadd.f32 %v122_v33, %v105_v23  ;;  %v3158_v47 = vld [vmem:[%s4672_s1 + $0x108] sm:$0xff]  ;;  %v187_v23 = vstv %s3044_s15  ;;  %v3171_v33 = vld [vmem:[%s4681_s10 + $0x50] sm:$0xff]  ;;  %s3303_s15 = sld [smem:[#allocation2 + $0x82]] }
  0x31   :  { %745 = vperm.xlu1 %2495, %v2923_v59   ;;  %740 = vperm.xlu0 %2494, %v2928_v60   ;;  %4754 = vst [vmem:[#allocation30_spill] sm:$0xff] %v3139_v12  ;;  %v145_v27 = vmul.f32 %v3111_v39, %v139_v46  ;;  %v146_v29 = vmul.f32 %v3116_v38, %v139_v46  ;;  %4755 = vst [vmem:[#allocation31_spill] sm:$0xff] %v3148_v20  ;;  %v3166_v46 = vld [vmem:[%s4681_s10 + $0x58] sm:$0xff]  ;;  %v3176_v19 = vld [vmem:[%s4672_s1 + $0x110] sm:$0x1] }
  0x32   :  { %4756 = vst [vmem:[#allocation32_spill] sm:$0xff] %v3153_v26  ;;  %4757 = vst [vmem:[#allocation33_spill] sm:$0xff] %v3158_v47  ;;  %v147_v38 = vadd.f32 %v140_v21, %v123_v8  ;;  %v148_v39 = vadd.f32 %v141_v2, %v124_v7  ;;  %v149_v37 = vadd.f32 %v142_v0, %v125_v6  ;;  %v3187_v6 = vld [vmem:[%s4672_s1 + $0x118] sm:$0xff]  ;;  %v3210_v8 = vld [vmem:[%s4681_s10 + $0x60] sm:$0x3] }
  0x33   :  { %v150_v34 = vadd.f32 %v143_v1, %v126_v43  ;;  %4758 = vst [vmem:[#allocation34_spill] sm:$0xff] %v3176_v19  ;;  %v151_v18 = vadd.f32 %v144_v3, %v127_v30  ;;  %v152_v16 = vadd.f32 %v145_v27, %v128_v22  ;;  %v164_v15 = vmul.f32 %v3129_v11, %v163_v17  ;;  %v3192_v22 = vld [vmem:[%s4672_s1 + $0x120] sm:$0xff]  ;;  %v3197_v30 = vld [vmem:[%s4672_s1 + $0x128] sm:$0xff]  ;;  %v3216_v1 = vld [vmem:[%s4672_s1 + $0x130] sm:$0xff] }
  0x34   :  { %v165_v10 = vmul.f32 %v3134_v4, %v163_v17  ;;  %v166_v55 = vmul.f32 %v3139_v12, %v163_v17  ;;  %v167_v50 = vmul.f32 %v3148_v20, %v163_v17  ;;  %v168_v21 = vmul.f32 %v3153_v26, %v163_v17  ;;  %4759 = vst [vmem:[#allocation35_spill] sm:$0xff] %v3187_v6  ;;  %v3229_v3 = vld [vmem:[%s4680_s9 + $0x60] sm:$0x3] }
  0x35   :  { %870 = vperm.xlu1 %2495, %v3007_v24   ;;  %865 = vperm.xlu0 %2494, %v3012_v25   ;;  %v169_v43 = vmul.f32 %v3158_v47, %v163_v17  ;;  %4760 = vst [vmem:[#allocation36_spill] sm:$0xff] %v3192_v22  ;;  %4761 = vst [vmem:[#allocation37_spill] sm:$0xff] %v3197_v30  ;;  %v3203_v7 = vmul.f32 %v2822_v35, %v2795_v28  ;;  %v3221_v28 = vld [vmem:[%s4672_s1 + $0x138] sm:$0xff]  ;;  %v211_v35 = vstv %s3101_s14  ;;  %v3239_v47 = vld [vmem:[%s4672_s1 + $0x148] sm:$0x1] }
  0x36   :  { %v153_v2 = vadd.f32 %v146_v29, %v129_v13  ;;  %v170_v0 = vmul.f32 %v3176_v19, %v163_v17  ;;  %4762 = vst [vmem:[#allocation38_spill] sm:$0xff] %v3216_v1  ;;  %4763 = vst [vmem:[#allocation39_spill] sm:$0xff] %v3221_v28  ;;  %v171_v17 = vadd.f32 %v164_v15, %v147_v38  ;;  %v3234_v19 = vld [vmem:[%s4672_s1 + $0x140] sm:$0xff] }
  0x37   :  { %v172_v13 = vadd.f32 %v165_v10, %v148_v39  ;;  %v173_v27 = vadd.f32 %v166_v55, %v149_v37  ;;  %v174_v29 = vadd.f32 %v167_v50, %v150_v34  ;;  %4764 = vst [vmem:[#allocation40_spill] sm:$0xff] %v3234_v19  ;;  %4765 = vst [vmem:[#allocation41_spill] sm:$0xff] %v3239_v47  ;;  %v3247_v50 = vld [vmem:[%s4672_s1 + $0x150] sm:$0xff]  ;;  %v3252_v55 = vld [vmem:[%s4672_s1 + $0x158] sm:$0xff]  ;;  %v3255_v10 = vstv %s3120_s13 }
  0x38   :  { %v188_v26 = vmul.f32 %v3187_v6, %v187_v23  ;;  %v189_v20 = vmul.f32 %v3192_v22, %v187_v23  ;;  %v190_v12 = vmul.f32 %v3197_v30, %v187_v23  ;;  %4766 = vst [vmem:[#allocation42_spill] sm:$0xff] %v3252_v55  ;;  %v175_v15 = vadd.f32 %v168_v21, %v151_v18  ;;  %v3262_v37 = vld [vmem:[%s4672_s1 + $0x160] sm:$0xff]  ;;  %v3267_v30 = vld [vmem:[%s4672_s1 + $0x168] sm:$0xff]  ;;  %v3272_v22 = vld [vmem:[%s4672_s1 + $0x170] sm:$0xff] }
  0x39   :  { %755 = vperm.xlu1 %2495, %v3066_v14   ;;  %750 = vperm.xlu0 %2494, %v3106_v32   ;;  %v176_v38 = vadd.f32 %v169_v43, %v152_v16  ;;  %v191_v39 = vmul.f32 %v3216_v1, %v187_v23  ;;  %v192_v34 = vmul.f32 %v3221_v28, %v187_v23  ;;  %v3281_v43 = vld [vmem:[%s4672_s1 + $0x178] sm:$0xff]  ;;  %v3286_v28 = vld [vmem:[%s4672_s1 + $0x180] sm:$0x1]  ;;  %v3291_v1 = vld [vmem:[%s4672_s1 + $0x188] sm:$0xff] }
  0x3a   :  { %4767 = vst [vmem:[#allocation43_spill] sm:$0xff] %v3262_v37  ;;  %4768 = vst [vmem:[#allocation44_spill] sm:$0xff] %v3267_v30  ;;  %v177_v16 = vadd.f32 %v170_v0, %v153_v2  ;;  %v193_v18 = vmul.f32 %v3234_v19, %v187_v23  ;;  %v194_v21 = vmul.f32 %v3239_v47, %v187_v23  ;;  %v3294_v2 = vstv %s3161_s16  ;;  %v3301_v6 = vld [vmem:[%s4672_s1 + $0x190] sm:$0xff] }
  0x3b   :  { %4769 = vst [vmem:[#allocation45_spill] sm:$0xff] %v3286_v28  ;;  %v195_v23 = vadd.f32 %v188_v26, %v171_v17  ;;  %v196_v0 = vadd.f32 %v189_v20, %v172_v13  ;;  %v197_v47 = vadd.f32 %v190_v12, %v173_v27  ;;  %v198_v19 = vadd.f32 %v191_v39, %v174_v29  ;;  %v3312_v12 = vld [vmem:[%s4672_s1 + $0x198] sm:$0xff]  ;;  %v3317_v20 = vld [vmem:[%s4672_s1 + $0x1a0] sm:$0xff]  ;;  %v3322_v17 = vld [vmem:[%s4672_s1 + $0x1a8] sm:$0xff] }
  0x3c   :  { %v212_v4 = vmul.f32 %v3247_v50, %v211_v35  ;;  %v213_v11 = vmul.f32 %v3252_v55, %v211_v35  ;;  %v214_v49 = vmul.f32 %v3262_v37, %v211_v35  ;;  %v215_v26 = vmul.f32 %v3267_v30, %v211_v35  ;;  %4770 = vst [vmem:[#allocation46_spill] sm:$0xff] %v3317_v20 }
  0x3d   :  { %880 = vperm.xlu1 %2495, %v3166_v46   ;;  %875 = vperm.xlu0 %2494, %v3171_v33   ;;  %4771 = vst [vmem:[#allocation47_spill] sm:$0xff] %v3322_v17  ;;  %v3326_v13 = vmul.f32 %v2827_v36, %v2806_v31  ;;  %v199_v27 = vadd.f32 %v192_v34, %v175_v15  ;;  %v3330_v39 = vstv %s3199_s26  ;;  %v3343_v31 = vld [vmem:[%s4672_s1 + $0x1b0] sm:$0xff]  ;;  %v3346_v36 = vstv %s3224_s18  ;;  %s3348_s26 = sld [smem:[#allocation2 + $0x84]]  ;;  %s3364_s18 = sld [smem:[#allocation2 + $0x85]] }
  0x3e   :  { %v216_v29 = vmul.f32 %v3272_v22, %v211_v35  ;;  %v3336_v30 = vmul.f32 %v3007_v24, %v2923_v59  ;;  %v200_v37 = vadd.f32 %v193_v18, %v176_v38  ;;  %v201_v55 = vadd.f32 %v194_v21, %v177_v16  ;;  %4772 = vst [vmem:[#allocation48_spill] sm:$0xff] %v3343_v31  ;;  %v3362_v38 = vld [vmem:[%s4672_s1 + $0x1c0] sm:$0xff] }
  0x3f   :  { %v217_v15 = vmul.f32 %v3281_v43, %v211_v35  ;;  %v218_v59 = vmul.f32 %v3286_v28, %v211_v35  ;;  %v219_v24 = vadd.f32 %v212_v4, %v195_v23  ;;  %v220_v34 = vadd.f32 %v213_v11, %v196_v0  ;;  %v3371_v35 = vld [vmem:[%s4672_s1 + $0x1c8] sm:$0xff]  ;;  %v3394_v0 = vld [vmem:[%s4672_s1 + $0x1e0] sm:$0xff] }
  0x40   :  { %v221_v16 = vadd.f32 %v214_v49, %v197_v47  ;;  %v222_v18 = vadd.f32 %v215_v26, %v198_v19  ;;  %v237_v4 = vmul.f32 %v3301_v6, %v3255_v10  ;;  %v223_v21 = vadd.f32 %v216_v29, %v199_v27  ;;  %v3384_v19 = vld [vmem:[%s4672_s1 + $0x1d0] sm:$0xff]  ;;  %v3389_v47 = vld [vmem:[%s4672_s1 + $0x1d8] sm:$0xff] }
  0x41   :  { %885 = vperm.xlu1 %2495, %v3210_v8   ;;  %760 = vperm.xlu0 %2494, %v3229_v3   ;;  %v238_v23 = vmul.f32 %v3312_v12, %v3255_v10  ;;  %v239_v11 = vmul.f32 %v3317_v20, %v3255_v10  ;;  %v240_v49 = vmul.f32 %v3322_v17, %v3255_v10  ;;  %v3411_v17 = vld [vmem:[%s4672_s1 + $0x1e8] sm:$0xff]  ;;  %v3414_v20 = vstv %s3296_s19 }
  0x42   :  { %v919_v26 = vmul.f32 %v3012_v25, %v2928_v60  ;;  %v3400_v27 = vmul.f32 %v3166_v46, %v3066_v14  ;;  %v3404_v29 = vmul.f32 %v3171_v33, %v3106_v32  ;;  %v224_v60 = vadd.f32 %v217_v15, %v200_v37 }
  0x43   :  { %v225_v25 = vadd.f32 %v218_v59, %v201_v55  ;;  %v241_v14 = vmul.f32 %v3343_v31, %v3255_v10  ;;  %v244_v33 = vadd.f32 %v237_v4, %v220_v34  ;;  %v260_v37 = vmul.f32 %v3362_v38, %v3294_v2  ;;  %v3435_v55 = vld [vmem:[%s4672_s1 + $0x1f8] sm:$0xff] }
  0x44   :  { %v245_v15 = vadd.f32 %v238_v23, %v221_v16  ;;  %v246_v59 = vadd.f32 %v239_v11, %v222_v18  ;;  %v247_v31 = vadd.f32 %v240_v49, %v223_v21  ;;  %v261_v28 = vmul.f32 %v3371_v35, %v3294_v2 }
  0x45   :  { %931 = vperm.xlu1 %2495, %v2864_v45   ;;  %926 = vperm.xlu0 %2494, %v2860_v44   ;;  %v3355_v44 = vld [vmem:[%s4672_s1 + $0x1b8] sm:$0x1]  ;;  %v236_v45 = vmul.f32 %v3291_v1, %v3255_v10  ;;  %v3448_v34 = vstv %s3332_s21  ;;  %v3454_v16 = vmul.f32 %v3210_v8, %v3229_v3  ;;  %v3459_v18 = vstv %s3348_s26  ;;  %s3494_s21 = sld [smem:[#allocation2 + $0x89]] }
  0x46   :  { %v242_v32 = vmul.f32 %v3355_v44, %v3255_v10  ;;  %v262_v10 = vmul.f32 %v3384_v19, %v3294_v2  ;;  %v3468_v23 = vstv %s3364_s18  ;;  %v3471_v11 = vstv %s3373_s12 }
  0x47   :  { %v243_v46 = vadd.f32 %v236_v45, %v219_v24  ;;  %v263_v24 = vmul.f32 %v3389_v47, %v3294_v2  ;;  %v264_v45 = vmul.f32 %v3394_v0, %v3294_v2  ;;  %v3475_v8 = vadd.f32 %v261_v28, %v244_v33 }
  0x48   :  { %v3461_v4 = vadd.f32 %v242_v32, %v225_v25  ;;  %v3479_v3 = vmul.f32 %v3435_v55, %v3330_v39  ;;  %v3492_v32 = vstv %s3416_s0  ;;  %v306_v33 = vmul.f32 %v3346_v36, %v2954_v5 }
  0x49   :  { %941 = vperm.xlu1 %2495, %v2889_v51   ;;  %936 = vperm.xlu0 %2494, %v2893_v52   ;;  %v3423_v51 = vld [vmem:[%s4672_s1 + $0x1f0] sm:$0x1]  ;;  %v3426_v52 = vstv %s3303_s15  ;;  %s3450_s15 = sld [smem:[#allocation2 + $0x88]]  ;;  %v3473_v49 = vadd.f32 %v260_v37, %v243_v46  ;;  %v3487_v25 = vadd.f32 %v263_v24, %v246_v59  ;;  %v301_v46 = vmul.f32 %v3346_v36, %v2913_v57 }
  0x4a   :  { %v3465_v21 = vmul.f32 %v3423_v51, %v3294_v2  ;;  %v4775_v24 = vld [vmem:[#allocation7_spill] sm:$0xff] }
  0x4b   :  { %v308_v57 = vadd.f32 %v301_v46, %v2848_v41  ;;  %v313_v5 = vadd.f32 %v306_v33, %v4775_v24 }
  0x4d   :  { %951 = vperm.xlu1 %2495, %v2896_v53   ;;  %946 = vperm.xlu0 %2494, %v2898_v54   ;;  %v248_v53 = vadd.f32 %v241_v14, %v224_v60  ;;  %v265_v54 = vmul.f32 %v3411_v17, %v3294_v2  ;;  %v300_v60 = vmul.f32 %v3346_v36, %v2908_v56 }
  0x4e   :  { %v3485_v2 = vadd.f32 %v262_v10, %v245_v15  ;;  %v3489_v14 = vadd.f32 %v264_v45, %v247_v31  ;;  %v302_v56 = vmul.f32 %v3346_v36, %v2918_v58  ;;  %v305_v31 = vmul.f32 %v3346_v36, %v2943_v63  ;;  %v4774_v63 = vld [vmem:[#allocation6_spill] sm:$0xff] }
  0x4f   :  { %v3496_v28 = vadd.f32 %v265_v54, %v248_v53  ;;  %v307_v37 = vadd.f32 %v300_v60, %v2843_v40  ;;  %v4776_v40 = vld [vmem:[#allocation8_spill] sm:$0xff]  ;;  %v4778_v45 = vld [vmem:[#allocation10_spill] sm:$0xff]  ;;  %v4781_v60 = vld [vmem:[#allocation13_spill] sm:$0xff] }
  0x50   :  { %v309_v15 = vadd.f32 %v302_v56, %v2853_v42  ;;  %v312_v10 = vadd.f32 %v305_v31, %v4774_v63  ;;  %v317_v41 = vmul.f32 %v4776_v40, %v3414_v20  ;;  %v4777_v42 = vld [vmem:[#allocation9_spill] sm:$0xff]  ;;  %v4780_v53 = vld [vmem:[#allocation12_spill] sm:$0xff]  ;;  %v322_v46 = vmul.f32 %v4781_v60, %v3414_v20 }
  0x51   :  { %961 = vperm.xlu1 %2495, %v3203_v7   ;;  %956 = vperm.xlu0 %2494, %v3326_v13   ;;  %v303_v7 = vmul.f32 %v3346_v36, %v2933_v61  ;;  %v304_v13 = vmul.f32 %v3346_v36, %v2938_v62  ;;  %v316_v61 = vmul.f32 %v2962_v9, %v3414_v20  ;;  %v4773_v62 = vld [vmem:[#allocation5_spill] sm:$0xff]  ;;  %v3521_v36 = vstv %s3450_s15 }
  0x52   :  { %v319_v9 = vmul.f32 %v4778_v45, %v3414_v20  ;;  %v321_v54 = vmul.f32 %v4780_v53, %v3414_v20  ;;  %v324_v31 = vadd.f32 %v317_v41, %v308_v57  ;;  %v329_v40 = vadd.f32 %v322_v46, %v313_v5  ;;  %v2537_v5 = vld [vmem:[%s4676_s5 + $0x160] ss:$8 sps:$4 sm:$0xff]   ;;  %v4788_v41 = vld [vmem:[#allocation20_spill] sm:$0xff] }
  0x53   :  { %v310_v58 = vadd.f32 %v303_v7, %v2875_v48  ;;  %v311_v59 = vadd.f32 %v304_v13, %v4773_v62  ;;  %v318_v48 = vmul.f32 %v4777_v42, %v3414_v20  ;;  %v323_v56 = vadd.f32 %v316_v61, %v307_v37  ;;  %v4782_v7 = vld [vmem:[#allocation14_spill] sm:$0xff]  ;;  %v4783_v42 = vld [vmem:[#allocation15_spill] sm:$0xff]  ;;  %v4784_v37 = vld [vmem:[#allocation16_spill] sm:$0xff] }
  0x54   :  { %v332_v13 = vmul.f32 %v4782_v7, %v3426_v52  ;;  %v328_v24 = vadd.f32 %v321_v54, %v312_v10  ;;  %v333_v45 = vmul.f32 %v4783_v42, %v3426_v52  ;;  %v334_v57 = vmul.f32 %v4784_v37, %v3426_v52  ;;  %v4787_v61 = vld [vmem:[#allocation19_spill] sm:$0xff]  ;;  %v2534_v10 = vld [vmem:[%s4676_s5 + $0xe0] ss:$8 sps:$4 sm:$0xff]  }
  0x55   :  { %971 = vperm.xlu1 %2495, %v3336_v30   ;;  %966 = vperm.xlu0 %2494, %v919_v26   ;;  %v4779_v30 = vld [vmem:[#allocation11_spill] sm:$0xff]  ;;  %v325_v33 = vadd.f32 %v318_v48, %v309_v15  ;;  %v326_v62 = vadd.f32 %v319_v9, %v310_v58  ;;  %v4785_v15 = vld [vmem:[#allocation17_spill] sm:$0xff]  ;;  %v338_v48 = vmul.f32 %v4788_v41, %v3426_v52 }
  0x56   :  { %v320_v26 = vmul.f32 %v4779_v30, %v3414_v20  ;;  %v3542_v30 = vstv %s3494_s21  ;;  %v2535_v20 = vld [vmem:[%s4676_s5 + $0x164] ss:$8 sps:$4 sm:$0xff]   ;;  %v335_v58 = vmul.f32 %v4785_v15, %v3426_v52  ;;  %v339_v9 = vadd.f32 %v332_v13, %v323_v56  ;;  %1135 = vmatpush1.bf16.msra.mxu1 %v2534_v10  ;;  %v2538_v37 = vld [vmem:[%s4676_s5 + $0xf4] ss:$8 sps:$4 sm:$0xff]  }
  0x57   :  { %v4789_v53 = vld [vmem:[#allocation21_spill] sm:$0xff]  ;;  %1513 = vmatprep.subr.bf16.mxu0 %v2535_v20  ;;  %v341_v60 = vadd.f32 %v334_v57, %v325_v33  ;;  %v345_v56 = vadd.f32 %v338_v48, %v329_v40  ;;  %v4790_v13 = vld [vmem:[#allocation22_spill] sm:$0xff]  ;;  %v4791_v33 = vld [vmem:[#allocation23_spill] sm:$0xff]  ;;  %1136 = vmatprep.subr.bf16.mxu1 %v2538_v37 }
  0x58   :  { %v327_v63 = vadd.f32 %v320_v26, %v311_v59  ;;  %v337_v59 = vmul.f32 %v4787_v61, %v3426_v52  ;;  %v340_v26 = vadd.f32 %v333_v45, %v324_v31  ;;  %v348_v54 = vmul.f32 %v4789_v53, %v3448_v34  ;;  %v2541_v45 = vld [vmem:[%s4676_s5 + $0x174] ss:$8 sps:$4 sm:$0xff]   ;;  %v4794_v57 = vld [vmem:[#allocation26_spill] sm:$0xff]  ;;  %1514 = vmatpush1.bf16.msra.mxu0 %v2537_v5  ;;  %v2543_v61 = vld [vmem:[%s4676_s5 + $0x170] ss:$8 sps:$4 sm:$0xff]  }
  0x59   :  { %981 = vperm.xlu1 %2495, %v3400_v27   ;;  %976 = vperm.xlu0 %2494, %v3404_v29   ;;  %v4786_v27 = vld [vmem:[#allocation18_spill] sm:$0xff]  ;;  %v342_v46 = vadd.f32 %v335_v58, %v326_v62  ;;  %v349_v31 = vmul.f32 %v4790_v13, %v3448_v34  ;;  %v350_v62 = vmul.f32 %v4791_v33, %v3448_v34  ;;  %v4795_v40 = vld [vmem:[#allocation27_spill] sm:$0xff]  ;;  %v4796_v48 = vld [vmem:[#allocation28_spill] sm:$0xff] }
  0x5a   :  { %v336_v29 = vmul.f32 %v4786_v27, %v3426_v52  ;;  %v344_v42 = vadd.f32 %v337_v59, %v328_v24  ;;  %v3572_v52 = vld [vmem:[%s4672_s1 + $0x200] sm:$0xff]  ;;  %v353_v15 = vmul.f32 %v4794_v57, %v3448_v34  ;;  %v354_v58 = vmul.f32 %v4795_v40, %v3448_v34  ;;  %v4798_v37 = vld [vmem:[#allocation30_spill] sm:$0xff]  ;;  %1515 = vmatprep.subr.bf16.mxu0 %v2541_v45 }
  0x5b   :  { %v355_v27 = vadd.f32 %v348_v54, %v339_v9  ;;  %v356_v59 = vadd.f32 %v349_v31, %v340_v26  ;;  %v357_v10 = vadd.f32 %v350_v62, %v341_v60  ;;  %v364_v53 = vmul.f32 %v4796_v48, %v3459_v18  ;;  %v4797_v26 = vld [vmem:[#allocation29_spill] sm:$0xff]  ;;  %v4799_v31 = vld [vmem:[#allocation31_spill] sm:$0xff]  ;;  %v4800_v62 = vld [vmem:[#allocation32_spill] sm:$0xff] }
  0x5c   :  { %v343_v7 = vadd.f32 %v336_v29, %v327_v63  ;;  %v4792_v63 = vld [vmem:[#allocation24_spill] sm:$0xff]  ;;  %v3602_v5 = vadd.f32 %v3465_v21, %v3461_v4  ;;  %v3606_v9 = vmul.f32 %v3572_v52, %v3330_v39  ;;  %v365_v60 = vmul.f32 %v4797_v26, %v3459_v18  ;;  %v3619_v21 = vld [vmem:[%s4672_s1 + $0x208] sm:$0xff]  ;;  %1516 = vmatpush1.bf16.msra.mxu0 %v2543_v61 }
  0x5d   :  { %986 = vperm.xlu0 %2494, %v3454_v16   ;;  %v351_v24 = vmul.f32 %v4792_v63, %v3448_v34  ;;  %v4793_v16 = vld [vmem:[#allocation25_spill] sm:$0xff]  ;;  %v2540_v29 = vld [vmem:[%s4676_s5 + $0xf0] ss:$8 sps:$4 sm:$0xff]   ;;  %v366_v13 = vmul.f32 %v4798_v37, %v3459_v18  ;;  %v367_v33 = vmul.f32 %v4799_v31, %v3459_v18  ;;  %v368_v4 = vmul.f32 %v4800_v62, %v3459_v18  ;;  %v4803_v40 = vld [vmem:[#allocation34_spill] sm:$0xff] }
  0x5e   :  { %v352_v20 = vmul.f32 %v4793_v16, %v3448_v34  ;;  %v2546_v34 = vld [vmem:[%s4676_s5 + $0x4] ss:$8 sps:$4 sm:$0xff]   ;;  %1137 = vmatpush1.bf16.msra.mxu1 %v2540_v29  ;;  %v372_v16 = vadd.f32 %v365_v60, %v356_v59  ;;  %v370_v29 = vmul.f32 %v4803_v40, %v3459_v18  ;;  %v4804_v31 = vld [vmem:[#allocation36_spill] sm:$0xff]  ;;  %v396_v62 = vmul.f32 %v3247_v50, %v3471_v11  ;;  %v3670_v50 = vld [vmem:[%s4672_s1 + $0x228] sm:$0x1] }
  0x5f   :  { %v358_v41 = vadd.f32 %v351_v24, %v342_v46  ;;  %v360_v46 = vadd.f32 %v353_v15, %v344_v42  ;;  %v4801_v42 = vld [vmem:[#allocation33_spill] sm:$0xff]  ;;  %v371_v24 = vadd.f32 %v364_v53, %v355_v27  ;;  %v361_v15 = vadd.f32 %v354_v58, %v345_v56  ;;  %1303 = vmatprep.subr.bf16.mxu1 %v2546_v34  ;;  %v4806_v61 = vld [vmem:[#allocation38_spill] sm:$0xff]  ;;  %v4807_v58 = vld [vmem:[#allocation39_spill] sm:$0xff] }
  0x60   :  { %v359_v54 = vadd.f32 %v352_v20, %v343_v7  ;;  %v3624_v7 = vld [vmem:[%s4672_s1 + $0x210] sm:$0xff]  ;;  %v369_v63 = vmul.f32 %v4801_v42, %v3459_v18  ;;  %v2549_v45 = vld [vmem:[%s4676_s5 + $0x184] ss:$8 sps:$4 sm:$0xff]   ;;  %v373_v48 = vadd.f32 %v366_v13, %v357_v10  ;;  %v381_v27 = vmul.f32 %v4804_v31, %v3468_v23 }
  0x61   :  { %v4802_v20 = vld [vmem:[#allocation35_spill] sm:$0xff]  ;;  %v374_v26 = vadd.f32 %v367_v33, %v358_v41  ;;  %v4805_v59 = vld [vmem:[#allocation37_spill] sm:$0xff]  ;;  %v383_v60 = vmul.f32 %v4806_v61, %v3468_v23  ;;  %1725 = vmatprep.subr.bf16.mxu0 %v2549_v45  ;;  %v286_v56 = vmul.f32 %v3619_v21, %v3330_v39  ;;  %v3645_v18 = vmul.f32 %v3624_v7, %v3330_v39 }
  0x62   :  { %v380_v57 = vmul.f32 %v4802_v20, %v3468_v23  ;;  %v375_v37 = vadd.f32 %v368_v4, %v359_v54  ;;  %v382_v53 = vmul.f32 %v4805_v59, %v3468_v23  ;;  %v384_v10 = vmul.f32 %v4807_v58, %v3468_v23  ;;  %v4808_v54 = vld [vmem:[#allocation40_spill] sm:$0xff]  ;;  %v3661_v42 = vld [vmem:[%s4672_s1 + $0x220] sm:$0xff]  ;;  %v4811_v31 = vld [vmem:[#allocation43_spill] sm:$0xff] }
  0x63   :  { %v376_v34 = vadd.f32 %v369_v63, %v360_v46  ;;  %v385_v13 = vmul.f32 %v4808_v54, %v3468_v23  ;;  %v388_v33 = vadd.f32 %v381_v27, %v372_v16  ;;  %v3656_v4 = vld [vmem:[%s4672_s1 + $0x218] sm:$0xff]  ;;  %v377_v20 = vadd.f32 %v370_v29, %v361_v15  ;;  %v4809_v46 = vld [vmem:[#allocation41_spill] sm:$0xff]  ;;  %v4810_v16 = vld [vmem:[#allocation42_spill] sm:$0xff] }
  0x64   :  { %v387_v41 = vadd.f32 %v380_v57, %v371_v24  ;;  %v386_v63 = vmul.f32 %v4809_v46, %v3468_v23  ;;  %v389_v24 = vadd.f32 %v382_v53, %v373_v48  ;;  %v397_v57 = vmul.f32 %v4810_v16, %v3471_v11  ;;  %v4812_v59 = vld [vmem:[#allocation44_spill] sm:$0xff]  ;;  %v4813_v54 = vld [vmem:[#allocation45_spill] sm:$0xff] }
  0x65   :  { %v390_v45 = vadd.f32 %v383_v60, %v374_v26  ;;  %v391_v40 = vadd.f32 %v384_v10, %v375_v37  ;;  %v398_v27 = vmul.f32 %v4811_v31, %v3471_v11  ;;  %v399_v15 = vmul.f32 %v4812_v59, %v3471_v11 }
  0x66   :  { %v400_v23 = vmul.f32 %v3272_v22, %v3471_v11  ;;  %v403_v29 = vadd.f32 %v396_v62, %v387_v41  ;;  %v404_v48 = vadd.f32 %v397_v57, %v388_v33  ;;  %v412_v53 = vmul.f32 %v3291_v1, %v3492_v32 }
  0x67   :  { %v288_v61 = vmul.f32 %v3656_v4, %v3330_v39  ;;  %v289_v26 = vmul.f32 %v3661_v42, %v3330_v39  ;;  %v392_v37 = vadd.f32 %v385_v13, %v376_v34  ;;  %v401_v60 = vmul.f32 %v3281_v43, %v3471_v11  ;;  %v4814_v13 = vld [vmem:[#allocation46_spill] sm:$0xff] }
  0x68   :  { %v290_v58 = vmul.f32 %v3670_v50, %v3330_v39  ;;  %v405_v10 = vadd.f32 %v398_v27, %v389_v24  ;;  %v413_v22 = vmul.f32 %v3301_v6, %v3492_v32  ;;  %v414_v1 = vmul.f32 %v3312_v12, %v3492_v32  ;;  %v4815_v6 = vld [vmem:[#allocation47_spill] sm:$0xff]  ;;  %v4816_v12 = vld [vmem:[#allocation48_spill] sm:$0xff] }
  0x69   :  { %v393_v41 = vadd.f32 %v386_v63, %v377_v20  ;;  %v402_v33 = vmul.f32 %v4813_v54, %v3471_v11  ;;  %v406_v62 = vadd.f32 %v399_v15, %v390_v45  ;;  %v419_v46 = vadd.f32 %v412_v53, %v403_v29 }
  0x6a   :  { %v407_v34 = vadd.f32 %v400_v23, %v391_v40  ;;  %v415_v43 = vmul.f32 %v4814_v13, %v3492_v32  ;;  %v420_v16 = vadd.f32 %v413_v22, %v404_v48  ;;  %v428_v39 = vmul.f32 %v3362_v38, %v3521_v36 }
  0x6b   :  { %v408_v24 = vadd.f32 %v401_v60, %v392_v37  ;;  %v416_v57 = vmul.f32 %v4815_v6, %v3492_v32  ;;  %v417_v20 = vmul.f32 %v4816_v12, %v3492_v32  ;;  %v429_v11 = vmul.f32 %v3371_v35, %v3521_v36 }
  0x6c   :  { %v3706_v63 = vadd.f32 %v3479_v3, %v3473_v49  ;;  %v3710_v45 = vadd.f32 %v3606_v9, %v3475_v8  ;;  %v421_v40 = vadd.f32 %v414_v1, %v405_v10  ;;  %v430_v38 = vmul.f32 %v3384_v19, %v3521_v36 }
  0x6d   :  { %v409_v31 = vadd.f32 %v402_v33, %v393_v41  ;;  %v418_v27 = vmul.f32 %v3355_v44, %v3492_v32  ;;  %v435_v59 = vadd.f32 %v428_v39, %v419_v46  ;;  %v444_v35 = vmul.f32 %v3435_v55, %v3542_v30 }
  0x6e   :  { %v3719_v49 = vadd.f32 %v286_v56, %v3485_v2  ;;  %v422_v3 = vadd.f32 %v415_v43, %v406_v62  ;;  %v431_v8 = vmul.f32 %v3389_v47, %v3521_v36  ;;  %v436_v9 = vadd.f32 %v429_v11, %v420_v16 }
  0x6f   :  { %v423_v15 = vadd.f32 %v416_v57, %v407_v34  ;;  %v424_v23 = vadd.f32 %v417_v20, %v408_v24  ;;  %v432_v19 = vmul.f32 %v3394_v0, %v3521_v36  ;;  %v445_v44 = vmul.f32 %v3572_v52, %v3542_v30 }
  0x70   :  { %v433_v55 = vmul.f32 %v3411_v17, %v3521_v36  ;;  %v437_v32 = vadd.f32 %v430_v38, %v421_v40  ;;  %v446_v2 = vmul.f32 %v3619_v21, %v3542_v30  ;;  %v451_v56 = vadd.f32 %v444_v35, %v435_v59 }
  0x71   :  { %v294_v47 = vadd.f32 %v3645_v18, %v3487_v25  ;;  %v425_v29 = vadd.f32 %v418_v27, %v409_v31  ;;  %v434_v48 = vmul.f32 %v3423_v51, %v3521_v36  ;;  %v487_v0 = vadd.f32 %v3710_v45, %v3706_v63 }
  0x72   :  { %v295_v52 = vadd.f32 %v288_v61, %v3489_v14  ;;  %v438_v53 = vadd.f32 %v431_v8, %v422_v3  ;;  %v447_v17 = vmul.f32 %v3624_v7, %v3542_v30  ;;  %v452_v37 = vadd.f32 %v445_v44, %v436_v9 }
  0x73   :  { %v296_v21 = vadd.f32 %v289_v26, %v3496_v28  ;;  %v297_v60 = vadd.f32 %v290_v58, %v3602_v5  ;;  %v439_v10 = vadd.f32 %v432_v19, %v423_v15  ;;  %v488_v25 = vadd.f32 %v487_v0, %v3719_v49 }
  0x74   :  { %v440_v18 = vadd.f32 %v433_v55, %v424_v23  ;;  %v448_v51 = vmul.f32 %v3656_v4, %v3542_v30  ;;  %v453_v36 = vadd.f32 %v446_v2, %v437_v32  ;;  %v466_v22 = vrot.slane %v451_v56, 7 }
  0x75   :  { %v441_v1 = vadd.f32 %v434_v48, %v425_v29  ;;  %v449_v14 = vmul.f32 %v3661_v42, %v3542_v30  ;;  %v450_v7 = vmul.f32 %v3670_v50, %v3542_v30  ;;  %v489_v61 = vadd.f32 %v488_v25, %v294_v47 }
  0x76   :  { %v454_v28 = vadd.f32 %v447_v17, %v438_v53  ;;  %v467_v26 = vrot.slane %v452_v37, 7  ;;  %v455_v58 = vadd.f32 %v448_v51, %v439_v10  ;;  %v469_v41 = vrot.slane %v453_v36, 7 }
  0x77   :  { %v490_v5 = vadd.f32 %v489_v61, %v295_v52  ;;  %v486_v54 = vsel %vm465_vm0, %v297_v60, %v466_v22  ;;  %v456_v33 = vadd.f32 %v449_v14, %v440_v18  ;;  %v457_v62 = vadd.f32 %v450_v7, %v441_v1 }
  0x78   :  { %v468_v46 = vsel %vm465_vm0, %v466_v22, %v467_v26  ;;  %v471_v34 = vrot.slane %v454_v28, 7  ;;  %v470_v42 = vsel %vm465_vm0, %v467_v26, %v469_v41  ;;  %v473_v43 = vrot.slane %v455_v58, 7 }
  0x79   :  { %v491_v4 = vadd.f32 %v490_v5, %v296_v21  ;;  %v475_v16 = vrot.slane %v456_v33, 7  ;;  %v477_v30 = vrot.slane %v457_v62, 7 }
  0x7a   :  { %v472_v39 = vsel %vm465_vm0, %v469_v41, %v471_v34  ;;  %v474_v6 = vsel %vm465_vm0, %v471_v34, %v473_v43 }
  0x7b   :  { %v492_v13 = vadd.f32 %v491_v4, %v486_v54  ;;  %v478_v57 = vsel %vm465_vm0, %v475_v16, %v477_v30  ;;  %v476_v20 = vsel %vm465_vm0, %v473_v43, %v475_v16 }
  0x7c   :  { %v499_v40 = vsel %vm498_vm1, %v478_v57, 0.0 }
  0x7d   :  { %v493_v50 = vadd.f32 %v492_v13, %v468_v46 }
  0x7f   :  { %v494_v24 = vadd.f32 %v493_v50, %v470_v42 }
  0x81   :  { %v495_v12 = vadd.f32 %v494_v24, %v472_v39 }
  0x83   :  { %v496_v11 = vadd.f32 %v495_v12, %v474_v6 }
  0x85   :  { %v497_v38 = vadd.f32 %v496_v11, %v476_v20 }
  0x87   :  { %v500_v31 = vadd.f32 %v499_v40, %v497_v38 }
  0x89   :  { %v501_v27 = vrot.slane %v500_v31, 4 }
  0x8b   :  { %v502_v59 = vadd.f32 %v501_v27, %v500_v31 }
  0x8d   :  { %v503_v35 = vrot.slane %v502_v59, 2 }
  0x8f   :  { %v504_v3 = vadd.f32 %v503_v35, %v502_v59 }
  0x90   :  { %v3757_v8 = vpop.permute.xlu1 %825  ;;  %v3759_v15 = vpop.permute.xlu0 %700 }
  0x91   :  { %v505_v9 = vrot.slane %v504_v3, 1 }
  0x93   :  { %v506_v23 = vadd.f32 %v505_v9, %v504_v3 }
  0x94   :  { %v3761_v44 = vpop.permute.xlu1 %830  ;;  %v3772_v56 = vpop.permute.xlu0 %705 }
  0x95   :  { %v508_v19 = vmul.f32 0.010204081, %v506_v23 }
  0x97   :  { %v3764_v55 = vsub.f32 %v3706_v63, %v508_v19  ;;  %v3767_v32 = vsub.f32 %v3710_v45, %v508_v19  ;;  %v3770_v2 = vsub.f32 %v3719_v49, %v508_v19  ;;  %v3774_v29 = vsub.f32 %v294_v47, %v508_v19 }
  0x98   :  { %v3780_v53 = vsub.f32 %v295_v52, %v508_v19  ;;  %v3784_v45 = vpop.permute.xlu1 %715  ;;  %v3786_v17 = vsub.f32 %v296_v21, %v508_v19  ;;  %v3790_v37 = vpop.permute.xlu0 %710  ;;  %v3792_v60 = vsub.f32 %v486_v54, %v508_v19  ;;  %v516_v25 = vsub.f32 %v468_v46, %v508_v19 }
  0x99   :  { %v522_v48 = vmul.f32 %v3764_v55, %v3764_v55  ;;  %v523_v0 = vmul.f32 %v3767_v32, %v3767_v32  ;;  %v524_v63 = vmul.f32 %v3770_v2, %v3770_v2  ;;  %v525_v49 = vmul.f32 %v3774_v29, %v3774_v29 }
  0x9a   :  { %v526_v10 = vmul.f32 %v3780_v53, %v3780_v53  ;;  %v527_v18 = vmul.f32 %v3786_v17, %v3786_v17  ;;  %v3800_v21 = vsub.f32 %v470_v42, %v508_v19  ;;  %v528_v22 = vmul.f32 %v3792_v60, %v3792_v60 }
  0x9b   :  { %v535_v47 = vadd.f32 %v523_v0, %v522_v48  ;;  %v3806_v7 = vsub.f32 %v472_v39, %v508_v19  ;;  %v529_v61 = vmul.f32 %v516_v25, %v516_v25  ;;  %v3808_v26 = vsub.f32 %v474_v6, %v508_v19 }
  0x9c   :  { %v3798_v36 = vpop.permute.xlu1 %840  ;;  %v3804_v14 = vpop.permute.xlu0 %835  ;;  %v530_v5 = vmul.f32 %v3800_v21, %v3800_v21  ;;  %v3812_v41 = vsub.f32 %v478_v57, %v508_v19  ;;  %v3816_v33 = vsub.f32 %v476_v20, %v508_v19 }
  0x9d   :  { %v536_v52 = vadd.f32 %v535_v47, %v524_v63  ;;  %v531_v62 = vmul.f32 %v3806_v7, %v3806_v7  ;;  %v532_v34 = vmul.f32 %v3808_v26, %v3808_v26 }
  0x9e   :  { %v534_v42 = vmul.f32 %v3812_v41, %v3812_v41  ;;  %v533_v43 = vmul.f32 %v3816_v33, %v3816_v33 }
  0x9f   :  { %v537_v51 = vadd.f32 %v536_v52, %v525_v49  ;;  %v3858_v52 = vld [vmem:[%s4674_s3] ss:$0 sm:$0xff] }
  0xa0   :  { %v3814_v54 = vpop.permute.xlu1 %725  ;;  %v3820_v46 = vpop.permute.xlu0 %720  ;;  %v546_v24 = vsel %vm498_vm1, %v534_v42, 0.0 }
  0xa1   :  { %v538_v1 = vadd.f32 %v537_v51, %v526_v10 }
  0xa3   :  { %v539_v28 = vadd.f32 %v538_v1, %v527_v18 }
  0xa4   :  { %v3828_v30 = vpop.permute.xlu1 %850  ;;  %v3830_v39 = vpop.permute.xlu0 %845 }
  0xa5   :  { %v540_v58 = vadd.f32 %v539_v28, %v528_v22 }
  0xa7   :  { %v541_v4 = vadd.f32 %v540_v58, %v529_v61  ;;  %v3871_v61 = vld [vmem:[%s4675_s4] ss:$0 sm:$0xff] }
  0xa8   :  { %v3833_v12 = vpop.permute.xlu1 %735  ;;  %v3835_v11 = vpop.permute.xlu0 %730 }
  0xa9   :  { %v542_v13 = vadd.f32 %v541_v4, %v530_v5 }
  0xab   :  { %v543_v16 = vadd.f32 %v542_v13, %v531_v62 }
  0xac   :  { %v3837_v31 = vpop.permute.xlu1 %860  ;;  %v3839_v59 = vpop.permute.xlu0 %855 }
  0xad   :  { %v544_v50 = vadd.f32 %v543_v16, %v532_v34 }
  0xaf   :  { %v545_v6 = vadd.f32 %v544_v50, %v533_v43 }
  0xb0   :  { %v3841_v9 = vpop.permute.xlu1 %745  ;;  %v3843_v19 = vpop.permute.xlu0 %740 }
  0xb1   :  { %v547_v57 = vadd.f32 %v546_v24, %v545_v6 }
  0xb3   :  { %v548_v20 = vrot.slane %v547_v57, 4 }
  0xb4   :  { %v3845_v0 = vpop.permute.xlu1 %870  ;;  %v3847_v63 = vpop.permute.xlu0 %865 }
  0xb5   :  { %v549_v40 = vadd.f32 %v548_v20, %v547_v57 }
  0xb7   :  { %v550_v38 = vrot.slane %v549_v40, 2 }
  0xb8   :  { %v3849_v49 = vpop.permute.xlu1 %755  ;;  %v3851_v47 = vpop.permute.xlu0 %750 }
  0xb9   :  { %v551_v27 = vadd.f32 %v550_v38, %v549_v40 }
  0xbb   :  { %v552_v35 = vrot.slane %v551_v27, 1 }
  0xbc   :  { %v3884_v4 = vpop.permute.xlu1 %880 }
  0xbd   :  { %v553_v3 = vadd.f32 %v552_v35, %v551_v27 }
  0xbf   :  { %v554_v23 = vmul.f32 0.010204081, %v553_v3 }
  0xc1   :  { %v555_v48 = vadd.f32 1e-05, %v554_v23 }
  0xc3   :  { %2592 = vrsqrt.f32 %v555_v48 }
  0xcd   :  { %v3853_v10 = vpop.eup %2592 }
  0xce   :  { %v557_v18 = vmul.f32 %v3853_v10, %v3764_v55  ;;  %v558_v51 = vmul.f32 %v3853_v10, %v3767_v32  ;;  %v559_v22 = vmul.f32 %v3853_v10, %v3770_v2  ;;  %v560_v1 = vmul.f32 %v3853_v10, %v3774_v29 }
  0xcf   :  { %v561_v28 = vmul.f32 %v3853_v10, %v3780_v53  ;;  %v562_v55 = vmul.f32 %v3853_v10, %v3786_v17  ;;  %v563_v32 = vmul.f32 %v3853_v10, %v3792_v60  ;;  %v564_v5 = vmul.f32 %v3853_v10, %v516_v25  ;;  %v3891_v25 = vpop.permute.xlu0 %875 }
  0xd0   :  { %v577_v2 = vmul.f32 %v3858_v52, %v557_v18  ;;  %v578_v29 = vmul.f32 %v3858_v52, %v558_v51  ;;  %v579_v58 = vmul.f32 %v3858_v52, %v559_v22  ;;  %v580_v62 = vmul.f32 %v3858_v52, %v560_v1  ;;  %v3929_v1 = vpop.permute.xlu1 %885 }
  0xd1   :  { %v581_v53 = vmul.f32 %v3858_v52, %v561_v28  ;;  %v582_v34 = vmul.f32 %v3858_v52, %v562_v55  ;;  %v583_v17 = vmul.f32 %v3858_v52, %v563_v32  ;;  %v565_v60 = vmul.f32 %v3853_v10, %v3800_v21 }
  0xd2   :  { %v3894_v13 = vadd.f32 %v3871_v61, %v577_v2  ;;  %v3897_v42 = vadd.f32 %v3871_v61, %v578_v29  ;;  %v3900_v43 = vadd.f32 %v3871_v61, %v579_v58  ;;  %v3903_v16 = vadd.f32 %v3871_v61, %v580_v62 }
  0xd3   :  { %v3906_v50 = vadd.f32 %v3871_v61, %v581_v53  ;;  %v3909_v24 = vadd.f32 %v3871_v61, %v582_v34  ;;  %v3912_v21 = vadd.f32 %v3871_v61, %v583_v17  ;;  %v584_v6 = vmul.f32 %v3858_v52, %v564_v5  ;;  %v3935_v2 = vpop.permute.xlu0 %760 }
  0xd4   :  { %v695_v57 = vrot.slane %v3894_v13, 7  ;;  %v783_v20 = vrot.slane %v3897_v42, 7  ;;  %v657_v40 = vrot.slane %v3894_v13, 1  ;;  %v658_v38 = vrot.slane %v3897_v42, 1 }
  0xd5   :  { %v785_v27 = vrot.slane %v3900_v43, 7  ;;  %v660_v35 = vrot.slane %v3900_v43, 1  ;;  %v662_v3 = vrot.slane %v3903_v16, 1  ;;  %v664_v23 = vrot.slane %v3906_v50, 1 }
  0xd6   :  { %v784_v48 = vsel %vm465_vm0, %v695_v57, %v783_v20  ;;  %v659_v18 = vsel %vm656_vm2, %v657_v40, %v658_v38  ;;  %v787_v51 = vrot.slane %v3903_v16, 7  ;;  %v789_v22 = vrot.slane %v3906_v50, 7 }
  0xd7   :  { %v888_v28 = vmul.f32 %v3757_v8, %v784_v48  ;;  %v763_v55 = vmul.f32 %v3759_v15, %v659_v18  ;;  %v786_v32 = vsel %vm465_vm0, %v783_v20, %v785_v27  ;;  %v661_v5 = vsel %vm656_vm2, %v658_v38, %v660_v35  ;;  %v2544_v8 = vld [vmem:[%s4676_s5] ss:$8 sps:$4 sm:$0xff]   ;;  %v2552_v38 = vld [vmem:[%s4676_s5 + $0x14] ss:$8 sps:$4 sm:$0xff]  }
  0xd8   :  { %v889_v29 = vmul.f32 %v3761_v44, %v786_v32  ;;  %v764_v58 = vmul.f32 %v3772_v56, %v661_v5  ;;  %v665_v62 = vsel %vm656_vm2, %v662_v3, %v664_v23  ;;  %v663_v53 = vsel %vm656_vm2, %v660_v35, %v662_v3  ;;  %v2547_v15 = vld [vmem:[%s4676_s5 + $0x180] ss:$8 sps:$4 sm:$0xff]   ;;  %v3975_v32 = vpop.permute.xlu0 %926 }
  0xd9   :  { %v790_v34 = vsel %vm465_vm0, %v787_v51, %v789_v22  ;;  %v788_v17 = vsel %vm465_vm0, %v785_v27, %v787_v51  ;;  %v766_v56 = vmul.f32 %v3784_v45, %v665_v62  ;;  %v765_v40 = vmul.f32 %v3790_v37, %v663_v53  ;;  %v2555_v27 = vld [vmem:[%s4676_s5 + $0x194] ss:$8 sps:$4 sm:$0xff]  }
  0xda   :  { %v901_v20 = vpack.c.bf16 %v889_v29, %v888_v28  ;;  %v776_v44 = vpack.c.bf16 %v764_v58, %v763_v55  ;;  %v891_v35 = vmul.f32 %v3798_v36, %v790_v34  ;;  %v890_v3 = vmul.f32 %v3804_v14, %v788_v17  ;;  %v3967_v14 = vpop.permute.xlu1 %931  ;;  %v2550_v28 = vld [vmem:[%s4676_s5 + $0x10] ss:$8 sps:$4 sm:$0xff]   ;;  %v2561_v58 = vld [vmem:[%s4676_s5 + $0x1a4] ss:$8 sps:$4 sm:$0xff]  }
  0xdb   :  { %v666_v48 = vrot.slane %v3909_v24, 1  ;;  %v791_v18 = vrot.slane %v3909_v24, 7  ;;  %v668_v45 = vrot.slane %v3912_v21, 1  ;;  %v793_v37 = vrot.slane %v3912_v21, 7  ;;  %v2553_v55 = vld [vmem:[%s4676_s5 + $0x190] ss:$8 sps:$4 sm:$0xff]  }
  0xdc   :  { %1155 = vmatmul.mubr.bf16.vlgmr.msra.gmra.mrb[0].mxu1 %v776_v44  ;;  %1534 = vmatmul.mubr.bf16.vlgmr.msra.gmra.mrb[0].mxu0 %v901_v20  ;;  %v585_v51 = vmul.f32 %v3858_v52, %v565_v60  ;;  %v3965_v36 = vadd.f32 %v3871_v61, %v584_v6  ;;  %v4817_v5 = vmov 0   ;;  %v2558_v6 = vld [vmem:[%s4676_s5 + $0x24] ss:$8 sps:$4 sm:$0xff]   ;;  %v777_v62 = vpack.c.bf16 %v766_v56, %v765_v40  ;;  %v2556_v40 = vld [vmem:[%s4676_s5 + $0x20] ss:$8 sps:$4 sm:$0xff]  }
  0xdd   :  { %1304 = vmatpush1.bf16.msra.mxu1 %v2544_v8  ;;  %1726 = vmatpush1.bf16.msra.mxu0 %v2547_v15  ;;  %v794_v60 = vsel %vm465_vm0, %v791_v18, %v793_v37  ;;  %v902_v15 = vpack.c.bf16 %v891_v35, %v890_v3  ;;  %v669_v34 = vsel %vm656_vm2, %v666_v48, %v668_v45 }
  0xde   :  { %1305 = vmatprep.subr.bf16.mxu1 %v2552_v38  ;;  %1164 = vmatprep.mubr.bf16.mxu1 %v4817_v5  ;;  %v670_v29 = vrot.slane %v3965_v36, 1  ;;  %v3988_v53 = vadd.f32 %v3871_v61, %v585_v51  ;;  %v795_v8 = vrot.slane %v3965_v36, 7  ;;  %v667_v17 = vsel %vm656_vm2, %v664_v23, %v666_v48  ;;  %v2559_v23 = vld [vmem:[%s4676_s5 + $0x1a0] ss:$8 sps:$4 sm:$0xff]   ;;  %v4010_v48 = vpop.permute.xlu1 %941  ;;  %v4029_v51 = vpop.permute.xlu0 %936 }
  0xdf   :  { %1543 = vmatprep.mubr.bf16.mxu0 %v4817_v5  ;;  %1727 = vmatprep.subr.bf16.mxu0 %v2555_v27  ;;  %v893_v44 = vmul.f32 %v3828_v30, %v794_v60  ;;  %v792_v56 = vsel %vm465_vm0, %v789_v22, %v791_v18  ;;  %v566_v22 = vmul.f32 %v3853_v10, %v3806_v7 }
  0xe0   :  { %v671_v20 = vsel %vm656_vm2, %v668_v45, %v670_v29  ;;  %v672_v38 = vrot.slane %v3988_v53, 1  ;;  %v797_v35 = vrot.slane %v3988_v53, 7  ;;  %v796_v30 = vsel %vm465_vm0, %v793_v37, %v795_v8  ;;  %v2564_v45 = vld [vmem:[%s4676_s5 + $0x34] ss:$8 sps:$4 sm:$0xff]  }
  0xe1   :  { %1306 = vmatpush1.bf16.msra.mxu1 %v2550_v28  ;;  %1728 = vmatpush1.bf16.msra.mxu0 %v2553_v55  ;;  %v4002_v3 = vmul.f32 %v3835_v11, %v671_v20  ;;  %v4019_v18 = vmul.f32 %v3839_v59, %v796_v30  ;;  %v567_v7 = vmul.f32 %v3853_v10, %v3808_v26  ;;  %v2567_v37 = vld [vmem:[%s4676_s5 + $0x1b4] ss:$8 sps:$4 sm:$0xff]   ;;  %v2562_v26 = vld [vmem:[%s4676_s5 + $0x30] ss:$8 sps:$4 sm:$0xff]  }
  0xe2   :  { %1307 = vmatprep.subr.bf16.mxu1 %v2558_v6  ;;  %1729 = vmatprep.subr.bf16.mxu0 %v2561_v58  ;;  %v673_v27 = vsel %vm656_vm2, %v670_v29, %v672_v38  ;;  %v798_v11 = vsel %vm465_vm0, %v795_v8, %v797_v35  ;;  %v892_v28 = vmul.f32 %v3830_v39, %v792_v56  ;;  %v2573_v58 = vld [vmem:[%s4676_s5 + $0x1c4] ss:$8 sps:$4 sm:$0xff]   ;;  %v2568_v56 = vld [vmem:[%s4676_s5 + $0x40] ss:$8 sps:$4 sm:$0xff]  }
  0xe3   :  { %v4033_v59 = vmul.f32 %v3833_v12, %v673_v27  ;;  %v4036_v55 = vmul.f32 %v3837_v31, %v798_v11  ;;  %v768_v60 = vmul.f32 %v3814_v54, %v669_v34  ;;  %v767_v6 = vmul.f32 %v3820_v46, %v667_v17  ;;  %v2565_v54 = vld [vmem:[%s4676_s5 + $0x1b0] ss:$8 sps:$4 sm:$0xff]   ;;  %v2570_v31 = vld [vmem:[%s4676_s5 + $0x44] ss:$8 sps:$4 sm:$0xff]   ;;  %v4064_v34 = vpop.permute.xlu1 %951  ;;  %v4066_v17 = vpop.permute.xlu0 %946 }
  0xe4   :  { %1165 = vmatmul.mubr.bf16.gmra.mrb[4].mxu1 %v777_v62  ;;  %1544 = vmatmul.mubr.bf16.gmra.mrb[4].mxu0 %v902_v15  ;;  %v586_v46 = vmul.f32 %v3858_v52, %v566_v22  ;;  %v587_v29 = vmul.f32 %v3858_v52, %v567_v7  ;;  %v903_v62 = vpack.c.bf16 %v893_v44, %v892_v28  ;;  %v2571_v44 = vld [vmem:[%s4676_s5 + $0x1c0] ss:$8 sps:$4 sm:$0xff]   ;;  %v2574_v11 = vld [vmem:[%s4676_s5 + $0x50] ss:$8 sps:$4 sm:$0xff]   ;;  %v2585_v28 = vld [vmem:[%s4676_s5 + $0x1e4] ss:$8 sps:$4 sm:$0xff]  }
  0xe5   :  { %1308 = vmatpush1.bf16.msra.mxu1 %v2556_v40  ;;  %1174 = vmatprep.mubr.bf16.mxu1 %v4817_v5  ;;  %v779_v39 = vpack.c.bf16 %v4033_v59, %v4002_v3  ;;  %v904_v12 = vpack.c.bf16 %v4036_v55, %v4019_v18  ;;  %v568_v8 = vmul.f32 %v3853_v10, %v3816_v33  ;;  %v2579_v40 = vld [vmem:[%s4676_s5 + $0x1d4] ss:$8 sps:$4 sm:$0xff]   ;;  %v2577_v18 = vld [vmem:[%s4676_s5 + $0x1d0] ss:$8 sps:$4 sm:$0xff]  }
  0xe6   :  { %1553 = vmatprep.mubr.bf16.mxu0 %v4817_v5  ;;  %1730 = vmatpush1.bf16.msra.mxu0 %v2559_v23  ;;  %v569_v15 = vmul.f32 %v3853_v10, %v3812_v41  ;;  %v778_v20 = vpack.c.bf16 %v768_v60, %v767_v6  ;;  %v4075_v33 = vadd.f32 %v3871_v61, %v586_v46  ;;  %v2576_v10 = vld [vmem:[%s4676_s5 + $0x54] ss:$8 sps:$4 sm:$0xff]  }
  0xe7   :  { %1309 = vmatprep.subr.bf16.mxu1 %v2564_v45  ;;  %1731 = vmatprep.subr.bf16.mxu0 %v2567_v37  ;;  %v4078_v41 = vadd.f32 %v3871_v61, %v587_v29  ;;  %v588_v23 = vmul.f32 %v3858_v52, %v568_v8  ;;  %v962_v45 = vpop.permute.xlu1 %961  ;;  %v2582_v37 = vld [vmem:[%s4676_s5 + $0x64] ss:$8 sps:$4 sm:$0xff]   ;;  %v957_v55 = vpop.permute.xlu0 %956 }
  0xe8   :  { %v589_v30 = vmul.f32 %v3858_v52, %v569_v15  ;;  %v799_v22 = vrot.slane %v4075_v33, 7  ;;  %v674_v52 = vrot.slane %v4075_v33, 1  ;;  %v2588_v15 = vld [vmem:[%s4676_s5 + $0x74] ss:$8 sps:$4 sm:$0xff]  }
  0xe9   :  { %1310 = vmatpush1.bf16.msra.mxu1 %v2562_v26  ;;  %v801_v27 = vrot.slane %v4078_v41, 7  ;;  %v676_v7 = vrot.slane %v4078_v41, 1  ;;  %v4107_v60 = vadd.f32 %v3871_v61, %v588_v23 }
  0xea   :  { %1732 = vmatpush1.bf16.msra.mxu0 %v2565_v54  ;;  %1311 = vmatprep.subr.bf16.mxu1 %v2570_v31  ;;  %v4110_v26 = vadd.f32 %v3871_v61, %v589_v30  ;;  %v800_v54 = vsel %vm465_vm0, %v797_v35, %v799_v22  ;;  %v4117_v31 = vmul.f32 %v962_v45, %v3988_v53  ;;  %v2580_v61 = vld [vmem:[%s4676_s5 + $0x60] ss:$8 sps:$4 sm:$0xff]  }
  0xeb   :  { %1733 = vmatprep.subr.bf16.mxu0 %v2573_v58  ;;  %v802_v6 = vsel %vm465_vm0, %v799_v22, %v801_v27  ;;  %v803_v46 = vrot.slane %v4107_v60, 7  ;;  %v2583_v58 = vld [vmem:[%s4676_s5 + $0x1e0] ss:$8 sps:$4 sm:$0xff]   ;;  %v677_v35 = vsel %vm656_vm2, %v674_v52, %v676_v7  ;;  %v675_v8 = vsel %vm656_vm2, %v672_v38, %v674_v52 }
  0xec   :  { %1175 = vmatmul.mubr.bf16.gmra.mrb[8].mxu1 %v778_v20  ;;  %1554 = vmatmul.mubr.bf16.gmra.mrb[8].mxu0 %v903_v62  ;;  %v805_v29 = vrot.slane %v4110_v26, 7  ;;  %v4128_v62 = vmul.f32 %v957_v55, %v3965_v36  ;;  %v2591_v20 = vld [vmem:[%s4676_s5 + $0x1f4] ss:$8 sps:$4 sm:$0xff]   ;;  %v771_v23 = vmul.f32 %v3843_v19, %v675_v8  ;;  %v678_v59 = vrot.slane %v4107_v60, 1 }
  0xed   :  { %1184 = vmatprep.mubr.bf16.mxu1 %v4817_v5  ;;  %1563 = vmatprep.mubr.bf16.mxu0 %v4817_v5  ;;  %v804_v30 = vsel %vm465_vm0, %v801_v27, %v803_v46  ;;  %v642_v8 = vpack.c.bf16 %v4110_v26, %v4110_v26 }
  0xee   :  { %1312 = vmatpush1.bf16.msra.mxu1 %v2568_v56  ;;  %1734 = vmatpush1.bf16.msra.mxu0 %v2571_v44  ;;  %v897_v56 = vmul.f32 %v3845_v0, %v802_v6  ;;  %v896_v44 = vmul.f32 %v3847_v63, %v800_v54  ;;  %v1005_v38 = vpack.c.bf16 %v4117_v31, %v4128_v62  ;;  %v2586_v0 = vld [vmem:[%s4676_s5 + $0x70] ss:$8 sps:$4 sm:$0xff]  }
  0xef   :  { %1313 = vmatprep.subr.bf16.mxu1 %v2576_v10  ;;  %1735 = vmatprep.subr.bf16.mxu0 %v2579_v40  ;;  %v819_v10 = vrot.slane %v3894_v13, 5  ;;  %v772_v40 = vmul.f32 %v3841_v9, %v677_v35  ;;  %v806_v3 = vsel %vm465_vm0, %v803_v46, %v805_v29  ;;  %v2589_v63 = vld [vmem:[%s4676_s5 + $0x1f0] ss:$8 sps:$4 sm:$0xff]   ;;  %v639_v9 = vpack.c.bf16 %v3965_v36, %v3912_v21 }
  0xf0   :  { %v905_v19 = vpack.c.bf16 %v897_v56, %v896_v44  ;;  %v898_v52 = vmul.f32 %v3891_v25, %v804_v30  ;;  %v636_v6 = vpack.c.bf16 %v3897_v42, %v3894_v13  ;;  %v991_v54 = vmul.f32 %v4029_v51, %v3903_v16 }
  0xf1   :  { %v780_v22 = vpack.c.bf16 %v772_v40, %v771_v23  ;;  %v993_v46 = vmul.f32 %v4066_v17, %v3909_v24 }
  0xf2   :  { %1314 = vmatpush1.bf16.msra.mxu1 %v2574_v11  ;;  %1736 = vmatpush1.bf16.msra.mxu0 %v2577_v18  ;;  %v679_v18 = vsel %vm656_vm2, %v676_v7, %v678_v59 }
  0xf3   :  { %1315 = vmatprep.subr.bf16.mxu1 %v2582_v37  ;;  %1737 = vmatprep.subr.bf16.mxu0 %v2585_v28  ;;  %v773_v27 = vmul.f32 %v3851_v47, %v679_v18  ;;  %v990_v47 = vmul.f32 %v3967_v14, %v3900_v43  ;;  %v637_v14 = vpack.c.bf16 %v3903_v16, %v3900_v43  ;;  %v972_v43 = vpop.permute.xlu1 %971  ;;  %v967_v16 = vpop.permute.xlu0 %966 }
  0xf4   :  { %1185 = vmatmul.mubr.bf16.gmra.mrb[12].mxu1 %v779_v39  ;;  %1564 = vmatmul.mubr.bf16.gmra.mrb[12].mxu0 %v904_v12  ;;  %v680_v39 = vrot.slane %v4110_v26, 1  ;;  %v822_v12 = vsel %vm821_vm3, %v806_v3, %v819_v10 }
  0xf5   :  { %1194 = vmatprep.mubr.bf16.mxu1 %v4817_v5  ;;  %1573 = vmatprep.mubr.bf16.mxu0 %v4817_v5  ;;  %v899_v45 = vmul.f32 %v3884_v4, %v822_v12  ;;  %v900_v4 = vmul.f32 %v3929_v1, %v819_v10 }
  0xf6   :  { %1316 = vmatpush1.bf16.msra.mxu1 %v2580_v61  ;;  %1738 = vmatpush1.bf16.msra.mxu0 %v2583_v58  ;;  %v681_v11 = vsel %vm656_vm2, %v678_v59, %v680_v39  ;;  %v697_v7 = vsel %vm465_vm0, %v680_v39, %v695_v57  ;;  %v989_v57 = vmul.f32 %v3975_v32, %v3897_v42 }
  0xf7   :  { %1317 = vmatprep.subr.bf16.mxu1 %v2588_v15  ;;  %1739 = vmatprep.subr.bf16.mxu0 %v2591_v20  ;;  %v774_v36 = vmul.f32 %v3849_v49, %v681_v11  ;;  %v906_v37 = vpack.c.bf16 %v899_v45, %v898_v52  ;;  %v775_v25 = vmul.f32 %v3935_v2, %v697_v7  ;;  %v982_v29 = vpop.permute.xlu1 %981  ;;  %v977_v31 = vpop.permute.xlu0 %976 }
  0xf8   :  { %v907_v55 = vpack.c.bf16 %v900_v4, %v900_v4  ;;  %v1002_v1 = vpack.c.bf16 %v990_v47, %v989_v57  ;;  %v992_v2 = vmul.f32 %v4010_v48, %v3906_v50  ;;  %v994_v42 = vmul.f32 %v4064_v34, %v3912_v21 }
  0xf9   :  { %v781_v28 = vpack.c.bf16 %v774_v36, %v773_v27  ;;  %v782_v49 = vpack.c.bf16 %v775_v25, %v775_v25  ;;  %v638_v48 = vpack.c.bf16 %v3909_v24, %v3906_v50  ;;  %v998_v50 = vmul.f32 %v972_v43, %v4078_v41 }
  0xfa   :  { %1318 = vmatpush1.bf16.msra.mxu1 %v2586_v0  ;;  %1740 = vmatpush1.bf16.msra.mxu0 %v2589_v63  ;;  %v1003_v32 = vpack.c.bf16 %v992_v2, %v991_v54  ;;  %v1004_v51 = vpack.c.bf16 %v994_v42, %v993_v46  ;;  %v997_v24 = vmul.f32 %v967_v16, %v4075_v33  ;;  %v908_v21 = vrot.slane %v3894_v13, 6 }
  0xfb   :  { %v640_v34 = vpack.c.bf16 %v4075_v33, %v3988_v53  ;;  %v999_v62 = vmul.f32 %v977_v31, %v4107_v60  ;;  %v641_v13 = vpack.c.bf16 %v4107_v60, %v4078_v41  ;;  %v987_v53 = vpop.permute.xlu0 %986 }
  0xfc   :  { %1195 = vmatmul.mubr.bf16.gmra.mrb[16].mxu1 %v780_v22  ;;  %1574 = vmatmul.mubr.bf16.gmra.mrb[16].mxu0 %v905_v19  ;;  %v1006_v17 = vpack.c.bf16 %v998_v50, %v997_v24  ;;  %v910_v61 = vsel %vm498_vm1, %v4110_v26, %v908_v21  ;;  %v1001_v33 = vmul.f32 %v987_v53, %v908_v21  ;;  %v1854_v22 = vlaneseq }
  0xfd   :  { %1204 = vmatprep.mubr.bf16.mxu1 %v4817_v5  ;;  %1583 = vmatprep.mubr.bf16.mxu0 %v4817_v5  ;;  %v1000_v58 = vmul.f32 %v982_v29, %v910_v61 }
  0xfe   :  { %v1008_v15 = vpack.c.bf16 %v1001_v33, %v1001_v33 }
  0xff   :  { %v1007_v35 = vpack.c.bf16 %v1000_v58, %v999_v62 }
 0x104   :  { %1205 = vmatmul.mubr.bf16.gmra.mrb[20].mxu1 %v781_v28  ;;  %1584 = vmatmul.mubr.bf16.gmra.mrb[20].mxu0 %v906_v37 }
 0x105   :  { %1214 = vmatprep.mubr.bf16.mxu1 %v4817_v5  ;;  %1593 = vmatprep.mubr.bf16.mxu0 %v4817_v5 }
 0x10c   :  { %1215 = vmatmul.mubr.bf16.gmra.mrb[24].mxu1 %v782_v49  ;;  %1594 = vmatmul.mubr.bf16.gmra.mrb[24].mxu0 %v907_v55  ;;  %v1855_v55 = vshrl.u32 %v1854_v22, 7 }
 0x10d   :  { %1335 = vmatprep.mubr.bf16.mxu1 %v4817_v5  ;;  %1757 = vmatprep.mubr.bf16.mxu0 %v4817_v5 }
 0x10e   :  { %v4234_v47 = vsub.s32 0, %v1855_v55  ;;  %v4239_v2 = vsub.s32 1, %v1855_v55 }
 0x114   :  { %1336 = vmatmul.mubr.bf16.vlgmr.msra.gmra.mrb[0].mxu1 %v636_v6  ;;  %1758 = vmatmul.mubr.bf16.vlgmr.msra.gmra.mrb[0].mxu0 %v1002_v1  ;;  %v1852_v1 = vld [vmem:[%s4677_s6] sm:$0x3]  ;;  %s2612_s6 = smov 64  }
 0x115   :  { %1345 = vmatprep.mubr.bf16.mxu1 %v4817_v5  ;;  %1767 = vmatprep.mubr.bf16.mxu0 %v4817_v5  ;;  %v4242_v50 = vrot.slane %v1852_v1, %v4234_v47  ;;  %v4245_v21 = vrot.slane %v1852_v1, %v4239_v2 }
 0x11c   :  { %1346 = vmatmul.mubr.bf16.gmra.mrb[4].mxu1 %v637_v14  ;;  %1768 = vmatmul.mubr.bf16.gmra.mrb[4].mxu0 %v1003_v32 }
 0x11d   :  { %1355 = vmatprep.mubr.bf16.mxu1 %v4817_v5  ;;  %1777 = vmatprep.mubr.bf16.mxu0 %v4817_v5 }
 0x124   :  { %1356 = vmatmul.mubr.bf16.gmra.mrb[8].mxu1 %v638_v48  ;;  %1778 = vmatmul.mubr.bf16.gmra.mrb[8].mxu0 %v1004_v51 }
 0x125   :  { %1365 = vmatprep.mubr.bf16.mxu1 %v4817_v5  ;;  %1787 = vmatprep.mubr.bf16.mxu0 %v4817_v5 }
 0x12c   :  { %1366 = vmatmul.mubr.bf16.gmra.mrb[12].mxu1 %v639_v9  ;;  %1788 = vmatmul.mubr.bf16.gmra.mrb[12].mxu0 %v1005_v38 }
 0x12d   :  { %1375 = vmatprep.mubr.bf16.mxu1 %v4817_v5  ;;  %1797 = vmatprep.mubr.bf16.mxu0 %v4817_v5 }
 0x134   :  { %1376 = vmatmul.mubr.bf16.gmra.mrb[16].mxu1 %v640_v34  ;;  %1798 = vmatmul.mubr.bf16.gmra.mrb[16].mxu0 %v1006_v17 }
 0x135   :  { %1385 = vmatprep.mubr.bf16.mxu1 %v4817_v5  ;;  %1807 = vmatprep.mubr.bf16.mxu0 %v4817_v5 }
 0x13c   :  { %1386 = vmatmul.mubr.bf16.gmra.mrb[20].mxu1 %v641_v13  ;;  %1808 = vmatmul.mubr.bf16.gmra.mrb[20].mxu0 %v1007_v35 }
 0x13d   :  { %1395 = vmatprep.mubr.bf16.mxu1 %v4817_v5  ;;  %1817 = vmatprep.mubr.bf16.mxu0 %v4817_v5 }
 0x144   :  { %1396 = vmatmul.mubr.bf16.gmra.mrb[28].mxu1 %v642_v8  ;;  %1818 = vmatmul.mubr.bf16.gmra.mrb[28].mxu0 %v1008_v15 }
 0x1df   :  { %v4226_v20 = vpop.f32.mrb[24].mxu1  ;;  %v4228_v56 = vpop.f32.mrb[24].mxu0 }
 0x1e0   :  { %v4230_v41 = vpop.f32.mrb[25].mxu1  ;;  %v4232_v60 = vpop.f32.mrb[25].mxu0 }
 0x1e1   :  { %v1220_v44 = vpop.f32.mrb[26].mxu1  ;;  %v1599_v38 = vpop.f32.mrb[26].mxu0 }
 0x1e2   :  { %v1221_v10 = vpop.f32.mrb[27].mxu1  ;;  %v1600_v40 = vpop.f32.mrb[27].mxu0 }
 0x1e7   :  { %v1337_v5 = vpop.f32.mrb[0].mxu1  ;;  %v1759_v23 = vpop.f32.mrb[0].mxu0 }
 0x1e8   :  { %v2419_v3 = vadd.f32 %v1759_v23, %v1337_v5  ;;  %v1339_v0 = vpop.f32.mrb[1].mxu1  ;;  %v1761_v26 = vpop.f32.mrb[1].mxu0 }
 0x1e9   :  { %v2420_v63 = vadd.f32 %v1761_v26, %v1339_v0  ;;  %v1341_v59 = vpop.f32.mrb[2].mxu1  ;;  %v1763_v39 = vpop.f32.mrb[2].mxu0 }
 0x1ea   :  { %v2421_v9 = vadd.f32 %v1763_v39, %v1341_v59  ;;  %v1343_v19 = vpop.f32.mrb[3].mxu1  ;;  %v1765_v12 = vpop.f32.mrb[3].mxu0  ;;  %v4254_v29 = vadd.f32 %v2419_v3, %v4242_v50 }
 0x1eb   :  { %v2422_v30 = vadd.f32 %v1765_v12, %v1343_v19  ;;  %v4260_v62 = vadd.f32 %v2420_v63, %v4245_v21 }
 0x1ec   :  { %v4248_v34 = vadd.f32 %v2421_v9, %v4242_v50 }
 0x1ed   :  { %v4251_v17 = vadd.f32 %v2422_v30, %v4245_v21 }
 0x1ee   :  { %v1890_v8 = vadd.f32 %v4248_v34, %v4254_v29 }
 0x1ef   :  { %v1347_v11 = vpop.f32.mrb[4].mxu1  ;;  %v1769_v18 = vpop.f32.mrb[4].mxu0  ;;  %v1909_v10 = vadd.f32 %v4251_v17, %v4260_v62 }
 0x1f0   :  { %v2423_v45 = vadd.f32 %v1769_v18, %v1347_v11  ;;  %v1349_v52 = vpop.f32.mrb[5].mxu1  ;;  %v1771_v36 = vpop.f32.mrb[5].mxu0 }
 0x1f1   :  { %v2424_v27 = vadd.f32 %v1771_v36, %v1349_v52  ;;  %v1351_v37 = vpop.f32.mrb[6].mxu1  ;;  %v1773_v28 = vpop.f32.mrb[6].mxu0 }
 0x1f2   :  { %v2425_v7 = vadd.f32 %v1773_v28, %v1351_v37  ;;  %v1353_v4 = vpop.f32.mrb[7].mxu1  ;;  %v1775_v25 = vpop.f32.mrb[7].mxu0  ;;  %v4257_v61 = vadd.f32 %v2423_v45, %v4242_v50 }
 0x1f3   :  { %v2426_v49 = vadd.f32 %v1775_v25, %v1353_v4  ;;  %v4263_v13 = vadd.f32 %v2424_v27, %v4245_v21 }
 0x1f4   :  { %v1891_v3 = vadd.f32 %v1890_v8, %v4257_v61  ;;  %v4271_v0 = vadd.f32 %v2425_v7, %v4242_v50 }
 0x1f5   :  { %v1910_v63 = vadd.f32 %v1909_v10, %v4263_v13  ;;  %v4275_v59 = vadd.f32 %v2426_v49, %v4245_v21 }
 0x1f6   :  { %v1892_v19 = vadd.f32 %v1891_v3, %v4271_v0 }
 0x1f7   :  { %v1357_v57 = vpop.f32.mrb[8].mxu1  ;;  %v1779_v6 = vpop.f32.mrb[8].mxu0  ;;  %v1911_v22 = vadd.f32 %v1910_v63, %v4275_v59 }
 0x1f8   :  { %v2427_v54 = vadd.f32 %v1779_v6, %v1357_v57  ;;  %v1359_v14 = vpop.f32.mrb[9].mxu1  ;;  %v1781_v32 = vpop.f32.mrb[9].mxu0 }
 0x1f9   :  { %v2428_v42 = vadd.f32 %v1781_v32, %v1359_v14  ;;  %v1361_v46 = vpop.f32.mrb[10].mxu1  ;;  %v1783_v48 = vpop.f32.mrb[10].mxu0 }
 0x1fa   :  { %v2429_v51 = vadd.f32 %v1783_v48, %v1361_v46  ;;  %v1363_v43 = vpop.f32.mrb[11].mxu1  ;;  %v1785_v16 = vpop.f32.mrb[11].mxu0  ;;  %v4278_v39 = vadd.f32 %v2427_v54, %v4242_v50 }
 0x1fb   :  { %v2430_v24 = vadd.f32 %v1785_v16, %v1363_v43  ;;  %v4281_v9 = vadd.f32 %v2428_v42, %v4245_v21 }
 0x1fc   :  { %v1893_v52 = vadd.f32 %v1892_v19, %v4278_v39  ;;  %v4287_v36 = vadd.f32 %v2429_v51, %v4242_v50 }
 0x1fd   :  { %v1912_v7 = vadd.f32 %v1911_v22, %v4281_v9  ;;  %v4291_v4 = vadd.f32 %v2430_v24, %v4245_v21 }
 0x1fe   :  { %v1894_v54 = vadd.f32 %v1893_v52, %v4287_v36 }
 0x1ff   :  { %v1367_v31 = vpop.f32.mrb[12].mxu1  ;;  %v1789_v58 = vpop.f32.mrb[12].mxu0  ;;  %v1913_v14 = vadd.f32 %v1912_v7, %v4291_v4 }
 0x200   :  { %v2431_v35 = vadd.f32 %v1789_v58, %v1367_v31  ;;  %v1369_v53 = vpop.f32.mrb[13].mxu1  ;;  %v1791_v33 = vpop.f32.mrb[13].mxu0 }
 0x201   :  { %v2432_v15 = vadd.f32 %v1791_v33, %v1369_v53  ;;  %v1371_v44 = vpop.f32.mrb[14].mxu1  ;;  %v1793_v38 = vpop.f32.mrb[14].mxu0 }
 0x202   :  { %v2433_v40 = vadd.f32 %v1793_v38, %v1371_v44  ;;  %v1373_v5 = vpop.f32.mrb[15].mxu1  ;;  %v1795_v23 = vpop.f32.mrb[15].mxu0  ;;  %v4294_v57 = vadd.f32 %v2431_v35, %v4242_v50 }
 0x203   :  { %v2434_v26 = vadd.f32 %v1795_v23, %v1373_v5  ;;  %v4297_v1 = vadd.f32 %v2432_v15, %v4245_v21 }
 0x204   :  { %v1895_v32 = vadd.f32 %v1894_v54, %v4294_v57  ;;  %v4303_v42 = vadd.f32 %v2433_v40, %v4242_v50 }
 0x205   :  { %v1914_v51 = vadd.f32 %v1913_v14, %v4297_v1  ;;  %v4307_v43 = vadd.f32 %v2434_v26, %v4245_v21 }
 0x206   :  { %v1896_v10 = vadd.f32 %v1895_v32, %v4303_v42 }
 0x207   :  { %v1377_v12 = vpop.f32.mrb[16].mxu1  ;;  %v1799_v30 = vpop.f32.mrb[16].mxu0  ;;  %v1915_v5 = vadd.f32 %v1914_v51, %v4307_v43 }
 0x208   :  { %v2435_v11 = vadd.f32 %v1799_v30, %v1377_v12  ;;  %v1379_v18 = vpop.f32.mrb[17].mxu1  ;;  %v1801_v45 = vpop.f32.mrb[17].mxu0 }
 0x209   :  { %v2436_v27 = vadd.f32 %v1801_v45, %v1379_v18  ;;  %v1381_v37 = vpop.f32.mrb[18].mxu1  ;;  %v1803_v28 = vpop.f32.mrb[18].mxu0 }
 0x20a   :  { %v2437_v25 = vadd.f32 %v1803_v28, %v1381_v37  ;;  %v1383_v55 = vpop.f32.mrb[19].mxu1  ;;  %v1805_v49 = vpop.f32.mrb[19].mxu0  ;;  %v4310_v58 = vadd.f32 %v2435_v11, %v4242_v50 }
 0x20b   :  { %v2438_v6 = vadd.f32 %v1805_v49, %v1383_v55  ;;  %v4313_v8 = vadd.f32 %v2436_v27, %v4245_v21 }
 0x20c   :  { %v1897_v23 = vadd.f32 %v1896_v10, %v4310_v58  ;;  %v4319_v3 = vadd.f32 %v2437_v25, %v4242_v50 }
 0x20d   :  { %v1916_v26 = vadd.f32 %v1915_v5, %v4313_v8  ;;  %v4323_v63 = vadd.f32 %v2438_v6, %v4245_v21 }
 0x20e   :  { %v1898_v52 = vadd.f32 %v1897_v23, %v4319_v3 }
 0x20f   :  { %v1387_v46 = vpop.f32.mrb[20].mxu1  ;;  %v1809_v48 = vpop.f32.mrb[20].mxu0  ;;  %v1917_v7 = vadd.f32 %v1916_v26, %v4323_v63 }
 0x210   :  { %v2439_v16 = vadd.f32 %v1809_v48, %v1387_v46  ;;  %v1389_v24 = vpop.f32.mrb[21].mxu1  ;;  %v1811_v31 = vpop.f32.mrb[21].mxu0 }
 0x211   :  { %v2440_v35 = vadd.f32 %v1811_v31, %v1389_v24  ;;  %v1391_v53 = vpop.f32.mrb[22].mxu1  ;;  %v1813_v33 = vpop.f32.mrb[22].mxu0 }
 0x212   :  { %v2441_v15 = vadd.f32 %v1813_v33, %v1391_v53  ;;  %v1393_v44 = vpop.f32.mrb[23].mxu1  ;;  %v1815_v38 = vpop.f32.mrb[23].mxu0  ;;  %v4326_v19 = vadd.f32 %v2439_v16, %v4242_v50 }
 0x213   :  { %v2442_v40 = vadd.f32 %v1815_v38, %v1393_v44  ;;  %v4329_v22 = vadd.f32 %v2440_v35, %v4245_v21 }
 0x214   :  { %v1899_v6 = vadd.f32 %v1898_v52, %v4326_v19  ;;  %v4338_v54 = vadd.f32 %v2441_v15, %v4242_v50 }
 0x215   :  { %v1918_v14 = vadd.f32 %v1917_v7, %v4329_v22  ;;  %v4343_v32 = vadd.f32 %v2442_v40, %v4245_v21 }
 0x217   :  { %v1397_v12 = vpop.f32.mrb[28].mxu1  ;;  %v1819_v30 = vpop.f32.mrb[28].mxu0  ;;  %v1919_v16 = vadd.f32 %v1918_v14, %v4343_v32 }
 0x218   :  { %v1398_v11 = vadd.f32 %v1397_v12, %v4226_v20  ;;  %v1399_v18 = vpop.f32.mrb[29].mxu1  ;;  %v1821_v45 = vpop.f32.mrb[29].mxu0 }
 0x219   :  { %v1400_v27 = vadd.f32 %v1399_v18, %v4230_v41  ;;  %v1401_v37 = vpop.f32.mrb[30].mxu1  ;;  %v1823_v28 = vpop.f32.mrb[30].mxu0 }
 0x21a   :  { %v1626_v25 = vadd.f32 %v4228_v56, %v1398_v11  ;;  %v1402_v55 = vpop.f32.mrb[31].mxu1  ;;  %v1824_v49 = vpop.f32.mrb[31].mxu0  ;;  %v1900_v56 = vadd.f32 %v1899_v6, %v4338_v54 }
 0x21b   :  { %v1627_v20 = vadd.f32 %v4232_v60, %v1400_v27 }
 0x21c   :  { %v1850_v41 = vadd.f32 %v1819_v30, %v1626_v25 }
 0x21d   :  { %v1851_v46 = vadd.f32 %v1821_v45, %v1627_v20 }
 0x21e   :  { %v4346_v48 = vadd.f32 %v4242_v50, %v1850_v41 }
 0x21f   :  { %v4350_v51 = vadd.f32 %v4245_v21, %v1851_v46 }
 0x220   :  { %v1901_v60 = vsel %vm498_vm1, %v4346_v48, 0.0 }
 0x221   :  { %v1902_v24 = vadd.f32 %v1901_v60, %v1900_v56  ;;  %v1920_v31 = vsel %vm498_vm1, %v4350_v51, 0.0 }
 0x222   :  { %v1921_v35 = vadd.f32 %v1920_v31, %v1919_v16 }
 0x223   :  { %v1903_v53 = vrot.slane %v1902_v24, 4 }
 0x224   :  { %v1922_v33 = vrot.slane %v1921_v35, 4 }
 0x225   :  { %v1904_v15 = vadd.f32 %v1903_v53, %v1902_v24 }
 0x226   :  { %v1923_v50 = vadd.f32 %v1922_v33, %v1921_v35 }
 0x227   :  { %v1905_v44 = vrot.slane %v1904_v15, 2 }
 0x228   :  { %v1924_v38 = vrot.slane %v1923_v50, 2 }
 0x229   :  { %v1906_v10 = vadd.f32 %v1905_v44, %v1904_v15 }
 0x22a   :  { %v1925_v40 = vadd.f32 %v1924_v38, %v1923_v50 }
 0x22b   :  { %v1907_v21 = vrot.slane %v1906_v10, 1 }
 0x22c   :  { %v1926_v5 = vrot.slane %v1925_v40, 1 }
 0x22d   :  { %v1908_v23 = vadd.f32 %v1907_v21, %v1906_v10 }
 0x22e   :  { %v1927_v26 = vadd.f32 %v1926_v5, %v1925_v40 }
 0x22f   :  { %1929 = vrot.lane.b32.xlu1 %v1908_v23, %s2612_s6 }
 0x230   :  { %1935 = vrot.lane.b32.xlu0 %v1927_v26, %s2612_s6 }
 0x2a1   :  { %v1930_v12 = vpop.permute.xlu1 %1929 }
 0x2a2   :  { %v1932_v30 = vadd.f32 %v1930_v12, %v1908_v23  ;;  %v1936_v18 = vpop.permute.xlu0 %1935 }
 0x2a4   :  { %v1933_v11 = vadd.f32 %v1932_v30, %v1927_v26 }
 0x2a6   :  { %v1938_v45 = vadd.f32 %v1936_v18, %v1933_v11 }
 0x2a8   :  { %v1940_v52 = vmul.f32 0.0025510204, %v1938_v45 }
 0x2aa   :  { %1942 = vrot.lane.b32.xlu1 %v1940_v52, %s2612_s6 }
 0x31c   :  { %v1943_v27 = vpop.permute.xlu1 %1942 }
 0x31d   :  { %v1946_v37 = vsel %vm1945_vm4, %v1940_v52, %v1943_v27 }
 0x31e   :  { %v4362_v28 = vrot.slane %v1946_v37, %v4234_v47 }
 0x320   :  { %v4366_v7 = vsub.f32 %v4260_v62, %v4362_v28  ;;  %v4370_v25 = vsub.f32 %v4251_v17, %v4362_v28  ;;  %v4374_v55 = vsub.f32 %v4263_v13, %v4362_v28  ;;  %v4382_v20 = vsub.f32 %v4275_v59, %v4362_v28 }
 0x321   :  { %v4386_v62 = vsub.f32 %v4281_v9, %v4362_v28  ;;  %v4392_v13 = vsub.f32 %v4254_v29, %v4362_v28  ;;  %v4396_v41 = vsub.f32 %v4248_v34, %v4362_v28  ;;  %v4400_v59 = vsub.f32 %v4291_v4, %v4362_v28 }
 0x322   :  { %v1978_v49 = vmul.f32 %v4366_v7, %v4366_v7  ;;  %v1980_v6 = vmul.f32 %v4370_v25, %v4370_v25  ;;  %v1982_v17 = vmul.f32 %v4374_v55, %v4374_v55  ;;  %v1984_v9 = vmul.f32 %v4382_v20, %v4382_v20 }
 0x323   :  { %v4406_v56 = vsub.f32 %v4297_v1, %v4362_v28  ;;  %v1986_v29 = vmul.f32 %v4386_v62, %v4386_v62  ;;  %v4412_v34 = vsub.f32 %v4257_v61, %v4362_v28  ;;  %v1977_v4 = vmul.f32 %v4392_v13, %v4392_v13 }
 0x324   :  { %v2022_v14 = vadd.f32 %v1980_v6, %v1978_v49  ;;  %v4418_v60 = vsub.f32 %v4307_v43, %v4362_v28  ;;  %v1979_v24 = vmul.f32 %v4396_v41, %v4396_v41  ;;  %v1988_v1 = vmul.f32 %v4400_v59, %v4400_v59 }
 0x325   :  { %v4426_v35 = vsub.f32 %v4271_v0, %v4362_v28  ;;  %v4430_v61 = vsub.f32 %v4313_v8, %v4362_v28  ;;  %v1990_v53 = vmul.f32 %v4406_v56, %v4406_v56  ;;  %v4436_v33 = vsub.f32 %v4278_v39, %v4362_v28 }
 0x326   :  { %v2023_v46 = vadd.f32 %v2022_v14, %v1982_v17  ;;  %v1981_v15 = vmul.f32 %v4412_v34, %v4412_v34  ;;  %v2003_v50 = vadd.f32 %v1979_v24, %v1977_v4  ;;  %v4442_v0 = vsub.f32 %v4323_v63, %v4362_v28 }
 0x327   :  { %v1992_v8 = vmul.f32 %v4418_v60, %v4418_v60  ;;  %v4448_v38 = vsub.f32 %v4287_v36, %v4362_v28  ;;  %v1983_v39 = vmul.f32 %v4426_v35, %v4426_v35  ;;  %v4454_v40 = vsub.f32 %v4329_v22, %v4362_v28 }
 0x328   :  { %v2024_v16 = vadd.f32 %v2023_v46, %v1984_v9  ;;  %v2004_v10 = vadd.f32 %v2003_v50, %v1981_v15  ;;  %v1994_v63 = vmul.f32 %v4430_v61, %v4430_v61  ;;  %v4460_v5 = vsub.f32 %v4294_v57, %v4362_v28 }
 0x329   :  { %v1985_v36 = vmul.f32 %v4436_v33, %v4436_v33  ;;  %v4466_v26 = vsub.f32 %v4343_v32, %v4362_v28  ;;  %v4470_v22 = vsub.f32 %v4350_v51, %v4362_v28  ;;  %v1996_v12 = vmul.f32 %v4442_v0, %v4442_v0 }
 0x32a   :  { %v2025_v31 = vadd.f32 %v2024_v16, %v1986_v29  ;;  %v2005_v23 = vadd.f32 %v2004_v10, %v1983_v39  ;;  %v4476_v57 = vsub.f32 %v4303_v42, %v4362_v28  ;;  %v1987_v11 = vmul.f32 %v4448_v38, %v4448_v38 }
 0x32b   :  { %v1998_v32 = vmul.f32 %v4454_v40, %v4454_v40  ;;  %v4484_v51 = vsub.f32 %v4310_v58, %v4362_v28  ;;  %v1989_v52 = vmul.f32 %v4460_v5, %v4460_v5  ;;  %v2000_v42 = vmul.f32 %v4466_v26, %v4466_v26 }
 0x32c   :  { %v2026_v43 = vadd.f32 %v2025_v31, %v1988_v1  ;;  %v2006_v18 = vadd.f32 %v2005_v23, %v1985_v36  ;;  %v2002_v37 = vmul.f32 %v4470_v22, %v4470_v22  ;;  %v4494_v6 = vsub.f32 %v4319_v3, %v4362_v28 }
 0x32d   :  { %v1991_v17 = vmul.f32 %v4476_v57, %v4476_v57  ;;  %v4500_v9 = vsub.f32 %v4326_v19, %v4362_v28  ;;  %v1993_v46 = vmul.f32 %v4484_v51, %v4484_v51  ;;  %v4507_v4 = vsub.f32 %v4346_v48, %v4362_v28 }
 0x32e   :  { %v2027_v44 = vadd.f32 %v2026_v43, %v1990_v53  ;;  %v2007_v27 = vadd.f32 %v2006_v18, %v1987_v11  ;;  %v2033_v16 = vsel %vm498_vm1, %v2002_v37, 0.0  ;;  %v4511_v24 = vsub.f32 %v4338_v54, %v4362_v28 }
 0x32f   :  { %v1995_v1 = vmul.f32 %v4494_v6, %v4494_v6  ;;  %v1997_v53 = vmul.f32 %v4500_v9, %v4500_v9  ;;  %v2001_v15 = vmul.f32 %v4507_v4, %v4507_v4 }
 0x330   :  { %v2028_v21 = vadd.f32 %v2027_v44, %v1992_v8  ;;  %v2008_v58 = vadd.f32 %v2007_v27, %v1989_v52  ;;  %v1999_v48 = vmul.f32 %v4511_v24, %v4511_v24 }
 0x331   :  { %v2014_v28 = vsel %vm498_vm1, %v2001_v15, 0.0 }
 0x332   :  { %v2029_v30 = vadd.f32 %v2028_v21, %v1994_v63  ;;  %v2009_v29 = vadd.f32 %v2008_v58, %v1991_v17 }
 0x334   :  { %v2030_v45 = vadd.f32 %v2029_v30, %v1996_v12  ;;  %v2010_v19 = vadd.f32 %v2009_v29, %v1993_v46  ;;  %v2128_v46 = vld [vmem:[%s4679_s8] sm:$0x3] }
 0x336   :  { %v2031_v49 = vadd.f32 %v2030_v45, %v1998_v32  ;;  %v2011_v43 = vadd.f32 %v2010_v19, %v1995_v1  ;;  %v4536_v19 = vrot.slane %v2128_v46, %v4234_v47 }
 0x338   :  { %v2032_v14 = vadd.f32 %v2031_v49, %v2000_v42  ;;  %v2012_v8 = vadd.f32 %v2011_v43, %v1997_v53 }
 0x33a   :  { %v2034_v3 = vadd.f32 %v2033_v16, %v2032_v14  ;;  %v2013_v54 = vadd.f32 %v2012_v8, %v1999_v48  ;;  %v2090_v14 = vld [vmem:[%s4678_s7] sm:$0x3] }
 0x33b   :  { %v2099_v1 = vrot.slane %v2090_v14, %v4239_v2 }
 0x33c   :  { %v2035_v31 = vrot.slane %v2034_v3, 4  ;;  %v2015_v10 = vadd.f32 %v2014_v28, %v2013_v54 }
 0x33e   :  { %v2036_v50 = vadd.f32 %v2035_v31, %v2034_v3  ;;  %v2016_v21 = vrot.slane %v2015_v10, 4  ;;  %v2095_v3 = vrot.slane %v2090_v14, %v4234_v47  ;;  %v4539_v31 = vrot.slane %v2128_v46, %v4239_v2 }
 0x340   :  { %v2037_v44 = vrot.slane %v2036_v50, 2  ;;  %v2017_v23 = vadd.f32 %v2016_v21, %v2015_v10 }
 0x342   :  { %v2038_v39 = vadd.f32 %v2037_v44, %v2036_v50  ;;  %v2018_v12 = vrot.slane %v2017_v23, 2 }
 0x344   :  { %v2039_v63 = vrot.slane %v2038_v39, 1  ;;  %v2019_v30 = vadd.f32 %v2018_v12, %v2017_v23 }
 0x346   :  { %v2040_v36 = vadd.f32 %v2039_v63, %v2038_v39  ;;  %v2020_v11 = vrot.slane %v2019_v30, 1 }
 0x348   :  { %2048 = vrot.lane.b32.xlu1 %v2040_v36, %s2612_s6  ;;  %v2021_v18 = vadd.f32 %v2020_v11, %v2019_v30 }
 0x34a   :  { %2042 = vrot.lane.b32.xlu0 %v2021_v18, %s2612_s6 }
 0x3ba   :  { %v2049_v27 = vpop.permute.xlu1 %2048 }
 0x3bc   :  { %v2043_v32 = vpop.permute.xlu0 %2042 }
 0x3bd   :  { %v2045_v45 = vadd.f32 %v2043_v32, %v2021_v18 }
 0x3bf   :  { %v2046_v52 = vadd.f32 %v2045_v45, %v2040_v36 }
 0x3c1   :  { %v2051_v42 = vadd.f32 %v2049_v27, %v2046_v52 }
 0x3c3   :  { %v2052_v37 = vmul.f32 0.0025510204, %v2051_v42 }
 0x3c5   :  { %2054 = vrot.lane.b32.xlu0 %v2052_v37, %s2612_s6 }
 0x437   :  { %v2055_v49 = vpop.permute.xlu0 %2054 }
 0x438   :  { %v2057_v17 = vsel %vm1945_vm4, %v2052_v37, %v2055_v49 }
 0x439   :  { %v2058_v58 = vadd.f32 1e-05, %v2057_v17 }
 0x43b   :  { %2594 = vrsqrt.f32 %v2058_v58 }
 0x445   :  { %v2595_v29 = vpop.eup %2594 }
 0x446   :  { %v2063_v16 = vrot.slane %v2595_v29, %v4234_v47 }
 0x448   :  { %v2064_v53 = vmul.f32 %v2063_v16, %v4392_v13  ;;  %v2065_v43 = vmul.f32 %v2063_v16, %v4366_v7  ;;  %v2066_v15 = vmul.f32 %v2063_v16, %v4396_v41  ;;  %v2067_v50 = vmul.f32 %v2063_v16, %v4370_v25 }
 0x449   :  { %v2068_v48 = vmul.f32 %v2063_v16, %v4412_v34  ;;  %v2069_v8 = vmul.f32 %v2063_v16, %v4374_v55  ;;  %v2070_v44 = vmul.f32 %v2063_v16, %v4426_v35  ;;  %v2071_v47 = vmul.f32 %v2063_v16, %v4382_v20 }
 0x44a   :  { %v2072_v54 = vmul.f32 %v2063_v16, %v4436_v33  ;;  %v2073_v2 = vmul.f32 %v2063_v16, %v4386_v62  ;;  %v2074_v13 = vmul.f32 %v2063_v16, %v4448_v38  ;;  %v2075_v7 = vmul.f32 %v2063_v16, %v4400_v59 }
 0x44b   :  { %v2076_v41 = vmul.f32 %v2063_v16, %v4460_v5  ;;  %v2077_v25 = vmul.f32 %v2063_v16, %v4406_v56  ;;  %v2078_v34 = vmul.f32 %v2063_v16, %v4476_v57  ;;  %v2079_v55 = vmul.f32 %v2063_v16, %v4418_v60 }
 0x44c   :  { %v2080_v35 = vmul.f32 %v2063_v16, %v4484_v51  ;;  %v2081_v20 = vmul.f32 %v2063_v16, %v4430_v61  ;;  %v2082_v33 = vmul.f32 %v2063_v16, %v4494_v6  ;;  %v2083_v62 = vmul.f32 %v2063_v16, %v4442_v0 }
 0x44d   :  { %v2084_v38 = vmul.f32 %v2063_v16, %v4500_v9  ;;  %v2085_v59 = vmul.f32 %v2063_v16, %v4454_v40  ;;  %v2086_v5 = vmul.f32 %v2063_v16, %v4511_v24  ;;  %v2087_v56 = vmul.f32 %v2063_v16, %v4466_v26 }
 0x44e   :  { %v2088_v57 = vmul.f32 %v2063_v16, %v4507_v4  ;;  %v2089_v60 = vmul.f32 %v2063_v16, %v4470_v22  ;;  %v2102_v28 = vmul.f32 %v2095_v3, %v2064_v53  ;;  %v2103_v51 = vmul.f32 %v2099_v1, %v2065_v43 }
 0x44f   :  { %v2104_v39 = vmul.f32 %v2095_v3, %v2066_v15  ;;  %v2105_v61 = vmul.f32 %v2099_v1, %v2067_v50  ;;  %v2106_v10 = vmul.f32 %v2095_v3, %v2068_v48  ;;  %v2107_v6 = vmul.f32 %v2099_v1, %v2069_v8 }
 0x450   :  { %v2108_v63 = vmul.f32 %v2095_v3, %v2070_v44  ;;  %v2109_v0 = vmul.f32 %v2099_v1, %v2071_v47  ;;  %v2110_v21 = vmul.f32 %v2095_v3, %v2072_v54  ;;  %v2111_v9 = vmul.f32 %v2099_v1, %v2073_v2 }
 0x451   :  { %v2112_v36 = vmul.f32 %v2095_v3, %v2074_v13  ;;  %v2113_v40 = vmul.f32 %v2099_v1, %v2075_v7  ;;  %v2114_v23 = vmul.f32 %v2095_v3, %v2076_v41  ;;  %v2115_v24 = vmul.f32 %v2099_v1, %v2077_v25 }
 0x452   :  { %v2116_v12 = vmul.f32 %v2095_v3, %v2078_v34  ;;  %v2117_v26 = vmul.f32 %v2099_v1, %v2079_v55  ;;  %v2118_v30 = vmul.f32 %v2095_v3, %v2080_v35  ;;  %v2119_v4 = vmul.f32 %v2099_v1, %v2081_v20 }
 0x453   :  { %v2120_v11 = vmul.f32 %v2095_v3, %v2082_v33  ;;  %v2121_v22 = vmul.f32 %v2099_v1, %v2083_v62  ;;  %v2122_v18 = vmul.f32 %v2095_v3, %v2084_v38  ;;  %v2123_v32 = vmul.f32 %v2099_v1, %v2085_v59 }
 0x454   :  { %v2124_v45 = vmul.f32 %v2095_v3, %v2086_v5  ;;  %v2125_v52 = vmul.f32 %v2099_v1, %v2087_v56  ;;  %v2126_v27 = vmul.f32 %v2095_v3, %v2088_v57  ;;  %v2127_v42 = vmul.f32 %v2099_v1, %v2089_v60 }
 0x455   :  { %v2140_v37 = vadd.f32 %v4536_v19, %v2102_v28  ;;  %v2141_v49 = vadd.f32 %v4539_v31, %v2103_v51  ;;  %v2142_v17 = vadd.f32 %v4536_v19, %v2104_v39  ;;  %v2143_v58 = vadd.f32 %v4539_v31, %v2105_v61 }
 0x456   :  { %v2144_v14 = vadd.f32 %v4536_v19, %v2106_v10  ;;  %v2145_v46 = vadd.f32 %v4539_v31, %v2107_v6  ;;  %v2146_v29 = vadd.f32 %v4536_v19, %v2108_v63  ;;  %v2147_v16 = vadd.f32 %v4539_v31, %v2109_v0 }
 0x457   :  { %v2148_v53 = vadd.f32 %v4536_v19, %v2110_v21  ;;  %v2149_v3 = vadd.f32 %v4539_v31, %v2111_v9  ;;  %v2150_v1 = vadd.f32 %v4536_v19, %v2112_v36  ;;  %v2151_v43 = vadd.f32 %v4539_v31, %v2113_v40 }
 0x458   :  { %v2152_v15 = vadd.f32 %v4536_v19, %v2114_v23  ;;  %v2153_v50 = vadd.f32 %v4539_v31, %v2115_v24  ;;  %v2154_v48 = vadd.f32 %v4536_v19, %v2116_v12  ;;  %v2155_v8 = vadd.f32 %v4539_v31, %v2117_v26 }
 0x459   :  { %v2156_v44 = vadd.f32 %v4536_v19, %v2118_v30  ;;  %v2157_v47 = vadd.f32 %v4539_v31, %v2119_v4  ;;  %v2158_v54 = vadd.f32 %v4536_v19, %v2120_v11  ;;  %v2159_v2 = vadd.f32 %v4539_v31, %v2121_v22 }
 0x45a   :  { %v2160_v13 = vadd.f32 %v4536_v19, %v2122_v18  ;;  %v2161_v7 = vadd.f32 %v4539_v31, %v2123_v32  ;;  %v2162_v41 = vadd.f32 %v4536_v19, %v2124_v45  ;;  %v2163_v25 = vadd.f32 %v4539_v31, %v2125_v52 }
 0x45b   :  { %v2164_v34 = vadd.f32 %v4536_v19, %v2126_v27  ;;  %v2165_v55 = vadd.f32 %v4539_v31, %v2127_v42  ;;  %v2166_v35 = vmax.f32 %v2140_v37, 0.0  ;;  %v2167_v20 = vmax.f32 %v2141_v49, 0.0 }
 0x45c   :  { %v2168_v33 = vmax.f32 %v2142_v17, 0.0  ;;  %v2169_v62 = vmax.f32 %v2143_v58, 0.0  ;;  %v2170_v38 = vmax.f32 %v2144_v14, 0.0  ;;  %v2171_v59 = vmax.f32 %v2145_v46, 0.0 }
 0x45d   :  { %v2172_v5 = vmax.f32 %v2146_v29, 0.0  ;;  %v2173_v56 = vmax.f32 %v2147_v16, 0.0  ;;  %v2174_v57 = vmax.f32 %v2148_v53, 0.0  ;;  %v2175_v60 = vmax.f32 %v2149_v3, 0.0  ;;  %2192 = vst [vmem:[%s4682_s11] sm:$0xff] %v2166_v35  ;;  %2193 = vst [vmem:[%s4682_s11 + $0x8] sm:$0xff] %v2167_v20 }
 0x45e   :  { %v2176_v19 = vmax.f32 %v2150_v1, 0.0  ;;  %v2177_v31 = vmax.f32 %v2151_v43, 0.0  ;;  %v2178_v28 = vmax.f32 %v2152_v15, 0.0  ;;  %v2179_v51 = vmax.f32 %v2153_v50, 0.0  ;;  %2194 = vst [vmem:[%s4682_s11 + $0x10] sm:$0xff] %v2168_v33  ;;  %2195 = vst [vmem:[%s4682_s11 + $0x18] sm:$0xff] %v2169_v62 }
 0x45f   :  { %2196 = vst [vmem:[%s4682_s11 + $0x20] sm:$0xff] %v2170_v38  ;;  %2197 = vst [vmem:[%s4682_s11 + $0x28] sm:$0xff] %v2171_v59  ;;  %v2180_v39 = vmax.f32 %v2154_v48, 0.0  ;;  %v2181_v61 = vmax.f32 %v2155_v8, 0.0  ;;  %v2182_v10 = vmax.f32 %v2156_v44, 0.0  ;;  %v2183_v6 = vmax.f32 %v2157_v47, 0.0 }
 0x460   :  { %2198 = vst [vmem:[%s4682_s11 + $0x30] sm:$0xff] %v2172_v5  ;;  %2199 = vst [vmem:[%s4682_s11 + $0x38] sm:$0xff] %v2173_v56  ;;  %v2184_v63 = vmax.f32 %v2158_v54, 0.0  ;;  %v2185_v0 = vmax.f32 %v2159_v2, 0.0  ;;  %v2186_v21 = vmax.f32 %v2160_v13, 0.0  ;;  %v2187_v9 = vmax.f32 %v2161_v7, 0.0 }
 0x461   :  { %2200 = vst [vmem:[%s4682_s11 + $0x40] sm:$0xff] %v2174_v57  ;;  %2201 = vst [vmem:[%s4682_s11 + $0x48] sm:$0xff] %v2175_v60  ;;  %v2188_v36 = vmax.f32 %v2162_v41, 0.0  ;;  %v2189_v40 = vmax.f32 %v2163_v25, 0.0  ;;  %v2190_v23 = vmax.f32 %v2164_v34, 0.0  ;;  %v2191_v24 = vmax.f32 %v2165_v55, 0.0 }
 0x462   :  { %2202 = vst [vmem:[%s4682_s11 + $0x50] sm:$0xff] %v2176_v19  ;;  %2203 = vst [vmem:[%s4682_s11 + $0x58] sm:$0xff] %v2177_v31 }
 0x463   :  { %2204 = vst [vmem:[%s4682_s11 + $0x60] sm:$0xff] %v2178_v28  ;;  %2205 = vst [vmem:[%s4682_s11 + $0x68] sm:$0xff] %v2179_v51 }
 0x464   :  { %2206 = vst [vmem:[%s4682_s11 + $0x70] sm:$0xff] %v2180_v39  ;;  %2207 = vst [vmem:[%s4682_s11 + $0x78] sm:$0xff] %v2181_v61 }
 0x465   :  { %2208 = vst [vmem:[%s4682_s11 + $0x80] sm:$0xff] %v2182_v10  ;;  %2209 = vst [vmem:[%s4682_s11 + $0x88] sm:$0xff] %v2183_v6 }
 0x466   :  { %2210 = vst [vmem:[%s4682_s11 + $0x90] sm:$0xff] %v2184_v63  ;;  %2211 = vst [vmem:[%s4682_s11 + $0x98] sm:$0xff] %v2185_v0 }
 0x467   :  { %2212 = vst [vmem:[%s4682_s11 + $0xa0] sm:$0xff] %v2186_v21  ;;  %2213 = vst [vmem:[%s4682_s11 + $0xa8] sm:$0xff] %v2187_v9 }
 0x468   :  { %2214 = vst [vmem:[%s4682_s11 + $0xb0] sm:$0xff] %v2188_v36  ;;  %2215 = vst [vmem:[%s4682_s11 + $0xb8] sm:$0xff] %v2189_v40 }
 0x469   :  { %2216 = vst [vmem:[%s4682_s11 + $0xc0] sm:$0x3] %v2190_v23  ;;  %2217 = vst [vmem:[%s4682_s11 + $0xc8] sm:$0x3] %v2191_v24 }
 0x46a   :  { %2222 = vsyncpa [#allocation3], 1 }

</bundles_post_ra>
